<compile_context>
chip_gen: v6e
topology: v6e:2x2x1
jax: 0.10.0
libtpu: 0.0.40
codegen_flags: <defaults>
</compile_context>

<pallas_src>
import functools

import jax
import jax.numpy as jnp
from jax import lax
from jax.experimental import pallas as pl
from jax.experimental.pallas import tpu as pltpu


def _round_up(x, m):
    return ((x + m - 1) // m) * m


def _lstm_fc_kernel(tok_ref, emb_ref, w_ih_ref, w_hh_ref, b_ref,
                    w_fc_ref, b_fc_ref, out_ref,
                    seq_ref, xw_ref, h_ref, *, T, B, H, L):
    """Fused embedding gather + multi-layer LSTM + V-tiled FC head.

    Grid: (V_pad // fc_tile,), "arbitrary" (sequential). The LSTM runs once at
    grid step 0 (pl.when) with its final hidden state parked in persistent
    VMEM scratch; every grid step emits one lane-dense logits tile while the
    next FC weight tile is DMA'd in behind it by the BlockSpec pipeline.
    """

    @pl.when(pl.program_id(0) == 0)
    def _run_lstm():
        # ---- fused embedding gather: SMEM token scalars -> seq_ref ----------
        # TODO(synk): for large vocab keep emb in HBM (pl.ANY) and gather rows
        # with manual async copies instead of holding the table resident.
        for t in range(T):
            for bb in range(B):
                tok = tok_ref[bb, t]
                seq_ref[pl.ds(t * B + bb, 1), :] = emb_ref[pl.ds(tok, 1), :]

        # ---- LSTM stack ------------------------------------------------------
        h = jnp.zeros((B, H), jnp.float32)
        for layer in range(L):  # static unroll over layers
            # Hoisted input projection: one bf16 MXU matmul for all T steps,
            # written to VMEM scratch so the unrolled recurrence does not carry
            # it as a live SSA value (bounds vreg pressure at large H).
            xw_ref[...] = (
                jnp.dot(seq_ref[...].astype(jnp.bfloat16), w_ih_ref[layer],
                        preferred_element_type=jnp.float32)
                + b_ref[layer])

            w_hh_l = w_hh_ref[layer]                      # (H, 4H) bf16
            last_layer = layer == L - 1

            def step(t, carry, w_hh_l=w_hh_l, last_layer=last_layer):
                h, c = carry
                row = pl.multiple_of(t * B, 8)
                gates = xw_ref[pl.ds(row, B), :] + jnp.dot(
                    h.astype(jnp.bfloat16), w_hh_l,
                    preferred_element_type=jnp.float32)    # (B, 4H) f32
                # Gate order [i, f, o, g]: sigmoid over a single contiguous 3H
                # region, tanh over the trailing H only.
                sg = jax.nn.sigmoid(gates[:, :3 * H])
                g_g = jnp.tanh(gates[:, 3 * H:])
                i_g = sg[:, 0 * H:1 * H]
                f_g = sg[:, 1 * H:2 * H]
                o_g = sg[:, 2 * H:3 * H]
                c = f_g * c + i_g * g_g
                h = o_g * jnp.tanh(c)
                if not last_layer:
                    # Only materialize the sequence for a consuming layer.
                    seq_ref[pl.ds(row, B), :] = h
                return h, c

            h, _ = lax.fori_loop(
                0, T, step,
                (jnp.zeros((B, H), jnp.float32),
                 jnp.zeros((B, H), jnp.float32)),
                unroll=True)

        h_ref[...] = h                                     # lstm_out[:, -1, :]

    # ---- FC head: one lane-dense V tile per grid step ------------------------
    out_ref[...] = (
        jnp.dot(h_ref[...].astype(jnp.bfloat16), w_fc_ref[...],
                preferred_element_type=jnp.float32)
        + b_fc_ref[...])


def prepare_params(params, *, fc_tile_target=2048):
    """One-time conversion of PyTorch-layout params into the kernel layout.

    Runs once at load time (NOT per forward call): gate reorder
    [i, f, g, o] -> [i, f, o, g], weight transposes, vocab padding and bf16
    casts of every MXU operand.
    """
    emb = jnp.asarray(params["emb"], jnp.float32)            # (V, E)
    w_ih = jnp.asarray(params["w_ih"], jnp.float32)          # (L, 4H, H)
    w_hh = jnp.asarray(params["w_hh"], jnp.float32)          # (L, 4H, H)
    b = jnp.asarray(params["b"], jnp.float32)                # (L, 1, 4H)
    w_fc = jnp.asarray(params["w_fc"], jnp.float32)          # (V, H)
    b_fc = jnp.asarray(params["b_fc"], jnp.float32)          # (1, V)

    L, four_h, H = w_ih.shape
    V = w_fc.shape[0]
    assert four_h == 4 * H
    assert emb.shape[1] == H, "kernel assumes embed_size == hidden_size"

    # PyTorch gate order [i, f, g, o] -> kernel order [i, f, o, g].
    perm = jnp.concatenate([
        jnp.arange(0 * H, 2 * H),      # i, f
        jnp.arange(3 * H, 4 * H),      # o
        jnp.arange(2 * H, 3 * H)])     # g

    w_ih_t = jnp.transpose(w_ih[:, perm, :], (0, 2, 1)).astype(jnp.bfloat16)
    w_hh_t = jnp.transpose(w_hh[:, perm, :], (0, 2, 1)).astype(jnp.bfloat16)
    b_p = b[:, :, perm]                                      # (L, 1, 4H) f32

    # Vocab padded lane-dense; FC head tiled over V (streamed, caps VMEM —
    # tile sized so 2x double-buffered bf16 tiles stay small even on v7x).
    V_pad = _round_up(V, 128)
    if V_pad > fc_tile_target:
        fc_tile = fc_tile_target
        V_pad = _round_up(V_pad, fc_tile)
    else:
        fc_tile = V_pad
    w_fc_t = jnp.pad(w_fc.T, ((0, 0), (0, V_pad - V))).astype(jnp.bfloat16)
    b_fc_p = jnp.pad(b_fc, ((0, 0), (0, V_pad - V)))

    arrays = {"emb": emb, "w_ih_t": w_ih_t, "w_hh_t": w_hh_t, "b": b_p,
              "w_fc_t": w_fc_t, "b_fc": b_fc_p}
    config = {"vocab_size": int(V), "fc_tile": int(fc_tile)}
    return arrays, config


@functools.partial(jax.jit, static_argnames=("vocab_size", "fc_tile"))
def next_word_lstm_forward(tokens, arrays, *, vocab_size, fc_tile):
    """Forward pass equivalent to NextWordLSTM.forward (repetition_penalty=1.0)."""
    emb = arrays["emb"]            # (V, H)    f32
    w_ih_t = arrays["w_ih_t"]      # (L, H, 4H) bf16
    w_hh_t = arrays["w_hh_t"]      # (L, H, 4H) bf16
    b = arrays["b"]                # (L, 1, 4H) f32
    w_fc_t = arrays["w_fc_t"]      # (H, V_pad) bf16
    b_fc = arrays["b_fc"]          # (1, V_pad) f32

    B, T = tokens.shape
    L, H, four_h = w_ih_t.shape
    V_pad = w_fc_t.shape[1]
    num_v_blocks = V_pad // fc_tile

    # Pad batch to full sublanes. TODO(synk): the padded rows ride the same
    # sublanes/MXU pass for free — callers can pack up to B_pad real sequences.
    B_pad = _round_up(max(B, 8), 8)
    tokens_p = jnp.pad(tokens.astype(jnp.int32), ((0, B_pad - B), (0, 0)))

    kernel = functools.partial(_lstm_fc_kernel, T=T, B=B_pad, H=H, L=L)

    grid_spec = pltpu.PrefetchScalarGridSpec(
        num_scalar_prefetch=1,              # tokens -> SMEM
        grid=(num_v_blocks,),
        in_specs=[
            pl.BlockSpec(emb.shape, lambda j, tok: (0, 0)),
            pl.BlockSpec(w_ih_t.shape, lambda j, tok: (0, 0, 0)),
            pl.BlockSpec(w_hh_t.shape, lambda j, tok: (0, 0, 0)),
            pl.BlockSpec(b.shape, lambda j, tok: (0, 0, 0)),
            pl.BlockSpec((H, fc_tile), lambda j, tok: (0, j)),
            pl.BlockSpec((1, fc_tile), lambda j, tok: (0, j)),
        ],
        out_specs=pl.BlockSpec((B_pad, fc_tile), lambda j, tok: (0, j)),
        scratch_shapes=[
            pltpu.VMEM((T * B_pad, H), jnp.float32),       # seq buffer
            pltpu.VMEM((T * B_pad, four_h), jnp.float32),  # hoisted projection
            pltpu.VMEM((B_pad, H), jnp.float32),           # h_last (persists)
        ],
    )

    # VMEM budget sized from the actual buffers, with 2x headroom for the
    # double-buffered FC / output tiles and compiler scratch.
    resident = (emb.size * 4 + w_ih_t.size * 2 + w_hh_t.size * 2 + b.size * 4
                + 2 * (H * fc_tile * 2 + fc_tile * 4)      # FC weight+bias tiles
                + 2 * (B_pad * fc_tile * 4)                # out tiles
                + T * B_pad * H * 4 + T * B_pad * four_h * 4 + B_pad * H * 4)
    vmem_limit = int(min(max(2 * resident, 16 * 2**20), 100 * 2**20))

    cost = pl.CostEstimate(
        flops=int(4 * L * T * B_pad * H * four_h + 2 * B_pad * H * V_pad),
        transcendentals=int(L * T * B_pad * 5 * H),
        bytes_accessed=int(tokens_p.size * 4 + emb.size * 4
                           + (w_ih_t.size + w_hh_t.size + w_fc_t.size) * 2
                           + (b.size + b_fc.size) * 4 + B_pad * V_pad * 4),
    )

    out = pl.pallas_call(
        kernel,
        out_shape=jax.ShapeDtypeStruct((B_pad, V_pad), jnp.float32),
        grid_spec=grid_spec,
        compiler_params=pltpu.CompilerParams(
            dimension_semantics=("arbitrary",),
            vmem_limit_bytes=vmem_limit),
        cost_estimate=cost,
    )(tokens_p, emb, w_ih_t, w_hh_t, b, w_fc_t, b_fc)

    return out[:B, :vocab_size]


def make_params(key, vocab_size, embed_size, hidden_size, num_layers):
    """Random params in the PyTorch nn.LSTM / nn.Linear layout."""
    assert embed_size == hidden_size, "kernel stacks per-layer w_ih uniformly"
    k = 1.0 / jnp.sqrt(hidden_size)
    keys = jax.random.split(key, 4 + 4 * num_layers)
    emb = jax.random.normal(keys[0], (vocab_size, embed_size), jnp.float32)

    w_ih, w_hh, b = [], [], []
    for layer in range(num_layers):
        k0, k1, k2, k3 = keys[4 + 4 * layer: 8 + 4 * layer]
        w_ih.append(jax.random.uniform(k0, (4 * hidden_size, hidden_size),
                                       jnp.float32, -k, k))
        w_hh.append(jax.random.uniform(k1, (4 * hidden_size, hidden_size),
                                       jnp.float32, -k, k))
        b_ih = jax.random.uniform(k2, (4 * hidden_size,), jnp.float32, -k, k)
        b_hh = jax.random.uniform(k3, (4 * hidden_size,), jnp.float32, -k, k)
        b.append((b_ih + b_hh)[None, :])
    w_fc = jax.random.uniform(keys[1], (vocab_size, hidden_size),
                              jnp.float32, -k, k)
    b_fc = jax.random.uniform(keys[2], (1, vocab_size), jnp.float32, -k, k)

    return {
        "emb": emb,
        "w_ih": jnp.stack(w_ih, axis=0),
        "w_hh": jnp.stack(w_hh, axis=0),
        "b": jnp.stack(b, axis=0),
        "w_fc": w_fc,
        "b_fc": b_fc,
    }


def ref_forward(tokens, params, matmul_dtype=jnp.float32):
    """Pure-JAX reference mirroring PyTorch nn.LSTM + nn.Linear semantics.

    matmul_dtype lets us also build a reference that makes the same bf16 MXU
    operand casts as the kernel (state / elementwise math stay f32).
    """
    emb = params["emb"]
    L, _, H = params["w_ih"].shape
    B, T = tokens.shape

    def mm(a, w):
        return jnp.dot(a.astype(matmul_dtype), w.astype(matmul_dtype),
                       preferred_element_type=jnp.float32)

    seq = emb[tokens].astype(jnp.float32)           # (B, T, H)
    for layer in range(L):
        w_ih = params["w_ih"][layer]
        w_hh = params["w_hh"][layer]
        bias = params["b"][layer, 0]
        h = jnp.zeros((B, H), jnp.float32)
        c = jnp.zeros((B, H), jnp.float32)
        outs = []
        for t in range(T):
            gates = mm(seq[:, t], w_ih.T) + mm(h, w_hh.T) + bias
            i_g = jax.nn.sigmoid(gates[:, 0 * H:1 * H])
            f_g = jax.nn.sigmoid(gates[:, 1 * H:2 * H])
            g_g = jnp.tanh(gates[:, 2 * H:3 * H])
            o_g = jax.nn.sigmoid(gates[:, 3 * H:4 * H])
            c = f_g * c + i_g * g_g
            h = o_g * jnp.tanh(c)
            outs.append(h)
        seq = jnp.stack(outs, axis=1)
    return mm(seq[:, -1], params["w_fc"].T) + params["b_fc"][0]


if __name__ == "__main__":
    VOCAB, EMBED, HIDDEN, LAYERS = 64, 32, 32, 2
    B, T = 2, 8

    key = jax.random.PRNGKey(0)
    k_params, k_tokens = jax.random.split(key)
    params = make_params(k_params, VOCAB, EMBED, HIDDEN, LAYERS)
    tokens = jax.random.randint(k_tokens, (B, T), 0, VOCAB, dtype=jnp.int32)

    arrays, cfg = prepare_params(params)     # one-time layout / bf16 conversion
    out = next_word_lstm_forward(tokens, arrays,
                                 vocab_size=cfg["vocab_size"],
                                 fc_tile=cfg["fc_tile"])
    out = jax.block_until_ready(out)
    assert out.shape == (B, VOCAB)

    # Tight wiring check vs. a JAX reference that makes the same bf16 MXU casts.
    ref_bf16 = ref_forward(tokens, params, matmul_dtype=jnp.bfloat16)
    err_bf16 = float(jnp.max(jnp.abs(out - ref_bf16)))
    assert err_bf16 < 5e-3, f"bf16-reference mismatch: max abs err {err_bf16}"

    # Sanity check vs. the exact f32 PyTorch-equivalent math (looser tolerance:
    # the kernel deliberately feeds the MXU bf16 operands).
    ref_f32 = ref_forward(tokens, params, matmul_dtype=jnp.float32)
    err_f32 = float(jnp.max(jnp.abs(out - ref_f32)))
    assert err_f32 < 5e-2, f"f32-reference mismatch: max abs err {err_f32}"

    print("KERNEL_OK")
</pallas_src>

<mosaic_0001>
module attributes {stable_mosaic.version = 11 : i64} {
  func.func @_lstm_fc_kernel(%arg0: i32, %arg1: memref<8x8xi32, #tpu.memory_space<smem>>, %arg2: memref<64x32xf32, #tpu.memory_space<vmem>>, %arg3: memref<2x32x128xbf16, #tpu.memory_space<vmem>>, %arg4: memref<2x32x128xbf16, #tpu.memory_space<vmem>>, %arg5: memref<2x1x128xf32, #tpu.memory_space<vmem>>, %arg6: memref<32x128xbf16, #tpu.memory_space<vmem>>, %arg7: memref<1x128xf32, #tpu.memory_space<vmem>>, %arg8: memref<8x128xf32, #tpu.memory_space<vmem>>, %arg9: memref<64x32xf32, #tpu.memory_space<vmem>>, %arg10: memref<64x128xf32, #tpu.memory_space<vmem>>, %arg11: memref<8x32xf32, #tpu.memory_space<vmem>>) attributes {dimension_semantics = [#tpu.dimension_semantics<arbitrary>], iteration_bounds = array<i64: 1>, scalar_prefetch = 1 : i64, scratch_operands = 3 : i64, tpu.core_type = #tpu.core_type<tc>, window_params = [{pipeline_mode = #tpu.pipeline_mode<synchronous>, transform_indices = @transform_0, window_bounds = array<i64: 64, 32>}, {pipeline_mode = #tpu.pipeline_mode<synchronous>, transform_indices = @transform_1, window_bounds = array<i64: 2, 32, 128>}, {pipeline_mode = #tpu.pipeline_mode<synchronous>, transform_indices = @transform_2, window_bounds = array<i64: 2, 32, 128>}, {pipeline_mode = #tpu.pipeline_mode<synchronous>, transform_indices = @transform_3, window_bounds = array<i64: 2, 1, 128>}, {transform_indices = @transform_4, window_bounds = array<i64: 32, 128>}, {transform_indices = @transform_5, window_bounds = array<i64: 1, 128>}, {transform_indices = @transform_6, window_bounds = array<i64: 8, 128>}]} {
    %c0_i32 = arith.constant 0 : i32
    %0 = arith.cmpi eq, %arg0, %c0_i32 : i32
    %1 = arith.extui %0 : i1 to i32
    %c0_i32_0 = arith.constant 0 : i32
    %2 = arith.cmpi ne, %1, %c0_i32_0 : i32
    scf.if %2 {
      %c0_8 = arith.constant 0 : index
      %c0_9 = arith.constant 0 : index
      %11 = memref.load %arg1[%c0_8, %c0_9] : memref<8x8xi32, #tpu.memory_space<smem>>
      %12 = arith.index_cast %11 : i32 to index
      %c0_10 = arith.constant 0 : index
      %13 = vector.load %arg2[%12, %c0_10] : memref<64x32xf32, #tpu.memory_space<vmem>>, vector<1x32xf32>
      %c0_11 = arith.constant 0 : index
      %c0_12 = arith.constant 0 : index
      %14 = vector.load %arg9[%c0_11, %c0_12] : memref<64x32xf32, #tpu.memory_space<vmem>>, vector<1x32xf32>
      tpu.vector_store %arg9[%c0_11, %c0_12], %13 {strides = array<i32>} : memref<64x32xf32, #tpu.memory_space<vmem>>, vector<1x32xf32>,
      %c1 = arith.constant 1 : index
      %c0_13 = arith.constant 0 : index
      %15 = memref.load %arg1[%c1, %c0_13] : memref<8x8xi32, #tpu.memory_space<smem>>
      %16 = arith.index_cast %15 : i32 to index
      %c0_14 = arith.constant 0 : index
      %17 = vector.load %arg2[%16, %c0_14] : memref<64x32xf32, #tpu.memory_space<vmem>>, vector<1x32xf32>
      %c1_15 = arith.constant 1 : index
      %c0_16 = arith.constant 0 : index
      %18 = vector.load %arg9[%c1_15, %c0_16] : memref<64x32xf32, #tpu.memory_space<vmem>>, vector<1x32xf32>
      tpu.vector_store %arg9[%c1_15, %c0_16], %17 {strides = array<i32>} : memref<64x32xf32, #tpu.memory_space<vmem>>, vector<1x32xf32>,
      %c2 = arith.constant 2 : index
      %c0_17 = arith.constant 0 : index
      %19 = memref.load %arg1[%c2, %c0_17] : memref<8x8xi32, #tpu.memory_space<smem>>
      %20 = arith.index_cast %19 : i32 to index
      %c0_18 = arith.constant 0 : index
      %21 = vector.load %arg2[%20, %c0_18] : memref<64x32xf32, #tpu.memory_space<vmem>>, vector<1x32xf32>
      %c2_19 = arith.constant 2 : index
      %c0_20 = arith.constant 0 : index
      %22 = vector.load %arg9[%c2_19, %c0_20] : memref<64x32xf32, #tpu.memory_space<vmem>>, vector<1x32xf32>
      tpu.vector_store %arg9[%c2_19, %c0_20], %21 {strides = array<i32>} : memref<64x32xf32, #tpu.memory_space<vmem>>, vector<1x32xf32>,
      %c3 = arith.constant 3 : index
      %c0_21 = arith.constant 0 : index
      %23 = memref.load %arg1[%c3, %c0_21] : memref<8x8xi32, #tpu.memory_space<smem>>
      %24 = arith.index_cast %23 : i32 to index
      %c0_22 = arith.constant 0 : index
      %25 = vector.load %arg2[%24, %c0_22] : memref<64x32xf32, #tpu.memory_space<vmem>>, vector<1x32xf32>
      %c3_23 = arith.constant 3 : index
      %c0_24 = arith.constant 0 : index
      %26 = vector.load %arg9[%c3_23, %c0_24] : memref<64x32xf32, #tpu.memory_space<vmem>>, vector<1x32xf32>
      tpu.vector_store %arg9[%c3_23, %c0_24], %25 {strides = array<i32>} : memref<64x32xf32, #tpu.memory_space<vmem>>, vector<1x32xf32>,
      %c4 = arith.constant 4 : index
      %c0_25 = arith.constant 0 : index
      %27 = memref.load %arg1[%c4, %c0_25] : memref<8x8xi32, #tpu.memory_space<smem>>
      %28 = arith.index_cast %27 : i32 to index
      %c0_26 = arith.constant 0 : index
      %29 = vector.load %arg2[%28, %c0_26] : memref<64x32xf32, #tpu.memory_space<vmem>>, vector<1x32xf32>
      %c4_27 = arith.constant 4 : index
      %c0_28 = arith.constant 0 : index
      %30 = vector.load %arg9[%c4_27, %c0_28] : memref<64x32xf32, #tpu.memory_space<vmem>>, vector<1x32xf32>
      tpu.vector_store %arg9[%c4_27, %c0_28], %29 {strides = array<i32>} : memref<64x32xf32, #tpu.memory_space<vmem>>, vector<1x32xf32>,
      %c5 = arith.constant 5 : index
      %c0_29 = arith.constant 0 : index
      %31 = memref.load %arg1[%c5, %c0_29] : memref<8x8xi32, #tpu.memory_space<smem>>
      %32 = arith.index_cast %31 : i32 to index
      %c0_30 = arith.constant 0 : index
      %33 = vector.load %arg2[%32, %c0_30] : memref<64x32xf32, #tpu.memory_space<vmem>>, vector<1x32xf32>
      %c5_31 = arith.constant 5 : index
      %c0_32 = arith.constant 0 : index
      %34 = vector.load %arg9[%c5_31, %c0_32] : memref<64x32xf32, #tpu.memory_space<vmem>>, vector<1x32xf32>
      tpu.vector_store %arg9[%c5_31, %c0_32], %33 {strides = array<i32>} : memref<64x32xf32, #tpu.memory_space<vmem>>, vector<1x32xf32>,
      %c6 = arith.constant 6 : index
      %c0_33 = arith.constant 0 : index
      %35 = memref.load %arg1[%c6, %c0_33] : memref<8x8xi32, #tpu.memory_space<smem>>
      %36 = arith.index_cast %35 : i32 to index
      %c0_34 = arith.constant 0 : index
      %37 = vector.load %arg2[%36, %c0_34] : memref<64x32xf32, #tpu.memory_space<vmem>>, vector<1x32xf32>
      %c6_35 = arith.constant 6 : index
      %c0_36 = arith.constant 0 : index
      %38 = vector.load %arg9[%c6_35, %c0_36] : memref<64x32xf32, #tpu.memory_space<vmem>>, vector<1x32xf32>
      tpu.vector_store %arg9[%c6_35, %c0_36], %37 {strides = array<i32>} : memref<64x32xf32, #tpu.memory_space<vmem>>, vector<1x32xf32>,
      %c7 = arith.constant 7 : index
      %c0_37 = arith.constant 0 : index
      %39 = memref.load %arg1[%c7, %c0_37] : memref<8x8xi32, #tpu.memory_space<smem>>
      %40 = arith.index_cast %39 : i32 to index
      %c0_38 = arith.constant 0 : index
      %41 = vector.load %arg2[%40, %c0_38] : memref<64x32xf32, #tpu.memory_space<vmem>>, vector<1x32xf32>
      %c7_39 = arith.constant 7 : index
      %c0_40 = arith.constant 0 : index
      %42 = vector.load %arg9[%c7_39, %c0_40] : memref<64x32xf32, #tpu.memory_space<vmem>>, vector<1x32xf32>
      tpu.vector_store %arg9[%c7_39, %c0_40], %41 {strides = array<i32>} : memref<64x32xf32, #tpu.memory_space<vmem>>, vector<1x32xf32>,
      %c0_41 = arith.constant 0 : index
      %c1_42 = arith.constant 1 : index
      %43 = memref.load %arg1[%c0_41, %c1_42] : memref<8x8xi32, #tpu.memory_space<smem>>
      %44 = arith.index_cast %43 : i32 to index
      %c0_43 = arith.constant 0 : index
      %45 = vector.load %arg2[%44, %c0_43] : memref<64x32xf32, #tpu.memory_space<vmem>>, vector<1x32xf32>
      %c8 = arith.constant 8 : index
      %c0_44 = arith.constant 0 : index
      %46 = vector.load %arg9[%c8, %c0_44] : memref<64x32xf32, #tpu.memory_space<vmem>>, vector<1x32xf32>
      tpu.vector_store %arg9[%c8, %c0_44], %45 {strides = array<i32>} : memref<64x32xf32, #tpu.memory_space<vmem>>, vector<1x32xf32>,
      %c1_45 = arith.constant 1 : index
      %c1_46 = arith.constant 1 : index
      %47 = memref.load %arg1[%c1_45, %c1_46] : memref<8x8xi32, #tpu.memory_space<smem>>
      %48 = arith.index_cast %47 : i32 to index
      %c0_47 = arith.constant 0 : index
      %49 = vector.load %arg2[%48, %c0_47] : memref<64x32xf32, #tpu.memory_space<vmem>>, vector<1x32xf32>
      %c9 = arith.constant 9 : index
      %c0_48 = arith.constant 0 : index
      %50 = vector.load %arg9[%c9, %c0_48] : memref<64x32xf32, #tpu.memory_space<vmem>>, vector<1x32xf32>
      tpu.vector_store %arg9[%c9, %c0_48], %49 {strides = array<i32>} : memref<64x32xf32, #tpu.memory_space<vmem>>, vector<1x32xf32>,
      %c2_49 = arith.constant 2 : index
      %c1_50 = arith.constant 1 : index
      %51 = memref.load %arg1[%c2_49, %c1_50] : memref<8x8xi32, #tpu.memory_space<smem>>
      %52 = arith.index_cast %51 : i32 to index
      %c0_51 = arith.constant 0 : index
      %53 = vector.load %arg2[%52, %c0_51] : memref<64x32xf32, #tpu.memory_space<vmem>>, vector<1x32xf32>
      %c10 = arith.constant 10 : index
      %c0_52 = arith.constant 0 : index
      %54 = vector.load %arg9[%c10, %c0_52] : memref<64x32xf32, #tpu.memory_space<vmem>>, vector<1x32xf32>
      tpu.vector_store %arg9[%c10, %c0_52], %53 {strides = array<i32>} : memref<64x32xf32, #tpu.memory_space<vmem>>, vector<1x32xf32>,
      %c3_53 = arith.constant 3 : index
      %c1_54 = arith.constant 1 : index
      %55 = memref.load %arg1[%c3_53, %c1_54] : memref<8x8xi32, #tpu.memory_space<smem>>
      %56 = arith.index_cast %55 : i32 to index
      %c0_55 = arith.constant 0 : index
      %57 = vector.load %arg2[%56, %c0_55] : memref<64x32xf32, #tpu.memory_space<vmem>>, vector<1x32xf32>
      %c11 = arith.constant 11 : index
      %c0_56 = arith.constant 0 : index
      %58 = vector.load %arg9[%c11, %c0_56] : memref<64x32xf32, #tpu.memory_space<vmem>>, vector<1x32xf32>
      tpu.vector_store %arg9[%c11, %c0_56], %57 {strides = array<i32>} : memref<64x32xf32, #tpu.memory_space<vmem>>, vector<1x32xf32>,
      %c4_57 = arith.constant 4 : index
      %c1_58 = arith.constant 1 : index
      %59 = memref.load %arg1[%c4_57, %c1_58] : memref<8x8xi32, #tpu.memory_space<smem>>
      %60 = arith.index_cast %59 : i32 to index
      %c0_59 = arith.constant 0 : index
      %61 = vector.load %arg2[%60, %c0_59] : memref<64x32xf32, #tpu.memory_space<vmem>>, vector<1x32xf32>
      %c12 = arith.constant 12 : index
      %c0_60 = arith.constant 0 : index
      %62 = vector.load %arg9[%c12, %c0_60] : memref<64x32xf32, #tpu.memory_space<vmem>>, vector<1x32xf32>
      tpu.vector_store %arg9[%c12, %c0_60], %61 {strides = array<i32>} : memref<64x32xf32, #tpu.memory_space<vmem>>, vector<1x32xf32>,
      %c5_61 = arith.constant 5 : index
      %c1_62 = arith.constant 1 : index
      %63 = memref.load %arg1[%c5_61, %c1_62] : memref<8x8xi32, #tpu.memory_space<smem>>
      %64 = arith.index_cast %63 : i32 to index
      %c0_63 = arith.constant 0 : index
      %65 = vector.load %arg2[%64, %c0_63] : memref<64x32xf32, #tpu.memory_space<vmem>>, vector<1x32xf32>
      %c13 = arith.constant 13 : index
      %c0_64 = arith.constant 0 : index
      %66 = vector.load %arg9[%c13, %c0_64] : memref<64x32xf32, #tpu.memory_space<vmem>>, vector<1x32xf32>
      tpu.vector_store %arg9[%c13, %c0_64], %65 {strides = array<i32>} : memref<64x32xf32, #tpu.memory_space<vmem>>, vector<1x32xf32>,
      %c6_65 = arith.constant 6 : index
      %c1_66 = arith.constant 1 : index
      %67 = memref.load %arg1[%c6_65, %c1_66] : memref<8x8xi32, #tpu.memory_space<smem>>
      %68 = arith.index_cast %67 : i32 to index
      %c0_67 = arith.constant 0 : index
      %69 = vector.load %arg2[%68, %c0_67] : memref<64x32xf32, #tpu.memory_space<vmem>>, vector<1x32xf32>
      %c14 = arith.constant 14 : index
      %c0_68 = arith.constant 0 : index
      %70 = vector.load %arg9[%c14, %c0_68] : memref<64x32xf32, #tpu.memory_space<vmem>>, vector<1x32xf32>
      tpu.vector_store %arg9[%c14, %c0_68], %69 {strides = array<i32>} : memref<64x32xf32, #tpu.memory_space<vmem>>, vector<1x32xf32>,
      %c7_69 = arith.constant 7 : index
      %c1_70 = arith.constant 1 : index
      %71 = memref.load %arg1[%c7_69, %c1_70] : memref<8x8xi32, #tpu.memory_space<smem>>
      %72 = arith.index_cast %71 : i32 to index
      %c0_71 = arith.constant 0 : index
      %73 = vector.load %arg2[%72, %c0_71] : memref<64x32xf32, #tpu.memory_space<vmem>>, vector<1x32xf32>
      %c15 = arith.constant 15 : index
      %c0_72 = arith.constant 0 : index
      %74 = vector.load %arg9[%c15, %c0_72] : memref<64x32xf32, #tpu.memory_space<vmem>>, vector<1x32xf32>
      tpu.vector_store %arg9[%c15, %c0_72], %73 {strides = array<i32>} : memref<64x32xf32, #tpu.memory_space<vmem>>, vector<1x32xf32>,
      %c0_73 = arith.constant 0 : index
      %c2_74 = arith.constant 2 : index
      %75 = memref.load %arg1[%c0_73, %c2_74] : memref<8x8xi32, #tpu.memory_space<smem>>
      %76 = arith.index_cast %75 : i32 to index
      %c0_75 = arith.constant 0 : index
      %77 = vector.load %arg2[%76, %c0_75] : memref<64x32xf32, #tpu.memory_space<vmem>>, vector<1x32xf32>
      %c16 = arith.constant 16 : index
      %c0_76 = arith.constant 0 : index
      %78 = vector.load %arg9[%c16, %c0_76] : memref<64x32xf32, #tpu.memory_space<vmem>>, vector<1x32xf32>
      tpu.vector_store %arg9[%c16, %c0_76], %77 {strides = array<i32>} : memref<64x32xf32, #tpu.memory_space<vmem>>, vector<1x32xf32>,
      %c1_77 = arith.constant 1 : index
      %c2_78 = arith.constant 2 : index
      %79 = memref.load %arg1[%c1_77, %c2_78] : memref<8x8xi32, #tpu.memory_space<smem>>
      %80 = arith.index_cast %79 : i32 to index
      %c0_79 = arith.constant 0 : index
      %81 = vector.load %arg2[%80, %c0_79] : memref<64x32xf32, #tpu.memory_space<vmem>>, vector<1x32xf32>
      %c17 = arith.constant 17 : index
      %c0_80 = arith.constant 0 : index
      %82 = vector.load %arg9[%c17, %c0_80] : memref<64x32xf32, #tpu.memory_space<vmem>>, vector<1x32xf32>
      tpu.vector_store %arg9[%c17, %c0_80], %81 {strides = array<i32>} : memref<64x32xf32, #tpu.memory_space<vmem>>, vector<1x32xf32>,
      %c2_81 = arith.constant 2 : index
      %c2_82 = arith.constant 2 : index
      %83 = memref.load %arg1[%c2_81, %c2_82] : memref<8x8xi32, #tpu.memory_space<smem>>
      %84 = arith.index_cast %83 : i32 to index
      %c0_83 = arith.constant 0 : index
      %85 = vector.load %arg2[%84, %c0_83] : memref<64x32xf32, #tpu.memory_space<vmem>>, vector<1x32xf32>
      %c18 = arith.constant 18 : index
      %c0_84 = arith.constant 0 : index
      %86 = vector.load %arg9[%c18, %c0_84] : memref<64x32xf32, #tpu.memory_space<vmem>>, vector<1x32xf32>
      tpu.vector_store %arg9[%c18, %c0_84], %85 {strides = array<i32>} : memref<64x32xf32, #tpu.memory_space<vmem>>, vector<1x32xf32>,
      %c3_85 = arith.constant 3 : index
      %c2_86 = arith.constant 2 : index
      %87 = memref.load %arg1[%c3_85, %c2_86] : memref<8x8xi32, #tpu.memory_space<smem>>
      %88 = arith.index_cast %87 : i32 to index
      %c0_87 = arith.constant 0 : index
      %89 = vector.load %arg2[%88, %c0_87] : memref<64x32xf32, #tpu.memory_space<vmem>>, vector<1x32xf32>
      %c19 = arith.constant 19 : index
      %c0_88 = arith.constant 0 : index
      %90 = vector.load %arg9[%c19, %c0_88] : memref<64x32xf32, #tpu.memory_space<vmem>>, vector<1x32xf32>
      tpu.vector_store %arg9[%c19, %c0_88], %89 {strides = array<i32>} : memref<64x32xf32, #tpu.memory_space<vmem>>, vector<1x32xf32>,
      %c4_89 = arith.constant 4 : index
      %c2_90 = arith.constant 2 : index
      %91 = memref.load %arg1[%c4_89, %c2_90] : memref<8x8xi32, #tpu.memory_space<smem>>
      %92 = arith.index_cast %91 : i32 to index
      %c0_91 = arith.constant 0 : index
      %93 = vector.load %arg2[%92, %c0_91] : memref<64x32xf32, #tpu.memory_space<vmem>>, vector<1x32xf32>
      %c20 = arith.constant 20 : index
      %c0_92 = arith.constant 0 : index
      %94 = vector.load %arg9[%c20, %c0_92] : memref<64x32xf32, #tpu.memory_space<vmem>>, vector<1x32xf32>
      tpu.vector_store %arg9[%c20, %c0_92], %93 {strides = array<i32>} : memref<64x32xf32, #tpu.memory_space<vmem>>, vector<1x32xf32>,
      %c5_93 = arith.constant 5 : index
      %c2_94 = arith.constant 2 : index
      %95 = memref.load %arg1[%c5_93, %c2_94] : memref<8x8xi32, #tpu.memory_space<smem>>
      %96 = arith.index_cast %95 : i32 to index
      %c0_95 = arith.constant 0 : index
      %97 = vector.load %arg2[%96, %c0_95] : memref<64x32xf32, #tpu.memory_space<vmem>>, vector<1x32xf32>
      %c21 = arith.constant 21 : index
      %c0_96 = arith.constant 0 : index
      %98 = vector.load %arg9[%c21, %c0_96] : memref<64x32xf32, #tpu.memory_space<vmem>>, vector<1x32xf32>
      tpu.vector_store %arg9[%c21, %c0_96], %97 {strides = array<i32>} : memref<64x32xf32, #tpu.memory_space<vmem>>, vector<1x32xf32>,
      %c6_97 = arith.constant 6 : index
      %c2_98 = arith.constant 2 : index
      %99 = memref.load %arg1[%c6_97, %c2_98] : memref<8x8xi32, #tpu.memory_space<smem>>
      %100 = arith.index_cast %99 : i32 to index
      %c0_99 = arith.constant 0 : index
      %101 = vector.load %arg2[%100, %c0_99] : memref<64x32xf32, #tpu.memory_space<vmem>>, vector<1x32xf32>
      %c22 = arith.constant 22 : index
      %c0_100 = arith.constant 0 : index
      %102 = vector.load %arg9[%c22, %c0_100] : memref<64x32xf32, #tpu.memory_space<vmem>>, vector<1x32xf32>
      tpu.vector_store %arg9[%c22, %c0_100], %101 {strides = array<i32>} : memref<64x32xf32, #tpu.memory_space<vmem>>, vector<1x32xf32>,
      %c7_101 = arith.constant 7 : index
      %c2_102 = arith.constant 2 : index
      %103 = memref.load %arg1[%c7_101, %c2_102] : memref<8x8xi32, #tpu.memory_space<smem>>
      %104 = arith.index_cast %103 : i32 to index
      %c0_103 = arith.constant 0 : index
      %105 = vector.load %arg2[%104, %c0_103] : memref<64x32xf32, #tpu.memory_space<vmem>>, vector<1x32xf32>
      %c23 = arith.constant 23 : index
      %c0_104 = arith.constant 0 : index
      %106 = vector.load %arg9[%c23, %c0_104] : memref<64x32xf32, #tpu.memory_space<vmem>>, vector<1x32xf32>
      tpu.vector_store %arg9[%c23, %c0_104], %105 {strides = array<i32>} : memref<64x32xf32, #tpu.memory_space<vmem>>, vector<1x32xf32>,
      %c0_105 = arith.constant 0 : index
      %c3_106 = arith.constant 3 : index
      %107 = memref.load %arg1[%c0_105, %c3_106] : memref<8x8xi32, #tpu.memory_space<smem>>
      %108 = arith.index_cast %107 : i32 to index
      %c0_107 = arith.constant 0 : index
      %109 = vector.load %arg2[%108, %c0_107] : memref<64x32xf32, #tpu.memory_space<vmem>>, vector<1x32xf32>
      %c24 = arith.constant 24 : index
      %c0_108 = arith.constant 0 : index
      %110 = vector.load %arg9[%c24, %c0_108] : memref<64x32xf32, #tpu.memory_space<vmem>>, vector<1x32xf32>
      tpu.vector_store %arg9[%c24, %c0_108], %109 {strides = array<i32>} : memref<64x32xf32, #tpu.memory_space<vmem>>, vector<1x32xf32>,
      %c1_109 = arith.constant 1 : index
      %c3_110 = arith.constant 3 : index
      %111 = memref.load %arg1[%c1_109, %c3_110] : memref<8x8xi32, #tpu.memory_space<smem>>
      %112 = arith.index_cast %111 : i32 to index
      %c0_111 = arith.constant 0 : index
      %113 = vector.load %arg2[%112, %c0_111] : memref<64x32xf32, #tpu.memory_space<vmem>>, vector<1x32xf32>
      %c25 = arith.constant 25 : index
      %c0_112 = arith.constant 0 : index
      %114 = vector.load %arg9[%c25, %c0_112] : memref<64x32xf32, #tpu.memory_space<vmem>>, vector<1x32xf32>
      tpu.vector_store %arg9[%c25, %c0_112], %113 {strides = array<i32>} : memref<64x32xf32, #tpu.memory_space<vmem>>, vector<1x32xf32>,
      %c2_113 = arith.constant 2 : index
      %c3_114 = arith.constant 3 : index
      %115 = memref.load %arg1[%c2_113, %c3_114] : memref<8x8xi32, #tpu.memory_space<smem>>
      %116 = arith.index_cast %115 : i32 to index
      %c0_115 = arith.constant 0 : index
      %117 = vector.load %arg2[%116, %c0_115] : memref<64x32xf32, #tpu.memory_space<vmem>>, vector<1x32xf32>
      %c26 = arith.constant 26 : index
      %c0_116 = arith.constant 0 : index
      %118 = vector.load %arg9[%c26, %c0_116] : memref<64x32xf32, #tpu.memory_space<vmem>>, vector<1x32xf32>
      tpu.vector_store %arg9[%c26, %c0_116], %117 {strides = array<i32>} : memref<64x32xf32, #tpu.memory_space<vmem>>, vector<1x32xf32>,
      %c3_117 = arith.constant 3 : index
      %c3_118 = arith.constant 3 : index
      %119 = memref.load %arg1[%c3_117, %c3_118] : memref<8x8xi32, #tpu.memory_space<smem>>
      %120 = arith.index_cast %119 : i32 to index
      %c0_119 = arith.constant 0 : index
      %121 = vector.load %arg2[%120, %c0_119] : memref<64x32xf32, #tpu.memory_space<vmem>>, vector<1x32xf32>
      %c27 = arith.constant 27 : index
      %c0_120 = arith.constant 0 : index
      %122 = vector.load %arg9[%c27, %c0_120] : memref<64x32xf32, #tpu.memory_space<vmem>>, vector<1x32xf32>
      tpu.vector_store %arg9[%c27, %c0_120], %121 {strides = array<i32>} : memref<64x32xf32, #tpu.memory_space<vmem>>, vector<1x32xf32>,
      %c4_121 = arith.constant 4 : index
      %c3_122 = arith.constant 3 : index
      %123 = memref.load %arg1[%c4_121, %c3_122] : memref<8x8xi32, #tpu.memory_space<smem>>
      %124 = arith.index_cast %123 : i32 to index
      %c0_123 = arith.constant 0 : index
      %125 = vector.load %arg2[%124, %c0_123] : memref<64x32xf32, #tpu.memory_space<vmem>>, vector<1x32xf32>
      %c28 = arith.constant 28 : index
      %c0_124 = arith.constant 0 : index
      %126 = vector.load %arg9[%c28, %c0_124] : memref<64x32xf32, #tpu.memory_space<vmem>>, vector<1x32xf32>
      tpu.vector_store %arg9[%c28, %c0_124], %125 {strides = array<i32>} : memref<64x32xf32, #tpu.memory_space<vmem>>, vector<1x32xf32>,
      %c5_125 = arith.constant 5 : index
      %c3_126 = arith.constant 3 : index
      %127 = memref.load %arg1[%c5_125, %c3_126] : memref<8x8xi32, #tpu.memory_space<smem>>
      %128 = arith.index_cast %127 : i32 to index
      %c0_127 = arith.constant 0 : index
      %129 = vector.load %arg2[%128, %c0_127] : memref<64x32xf32, #tpu.memory_space<vmem>>, vector<1x32xf32>
      %c29 = arith.constant 29 : index
      %c0_128 = arith.constant 0 : index
      %130 = vector.load %arg9[%c29, %c0_128] : memref<64x32xf32, #tpu.memory_space<vmem>>, vector<1x32xf32>
      tpu.vector_store %arg9[%c29, %c0_128], %129 {strides = array<i32>} : memref<64x32xf32, #tpu.memory_space<vmem>>, vector<1x32xf32>,
      %c6_129 = arith.constant 6 : index
      %c3_130 = arith.constant 3 : index
      %131 = memref.load %arg1[%c6_129, %c3_130] : memref<8x8xi32, #tpu.memory_space<smem>>
      %132 = arith.index_cast %131 : i32 to index
      %c0_131 = arith.constant 0 : index
      %133 = vector.load %arg2[%132, %c0_131] : memref<64x32xf32, #tpu.memory_space<vmem>>, vector<1x32xf32>
      %c30 = arith.constant 30 : index
      %c0_132 = arith.constant 0 : index
      %134 = vector.load %arg9[%c30, %c0_132] : memref<64x32xf32, #tpu.memory_space<vmem>>, vector<1x32xf32>
      tpu.vector_store %arg9[%c30, %c0_132], %133 {strides = array<i32>} : memref<64x32xf32, #tpu.memory_space<vmem>>, vector<1x32xf32>,
      %c7_133 = arith.constant 7 : index
      %c3_134 = arith.constant 3 : index
      %135 = memref.load %arg1[%c7_133, %c3_134] : memref<8x8xi32, #tpu.memory_space<smem>>
      %136 = arith.index_cast %135 : i32 to index
      %c0_135 = arith.constant 0 : index
      %137 = vector.load %arg2[%136, %c0_135] : memref<64x32xf32, #tpu.memory_space<vmem>>, vector<1x32xf32>
      %c31 = arith.constant 31 : index
      %c0_136 = arith.constant 0 : index
      %138 = vector.load %arg9[%c31, %c0_136] : memref<64x32xf32, #tpu.memory_space<vmem>>, vector<1x32xf32>
      tpu.vector_store %arg9[%c31, %c0_136], %137 {strides = array<i32>} : memref<64x32xf32, #tpu.memory_space<vmem>>, vector<1x32xf32>,
      %c0_137 = arith.constant 0 : index
      %c4_138 = arith.constant 4 : index
      %139 = memref.load %arg1[%c0_137, %c4_138] : memref<8x8xi32, #tpu.memory_space<smem>>
      %140 = arith.index_cast %139 : i32 to index
      %c0_139 = arith.constant 0 : index
      %141 = vector.load %arg2[%140, %c0_139] : memref<64x32xf32, #tpu.memory_space<vmem>>, vector<1x32xf32>
      %c32 = arith.constant 32 : index
      %c0_140 = arith.constant 0 : index
      %142 = vector.load %arg9[%c32, %c0_140] : memref<64x32xf32, #tpu.memory_space<vmem>>, vector<1x32xf32>
      tpu.vector_store %arg9[%c32, %c0_140], %141 {strides = array<i32>} : memref<64x32xf32, #tpu.memory_space<vmem>>, vector<1x32xf32>,
      %c1_141 = arith.constant 1 : index
      %c4_142 = arith.constant 4 : index
      %143 = memref.load %arg1[%c1_141, %c4_142] : memref<8x8xi32, #tpu.memory_space<smem>>
      %144 = arith.index_cast %143 : i32 to index
      %c0_143 = arith.constant 0 : index
      %145 = vector.load %arg2[%144, %c0_143] : memref<64x32xf32, #tpu.memory_space<vmem>>, vector<1x32xf32>
      %c33 = arith.constant 33 : index
      %c0_144 = arith.constant 0 : index
      %146 = vector.load %arg9[%c33, %c0_144] : memref<64x32xf32, #tpu.memory_space<vmem>>, vector<1x32xf32>
      tpu.vector_store %arg9[%c33, %c0_144], %145 {strides = array<i32>} : memref<64x32xf32, #tpu.memory_space<vmem>>, vector<1x32xf32>,
      %c2_145 = arith.constant 2 : index
      %c4_146 = arith.constant 4 : index
      %147 = memref.load %arg1[%c2_145, %c4_146] : memref<8x8xi32, #tpu.memory_space<smem>>
      %148 = arith.index_cast %147 : i32 to index
      %c0_147 = arith.constant 0 : index
      %149 = vector.load %arg2[%148, %c0_147] : memref<64x32xf32, #tpu.memory_space<vmem>>, vector<1x32xf32>
      %c34 = arith.constant 34 : index
      %c0_148 = arith.constant 0 : index
      %150 = vector.load %arg9[%c34, %c0_148] : memref<64x32xf32, #tpu.memory_space<vmem>>, vector<1x32xf32>
      tpu.vector_store %arg9[%c34, %c0_148], %149 {strides = array<i32>} : memref<64x32xf32, #tpu.memory_space<vmem>>, vector<1x32xf32>,
      %c3_149 = arith.constant 3 : index
      %c4_150 = arith.constant 4 : index
      %151 = memref.load %arg1[%c3_149, %c4_150] : memref<8x8xi32, #tpu.memory_space<smem>>
      %152 = arith.index_cast %151 : i32 to index
      %c0_151 = arith.constant 0 : index
      %153 = vector.load %arg2[%152, %c0_151] : memref<64x32xf32, #tpu.memory_space<vmem>>, vector<1x32xf32>
      %c35 = arith.constant 35 : index
      %c0_152 = arith.constant 0 : index
      %154 = vector.load %arg9[%c35, %c0_152] : memref<64x32xf32, #tpu.memory_space<vmem>>, vector<1x32xf32>
      tpu.vector_store %arg9[%c35, %c0_152], %153 {strides = array<i32>} : memref<64x32xf32, #tpu.memory_space<vmem>>, vector<1x32xf32>,
      %c4_153 = arith.constant 4 : index
      %c4_154 = arith.constant 4 : index
      %155 = memref.load %arg1[%c4_153, %c4_154] : memref<8x8xi32, #tpu.memory_space<smem>>
      %156 = arith.index_cast %155 : i32 to index
      %c0_155 = arith.constant 0 : index
      %157 = vector.load %arg2[%156, %c0_155] : memref<64x32xf32, #tpu.memory_space<vmem>>, vector<1x32xf32>
      %c36 = arith.constant 36 : index
      %c0_156 = arith.constant 0 : index
      %158 = vector.load %arg9[%c36, %c0_156] : memref<64x32xf32, #tpu.memory_space<vmem>>, vector<1x32xf32>
      tpu.vector_store %arg9[%c36, %c0_156], %157 {strides = array<i32>} : memref<64x32xf32, #tpu.memory_space<vmem>>, vector<1x32xf32>,
      %c5_157 = arith.constant 5 : index
      %c4_158 = arith.constant 4 : index
      %159 = memref.load %arg1[%c5_157, %c4_158] : memref<8x8xi32, #tpu.memory_space<smem>>
      %160 = arith.index_cast %159 : i32 to index
      %c0_159 = arith.constant 0 : index
      %161 = vector.load %arg2[%160, %c0_159] : memref<64x32xf32, #tpu.memory_space<vmem>>, vector<1x32xf32>
      %c37 = arith.constant 37 : index
      %c0_160 = arith.constant 0 : index
      %162 = vector.load %arg9[%c37, %c0_160] : memref<64x32xf32, #tpu.memory_space<vmem>>, vector<1x32xf32>
      tpu.vector_store %arg9[%c37, %c0_160], %161 {strides = array<i32>} : memref<64x32xf32, #tpu.memory_space<vmem>>, vector<1x32xf32>,
      %c6_161 = arith.constant 6 : index
      %c4_162 = arith.constant 4 : index
      %163 = memref.load %arg1[%c6_161, %c4_162] : memref<8x8xi32, #tpu.memory_space<smem>>
      %164 = arith.index_cast %163 : i32 to index
      %c0_163 = arith.constant 0 : index
      %165 = vector.load %arg2[%164, %c0_163] : memref<64x32xf32, #tpu.memory_space<vmem>>, vector<1x32xf32>
      %c38 = arith.constant 38 : index
      %c0_164 = arith.constant 0 : index
      %166 = vector.load %arg9[%c38, %c0_164] : memref<64x32xf32, #tpu.memory_space<vmem>>, vector<1x32xf32>
      tpu.vector_store %arg9[%c38, %c0_164], %165 {strides = array<i32>} : memref<64x32xf32, #tpu.memory_space<vmem>>, vector<1x32xf32>,
      %c7_165 = arith.constant 7 : index
      %c4_166 = arith.constant 4 : index
      %167 = memref.load %arg1[%c7_165, %c4_166] : memref<8x8xi32, #tpu.memory_space<smem>>
      %168 = arith.index_cast %167 : i32 to index
      %c0_167 = arith.constant 0 : index
      %169 = vector.load %arg2[%168, %c0_167] : memref<64x32xf32, #tpu.memory_space<vmem>>, vector<1x32xf32>
      %c39 = arith.constant 39 : index
      %c0_168 = arith.constant 0 : index
      %170 = vector.load %arg9[%c39, %c0_168] : memref<64x32xf32, #tpu.memory_space<vmem>>, vector<1x32xf32>
      tpu.vector_store %arg9[%c39, %c0_168], %169 {strides = array<i32>} : memref<64x32xf32, #tpu.memory_space<vmem>>, vector<1x32xf32>,
      %c0_169 = arith.constant 0 : index
      %c5_170 = arith.constant 5 : index
      %171 = memref.load %arg1[%c0_169, %c5_170] : memref<8x8xi32, #tpu.memory_space<smem>>
      %172 = arith.index_cast %171 : i32 to index
      %c0_171 = arith.constant 0 : index
      %173 = vector.load %arg2[%172, %c0_171] : memref<64x32xf32, #tpu.memory_space<vmem>>, vector<1x32xf32>
      %c40 = arith.constant 40 : index
      %c0_172 = arith.constant 0 : index
      %174 = vector.load %arg9[%c40, %c0_172] : memref<64x32xf32, #tpu.memory_space<vmem>>, vector<1x32xf32>
      tpu.vector_store %arg9[%c40, %c0_172], %173 {strides = array<i32>} : memref<64x32xf32, #tpu.memory_space<vmem>>, vector<1x32xf32>,
      %c1_173 = arith.constant 1 : index
      %c5_174 = arith.constant 5 : index
      %175 = memref.load %arg1[%c1_173, %c5_174] : memref<8x8xi32, #tpu.memory_space<smem>>
      %176 = arith.index_cast %175 : i32 to index
      %c0_175 = arith.constant 0 : index
      %177 = vector.load %arg2[%176, %c0_175] : memref<64x32xf32, #tpu.memory_space<vmem>>, vector<1x32xf32>
      %c41 = arith.constant 41 : index
      %c0_176 = arith.constant 0 : index
      %178 = vector.load %arg9[%c41, %c0_176] : memref<64x32xf32, #tpu.memory_space<vmem>>, vector<1x32xf32>
      tpu.vector_store %arg9[%c41, %c0_176], %177 {strides = array<i32>} : memref<64x32xf32, #tpu.memory_space<vmem>>, vector<1x32xf32>,
      %c2_177 = arith.constant 2 : index
      %c5_178 = arith.constant 5 : index
      %179 = memref.load %arg1[%c2_177, %c5_178] : memref<8x8xi32, #tpu.memory_space<smem>>
      %180 = arith.index_cast %179 : i32 to index
      %c0_179 = arith.constant 0 : index
      %181 = vector.load %arg2[%180, %c0_179] : memref<64x32xf32, #tpu.memory_space<vmem>>, vector<1x32xf32>
      %c42 = arith.constant 42 : index
      %c0_180 = arith.constant 0 : index
      %182 = vector.load %arg9[%c42, %c0_180] : memref<64x32xf32, #tpu.memory_space<vmem>>, vector<1x32xf32>
      tpu.vector_store %arg9[%c42, %c0_180], %181 {strides = array<i32>} : memref<64x32xf32, #tpu.memory_space<vmem>>, vector<1x32xf32>,
      %c3_181 = arith.constant 3 : index
      %c5_182 = arith.constant 5 : index
      %183 = memref.load %arg1[%c3_181, %c5_182] : memref<8x8xi32, #tpu.memory_space<smem>>
      %184 = arith.index_cast %183 : i32 to index
      %c0_183 = arith.constant 0 : index
      %185 = vector.load %arg2[%184, %c0_183] : memref<64x32xf32, #tpu.memory_space<vmem>>, vector<1x32xf32>
      %c43 = arith.constant 43 : index
      %c0_184 = arith.constant 0 : index
      %186 = vector.load %arg9[%c43, %c0_184] : memref<64x32xf32, #tpu.memory_space<vmem>>, vector<1x32xf32>
      tpu.vector_store %arg9[%c43, %c0_184], %185 {strides = array<i32>} : memref<64x32xf32, #tpu.memory_space<vmem>>, vector<1x32xf32>,
      %c4_185 = arith.constant 4 : index
      %c5_186 = arith.constant 5 : index
      %187 = memref.load %arg1[%c4_185, %c5_186] : memref<8x8xi32, #tpu.memory_space<smem>>
      %188 = arith.index_cast %187 : i32 to index
      %c0_187 = arith.constant 0 : index
      %189 = vector.load %arg2[%188, %c0_187] : memref<64x32xf32, #tpu.memory_space<vmem>>, vector<1x32xf32>
      %c44 = arith.constant 44 : index
      %c0_188 = arith.constant 0 : index
      %190 = vector.load %arg9[%c44, %c0_188] : memref<64x32xf32, #tpu.memory_space<vmem>>, vector<1x32xf32>
      tpu.vector_store %arg9[%c44, %c0_188], %189 {strides = array<i32>} : memref<64x32xf32, #tpu.memory_space<vmem>>, vector<1x32xf32>,
      %c5_189 = arith.constant 5 : index
      %c5_190 = arith.constant 5 : index
      %191 = memref.load %arg1[%c5_189, %c5_190] : memref<8x8xi32, #tpu.memory_space<smem>>
      %192 = arith.index_cast %191 : i32 to index
      %c0_191 = arith.constant 0 : index
      %193 = vector.load %arg2[%192, %c0_191] : memref<64x32xf32, #tpu.memory_space<vmem>>, vector<1x32xf32>
      %c45 = arith.constant 45 : index
      %c0_192 = arith.constant 0 : index
      %194 = vector.load %arg9[%c45, %c0_192] : memref<64x32xf32, #tpu.memory_space<vmem>>, vector<1x32xf32>
      tpu.vector_store %arg9[%c45, %c0_192], %193 {strides = array<i32>} : memref<64x32xf32, #tpu.memory_space<vmem>>, vector<1x32xf32>,
      %c6_193 = arith.constant 6 : index
      %c5_194 = arith.constant 5 : index
      %195 = memref.load %arg1[%c6_193, %c5_194] : memref<8x8xi32, #tpu.memory_space<smem>>
      %196 = arith.index_cast %195 : i32 to index
      %c0_195 = arith.constant 0 : index
      %197 = vector.load %arg2[%196, %c0_195] : memref<64x32xf32, #tpu.memory_space<vmem>>, vector<1x32xf32>
      %c46 = arith.constant 46 : index
      %c0_196 = arith.constant 0 : index
      %198 = vector.load %arg9[%c46, %c0_196] : memref<64x32xf32, #tpu.memory_space<vmem>>, vector<1x32xf32>
      tpu.vector_store %arg9[%c46, %c0_196], %197 {strides = array<i32>} : memref<64x32xf32, #tpu.memory_space<vmem>>, vector<1x32xf32>,
      %c7_197 = arith.constant 7 : index
      %c5_198 = arith.constant 5 : index
      %199 = memref.load %arg1[%c7_197, %c5_198] : memref<8x8xi32, #tpu.memory_space<smem>>
      %200 = arith.index_cast %199 : i32 to index
      %c0_199 = arith.constant 0 : index
      %201 = vector.load %arg2[%200, %c0_199] : memref<64x32xf32, #tpu.memory_space<vmem>>, vector<1x32xf32>
      %c47 = arith.constant 47 : index
      %c0_200 = arith.constant 0 : index
      %202 = vector.load %arg9[%c47, %c0_200] : memref<64x32xf32, #tpu.memory_space<vmem>>, vector<1x32xf32>
      tpu.vector_store %arg9[%c47, %c0_200], %201 {strides = array<i32>} : memref<64x32xf32, #tpu.memory_space<vmem>>, vector<1x32xf32>,
      %c0_201 = arith.constant 0 : index
      %c6_202 = arith.constant 6 : index
      %203 = memref.load %arg1[%c0_201, %c6_202] : memref<8x8xi32, #tpu.memory_space<smem>>
      %204 = arith.index_cast %203 : i32 to index
      %c0_203 = arith.constant 0 : index
      %205 = vector.load %arg2[%204, %c0_203] : memref<64x32xf32, #tpu.memory_space<vmem>>, vector<1x32xf32>
      %c48 = arith.constant 48 : index
      %c0_204 = arith.constant 0 : index
      %206 = vector.load %arg9[%c48, %c0_204] : memref<64x32xf32, #tpu.memory_space<vmem>>, vector<1x32xf32>
      tpu.vector_store %arg9[%c48, %c0_204], %205 {strides = array<i32>} : memref<64x32xf32, #tpu.memory_space<vmem>>, vector<1x32xf32>,
      %c1_205 = arith.constant 1 : index
      %c6_206 = arith.constant 6 : index
      %207 = memref.load %arg1[%c1_205, %c6_206] : memref<8x8xi32, #tpu.memory_space<smem>>
      %208 = arith.index_cast %207 : i32 to index
      %c0_207 = arith.constant 0 : index
      %209 = vector.load %arg2[%208, %c0_207] : memref<64x32xf32, #tpu.memory_space<vmem>>, vector<1x32xf32>
      %c49 = arith.constant 49 : index
      %c0_208 = arith.constant 0 : index
      %210 = vector.load %arg9[%c49, %c0_208] : memref<64x32xf32, #tpu.memory_space<vmem>>, vector<1x32xf32>
      tpu.vector_store %arg9[%c49, %c0_208], %209 {strides = array<i32>} : memref<64x32xf32, #tpu.memory_space<vmem>>, vector<1x32xf32>,
      %c2_209 = arith.constant 2 : index
      %c6_210 = arith.constant 6 : index
      %211 = memref.load %arg1[%c2_209, %c6_210] : memref<8x8xi32, #tpu.memory_space<smem>>
      %212 = arith.index_cast %211 : i32 to index
      %c0_211 = arith.constant 0 : index
      %213 = vector.load %arg2[%212, %c0_211] : memref<64x32xf32, #tpu.memory_space<vmem>>, vector<1x32xf32>
      %c50 = arith.constant 50 : index
      %c0_212 = arith.constant 0 : index
      %214 = vector.load %arg9[%c50, %c0_212] : memref<64x32xf32, #tpu.memory_space<vmem>>, vector<1x32xf32>
      tpu.vector_store %arg9[%c50, %c0_212], %213 {strides = array<i32>} : memref<64x32xf32, #tpu.memory_space<vmem>>, vector<1x32xf32>,
      %c3_213 = arith.constant 3 : index
      %c6_214 = arith.constant 6 : index
      %215 = memref.load %arg1[%c3_213, %c6_214] : memref<8x8xi32, #tpu.memory_space<smem>>
      %216 = arith.index_cast %215 : i32 to index
      %c0_215 = arith.constant 0 : index
      %217 = vector.load %arg2[%216, %c0_215] : memref<64x32xf32, #tpu.memory_space<vmem>>, vector<1x32xf32>
      %c51 = arith.constant 51 : index
      %c0_216 = arith.constant 0 : index
      %218 = vector.load %arg9[%c51, %c0_216] : memref<64x32xf32, #tpu.memory_space<vmem>>, vector<1x32xf32>
      tpu.vector_store %arg9[%c51, %c0_216], %217 {strides = array<i32>} : memref<64x32xf32, #tpu.memory_space<vmem>>, vector<1x32xf32>,
      %c4_217 = arith.constant 4 : index
      %c6_218 = arith.constant 6 : index
      %219 = memref.load %arg1[%c4_217, %c6_218] : memref<8x8xi32, #tpu.memory_space<smem>>
      %220 = arith.index_cast %219 : i32 to index
      %c0_219 = arith.constant 0 : index
      %221 = vector.load %arg2[%220, %c0_219] : memref<64x32xf32, #tpu.memory_space<vmem>>, vector<1x32xf32>
      %c52 = arith.constant 52 : index
      %c0_220 = arith.constant 0 : index
      %222 = vector.load %arg9[%c52, %c0_220] : memref<64x32xf32, #tpu.memory_space<vmem>>, vector<1x32xf32>
      tpu.vector_store %arg9[%c52, %c0_220], %221 {strides = array<i32>} : memref<64x32xf32, #tpu.memory_space<vmem>>, vector<1x32xf32>,
      %c5_221 = arith.constant 5 : index
      %c6_222 = arith.constant 6 : index
      %223 = memref.load %arg1[%c5_221, %c6_222] : memref<8x8xi32, #tpu.memory_space<smem>>
      %224 = arith.index_cast %223 : i32 to index
      %c0_223 = arith.constant 0 : index
      %225 = vector.load %arg2[%224, %c0_223] : memref<64x32xf32, #tpu.memory_space<vmem>>, vector<1x32xf32>
      %c53 = arith.constant 53 : index
      %c0_224 = arith.constant 0 : index
      %226 = vector.load %arg9[%c53, %c0_224] : memref<64x32xf32, #tpu.memory_space<vmem>>, vector<1x32xf32>
      tpu.vector_store %arg9[%c53, %c0_224], %225 {strides = array<i32>} : memref<64x32xf32, #tpu.memory_space<vmem>>, vector<1x32xf32>,
      %c6_225 = arith.constant 6 : index
      %c6_226 = arith.constant 6 : index
      %227 = memref.load %arg1[%c6_225, %c6_226] : memref<8x8xi32, #tpu.memory_space<smem>>
      %228 = arith.index_cast %227 : i32 to index
      %c0_227 = arith.constant 0 : index
      %229 = vector.load %arg2[%228, %c0_227] : memref<64x32xf32, #tpu.memory_space<vmem>>, vector<1x32xf32>
      %c54 = arith.constant 54 : index
      %c0_228 = arith.constant 0 : index
      %230 = vector.load %arg9[%c54, %c0_228] : memref<64x32xf32, #tpu.memory_space<vmem>>, vector<1x32xf32>
      tpu.vector_store %arg9[%c54, %c0_228], %229 {strides = array<i32>} : memref<64x32xf32, #tpu.memory_space<vmem>>, vector<1x32xf32>,
      %c7_229 = arith.constant 7 : index
      %c6_230 = arith.constant 6 : index
      %231 = memref.load %arg1[%c7_229, %c6_230] : memref<8x8xi32, #tpu.memory_space<smem>>
      %232 = arith.index_cast %231 : i32 to index
      %c0_231 = arith.constant 0 : index
      %233 = vector.load %arg2[%232, %c0_231] : memref<64x32xf32, #tpu.memory_space<vmem>>, vector<1x32xf32>
      %c55 = arith.constant 55 : index
      %c0_232 = arith.constant 0 : index
      %234 = vector.load %arg9[%c55, %c0_232] : memref<64x32xf32, #tpu.memory_space<vmem>>, vector<1x32xf32>
      tpu.vector_store %arg9[%c55, %c0_232], %233 {strides = array<i32>} : memref<64x32xf32, #tpu.memory_space<vmem>>, vector<1x32xf32>,
      %c0_233 = arith.constant 0 : index
      %c7_234 = arith.constant 7 : index
      %235 = memref.load %arg1[%c0_233, %c7_234] : memref<8x8xi32, #tpu.memory_space<smem>>
      %236 = arith.index_cast %235 : i32 to index
      %c0_235 = arith.constant 0 : index
      %237 = vector.load %arg2[%236, %c0_235] : memref<64x32xf32, #tpu.memory_space<vmem>>, vector<1x32xf32>
      %c56 = arith.constant 56 : index
      %c0_236 = arith.constant 0 : index
      %238 = vector.load %arg9[%c56, %c0_236] : memref<64x32xf32, #tpu.memory_space<vmem>>, vector<1x32xf32>
      tpu.vector_store %arg9[%c56, %c0_236], %237 {strides = array<i32>} : memref<64x32xf32, #tpu.memory_space<vmem>>, vector<1x32xf32>,
      %c1_237 = arith.constant 1 : index
      %c7_238 = arith.constant 7 : index
      %239 = memref.load %arg1[%c1_237, %c7_238] : memref<8x8xi32, #tpu.memory_space<smem>>
      %240 = arith.index_cast %239 : i32 to index
      %c0_239 = arith.constant 0 : index
      %241 = vector.load %arg2[%240, %c0_239] : memref<64x32xf32, #tpu.memory_space<vmem>>, vector<1x32xf32>
      %c57 = arith.constant 57 : index
      %c0_240 = arith.constant 0 : index
      %242 = vector.load %arg9[%c57, %c0_240] : memref<64x32xf32, #tpu.memory_space<vmem>>, vector<1x32xf32>
      tpu.vector_store %arg9[%c57, %c0_240], %241 {strides = array<i32>} : memref<64x32xf32, #tpu.memory_space<vmem>>, vector<1x32xf32>,
      %c2_241 = arith.constant 2 : index
      %c7_242 = arith.constant 7 : index
      %243 = memref.load %arg1[%c2_241, %c7_242] : memref<8x8xi32, #tpu.memory_space<smem>>
      %244 = arith.index_cast %243 : i32 to index
      %c0_243 = arith.constant 0 : index
      %245 = vector.load %arg2[%244, %c0_243] : memref<64x32xf32, #tpu.memory_space<vmem>>, vector<1x32xf32>
      %c58 = arith.constant 58 : index
      %c0_244 = arith.constant 0 : index
      %246 = vector.load %arg9[%c58, %c0_244] : memref<64x32xf32, #tpu.memory_space<vmem>>, vector<1x32xf32>
      tpu.vector_store %arg9[%c58, %c0_244], %245 {strides = array<i32>} : memref<64x32xf32, #tpu.memory_space<vmem>>, vector<1x32xf32>,
      %c3_245 = arith.constant 3 : index
      %c7_246 = arith.constant 7 : index
      %247 = memref.load %arg1[%c3_245, %c7_246] : memref<8x8xi32, #tpu.memory_space<smem>>
      %248 = arith.index_cast %247 : i32 to index
      %c0_247 = arith.constant 0 : index
      %249 = vector.load %arg2[%248, %c0_247] : memref<64x32xf32, #tpu.memory_space<vmem>>, vector<1x32xf32>
      %c59 = arith.constant 59 : index
      %c0_248 = arith.constant 0 : index
      %250 = vector.load %arg9[%c59, %c0_248] : memref<64x32xf32, #tpu.memory_space<vmem>>, vector<1x32xf32>
      tpu.vector_store %arg9[%c59, %c0_248], %249 {strides = array<i32>} : memref<64x32xf32, #tpu.memory_space<vmem>>, vector<1x32xf32>,
      %c4_249 = arith.constant 4 : index
      %c7_250 = arith.constant 7 : index
      %251 = memref.load %arg1[%c4_249, %c7_250] : memref<8x8xi32, #tpu.memory_space<smem>>
      %252 = arith.index_cast %251 : i32 to index
      %c0_251 = arith.constant 0 : index
      %253 = vector.load %arg2[%252, %c0_251] : memref<64x32xf32, #tpu.memory_space<vmem>>, vector<1x32xf32>
      %c60 = arith.constant 60 : index
      %c0_252 = arith.constant 0 : index
      %254 = vector.load %arg9[%c60, %c0_252] : memref<64x32xf32, #tpu.memory_space<vmem>>, vector<1x32xf32>
      tpu.vector_store %arg9[%c60, %c0_252], %253 {strides = array<i32>} : memref<64x32xf32, #tpu.memory_space<vmem>>, vector<1x32xf32>,
      %c5_253 = arith.constant 5 : index
      %c7_254 = arith.constant 7 : index
      %255 = memref.load %arg1[%c5_253, %c7_254] : memref<8x8xi32, #tpu.memory_space<smem>>
      %256 = arith.index_cast %255 : i32 to index
      %c0_255 = arith.constant 0 : index
      %257 = vector.load %arg2[%256, %c0_255] : memref<64x32xf32, #tpu.memory_space<vmem>>, vector<1x32xf32>
      %c61 = arith.constant 61 : index
      %c0_256 = arith.constant 0 : index
      %258 = vector.load %arg9[%c61, %c0_256] : memref<64x32xf32, #tpu.memory_space<vmem>>, vector<1x32xf32>
      tpu.vector_store %arg9[%c61, %c0_256], %257 {strides = array<i32>} : memref<64x32xf32, #tpu.memory_space<vmem>>, vector<1x32xf32>,
      %c6_257 = arith.constant 6 : index
      %c7_258 = arith.constant 7 : index
      %259 = memref.load %arg1[%c6_257, %c7_258] : memref<8x8xi32, #tpu.memory_space<smem>>
      %260 = arith.index_cast %259 : i32 to index
      %c0_259 = arith.constant 0 : index
      %261 = vector.load %arg2[%260, %c0_259] : memref<64x32xf32, #tpu.memory_space<vmem>>, vector<1x32xf32>
      %c62 = arith.constant 62 : index
      %c0_260 = arith.constant 0 : index
      %262 = vector.load %arg9[%c62, %c0_260] : memref<64x32xf32, #tpu.memory_space<vmem>>, vector<1x32xf32>
      tpu.vector_store %arg9[%c62, %c0_260], %261 {strides = array<i32>} : memref<64x32xf32, #tpu.memory_space<vmem>>, vector<1x32xf32>,
      %c7_261 = arith.constant 7 : index
      %c7_262 = arith.constant 7 : index
      %263 = memref.load %arg1[%c7_261, %c7_262] : memref<8x8xi32, #tpu.memory_space<smem>>
      %264 = arith.index_cast %263 : i32 to index
      %c0_263 = arith.constant 0 : index
      %265 = vector.load %arg2[%264, %c0_263] : memref<64x32xf32, #tpu.memory_space<vmem>>, vector<1x32xf32>
      %c63 = arith.constant 63 : index
      %c0_264 = arith.constant 0 : index
      %266 = vector.load %arg9[%c63, %c0_264] : memref<64x32xf32, #tpu.memory_space<vmem>>, vector<1x32xf32>
      tpu.vector_store %arg9[%c63, %c0_264], %265 {strides = array<i32>} : memref<64x32xf32, #tpu.memory_space<vmem>>, vector<1x32xf32>,
      %c0_265 = arith.constant 0 : index
      %c0_266 = arith.constant 0 : index
      %267 = vector.load %arg9[%c0_265, %c0_266] : memref<64x32xf32, #tpu.memory_space<vmem>>, vector<64x32xf32>
      %268 = arith.truncf %267 : vector<64x32xf32> to vector<64x32xbf16>
      %c0_267 = arith.constant 0 : index
      %c0_268 = arith.constant 0 : index
      %c0_269 = arith.constant 0 : index
      %269 = vector.load %arg3[%c0_267, %c0_268, %c0_269] : memref<2x32x128xbf16, #tpu.memory_space<vmem>>, vector<1x32x128xbf16>
      %270 = vector.shape_cast %269 : vector<1x32x128xbf16> to vector<32x128xbf16>
      %cst_270 = arith.constant dense<0.000000e+00> : vector<64x128xf32>
      %271 = tpu.matmul %268, %270, %cst_270 {dimension_numbers = #tpu.dot_dimension_numbers<[1], [0], [0], [1], [0, 0, 1, 1], [], []>} : vector<64x32xbf16>, vector<32x128xbf16>, vector<64x128xf32> -> vector<64x128xf32>
      %c0_271 = arith.constant 0 : index
      %c0_272 = arith.constant 0 : index
      %c0_273 = arith.constant 0 : index
      %272 = vector.load %arg5[%c0_271, %c0_272, %c0_273] : memref<2x1x128xf32, #tpu.memory_space<vmem>>, vector<1x1x128xf32>
      %273 = vector.shape_cast %272 : vector<1x1x128xf32> to vector<1x128xf32>
      %274 = vector.broadcast %273 : vector<1x128xf32> to vector<64x128xf32>
      %275 = arith.addf %271, %274 : vector<64x128xf32>
      %c0_274 = arith.constant 0 : index
      %c0_275 = arith.constant 0 : index
      %276 = vector.load %arg10[%c0_274, %c0_275] : memref<64x128xf32, #tpu.memory_space<vmem>>, vector<64x128xf32>
      tpu.vector_store %arg10[%c0_274, %c0_275], %275 {strides = array<i32>} : memref<64x128xf32, #tpu.memory_space<vmem>>, vector<64x128xf32>,
      %c0_276 = arith.constant 0 : index
      %c0_277 = arith.constant 0 : index
      %c0_278 = arith.constant 0 : index
      %277 = vector.load %arg4[%c0_276, %c0_277, %c0_278] : memref<2x32x128xbf16, #tpu.memory_space<vmem>>, vector<1x32x128xbf16>
      %278 = vector.shape_cast %277 : vector<1x32x128xbf16> to vector<32x128xbf16>
      %cst_279 = arith.constant 0.000000e+00 : f32
      %279 = vector.broadcast %cst_279 : f32 to vector<8x32xf32>
      %cst_280 = arith.constant 0.000000e+00 : f32
      %280 = vector.broadcast %cst_280 : f32 to vector<8x32xf32>
      %c0_i32_281 = arith.constant 0 : i32
      %c8_i32 = arith.constant 8 : i32
      %281 = arith.muli %c0_i32_281, %c8_i32 : i32
      %282 = tpu.assume_multiple %281, 8 : i32
      %283 = arith.index_cast %282 : i32 to index
      %c0_282 = arith.constant 0 : index
      %284 = vector.load %arg10[%283, %c0_282] : memref<64x128xf32, #tpu.memory_space<vmem>>, vector<8x128xf32>
      %285 = arith.truncf %279 : vector<8x32xf32> to vector<8x32xbf16>
      %cst_283 = arith.constant dense<0.000000e+00> : vector<8x128xf32>
      %286 = tpu.matmul %285, %278, %cst_283 {dimension_numbers = #tpu.dot_dimension_numbers<[1], [0], [0], [1], [0, 0, 1, 1], [], []>} : vector<8x32xbf16>, vector<32x128xbf16>, vector<8x128xf32> -> vector<8x128xf32>
      %287 = arith.addf %284, %286 : vector<8x128xf32>
      %288 = vector.extract_strided_slice %287 {offsets = [0, 0], sizes = [8, 96], strides = [1, 1]} : vector<8x128xf32> to vector<8x96xf32>
      %289 = arith.negf %288 : vector<8x96xf32>
      %290 = math.exp %289 : vector<8x96xf32>
      %cst_284 = arith.constant 1.000000e+00 : f32
      %291 = vector.broadcast %cst_284 : f32 to vector<8x96xf32>
      %292 = arith.addf %291, %290 : vector<8x96xf32>
      %293 = arith.divf %291, %292 : vector<8x96xf32>
      %294 = vector.extract_strided_slice %287 {offsets = [0, 96], sizes = [8, 32], strides = [1, 1]} : vector<8x128xf32> to vector<8x32xf32>
      %295 = math.tanh %294 : vector<8x32xf32>
      %296 = vector.extract_strided_slice %293 {offsets = [0, 0], sizes = [8, 32], strides = [1, 1]} : vector<8x96xf32> to vector<8x32xf32>
      %297 = vector.extract_strided_slice %293 {offsets = [0, 32], sizes = [8, 32], strides = [1, 1]} : vector<8x96xf32> to vector<8x32xf32>
      %298 = vector.extract_strided_slice %293 {offsets = [0, 64], sizes = [8, 32], strides = [1, 1]} : vector<8x96xf32> to vector<8x32xf32>
      %299 = arith.mulf %297, %280 : vector<8x32xf32>
      %300 = arith.mulf %296, %295 : vector<8x32xf32>
      %301 = arith.addf %299, %300 : vector<8x32xf32>
      %302 = math.tanh %301 : vector<8x32xf32>
      %303 = arith.mulf %298, %302 : vector<8x32xf32>
      %304 = arith.index_cast %282 : i32 to index
      %c0_285 = arith.constant 0 : index
      %305 = vector.load %arg9[%304, %c0_285] : memref<64x32xf32, #tpu.memory_space<vmem>>, vector<8x32xf32>
      tpu.vector_store %arg9[%304, %c0_285], %303 {strides = array<i32>} : memref<64x32xf32, #tpu.memory_space<vmem>>, vector<8x32xf32>,
      %c1_i32 = arith.constant 1 : i32
      %c8_i32_286 = arith.constant 8 : i32
      %306 = arith.muli %c1_i32, %c8_i32_286 : i32
      %307 = tpu.assume_multiple %306, 8 : i32
      %308 = arith.index_cast %307 : i32 to index
      %c0_287 = arith.constant 0 : index
      %309 = vector.load %arg10[%308, %c0_287] : memref<64x128xf32, #tpu.memory_space<vmem>>, vector<8x128xf32>
      %310 = arith.truncf %303 : vector<8x32xf32> to vector<8x32xbf16>
      %cst_288 = arith.constant dense<0.000000e+00> : vector<8x128xf32>
      %311 = tpu.matmul %310, %278, %cst_288 {dimension_numbers = #tpu.dot_dimension_numbers<[1], [0], [0], [1], [0, 0, 1, 1], [], []>} : vector<8x32xbf16>, vector<32x128xbf16>, vector<8x128xf32> -> vector<8x128xf32>
      %312 = arith.addf %309, %311 : vector<8x128xf32>
      %313 = vector.extract_strided_slice %312 {offsets = [0, 0], sizes = [8, 96], strides = [1, 1]} : vector<8x128xf32> to vector<8x96xf32>
      %314 = arith.negf %313 : vector<8x96xf32>
      %315 = math.exp %314 : vector<8x96xf32>
      %cst_289 = arith.constant 1.000000e+00 : f32
      %316 = vector.broadcast %cst_289 : f32 to vector<8x96xf32>
      %317 = arith.addf %316, %315 : vector<8x96xf32>
      %318 = arith.divf %316, %317 : vector<8x96xf32>
      %319 = vector.extract_strided_slice %312 {offsets = [0, 96], sizes = [8, 32], strides = [1, 1]} : vector<8x128xf32> to vector<8x32xf32>
      %320 = math.tanh %319 : vector<8x32xf32>
      %321 = vector.extract_strided_slice %318 {offsets = [0, 0], sizes = [8, 32], strides = [1, 1]} : vector<8x96xf32> to vector<8x32xf32>
      %322 = vector.extract_strided_slice %318 {offsets = [0, 32], sizes = [8, 32], strides = [1, 1]} : vector<8x96xf32> to vector<8x32xf32>
      %323 = vector.extract_strided_slice %318 {offsets = [0, 64], sizes = [8, 32], strides = [1, 1]} : vector<8x96xf32> to vector<8x32xf32>
      %324 = arith.mulf %322, %301 : vector<8x32xf32>
      %325 = arith.mulf %321, %320 : vector<8x32xf32>
      %326 = arith.addf %324, %325 : vector<8x32xf32>
      %327 = math.tanh %326 : vector<8x32xf32>
      %328 = arith.mulf %323, %327 : vector<8x32xf32>
      %329 = arith.index_cast %307 : i32 to index
      %c0_290 = arith.constant 0 : index
      %330 = vector.load %arg9[%329, %c0_290] : memref<64x32xf32, #tpu.memory_space<vmem>>, vector<8x32xf32>
      tpu.vector_store %arg9[%329, %c0_290], %328 {strides = array<i32>} : memref<64x32xf32, #tpu.memory_space<vmem>>, vector<8x32xf32>,
      %c2_i32 = arith.constant 2 : i32
      %c8_i32_291 = arith.constant 8 : i32
      %331 = arith.muli %c2_i32, %c8_i32_291 : i32
      %332 = tpu.assume_multiple %331, 8 : i32
      %333 = arith.index_cast %332 : i32 to index
      %c0_292 = arith.constant 0 : index
      %334 = vector.load %arg10[%333, %c0_292] : memref<64x128xf32, #tpu.memory_space<vmem>>, vector<8x128xf32>
      %335 = arith.truncf %328 : vector<8x32xf32> to vector<8x32xbf16>
      %cst_293 = arith.constant dense<0.000000e+00> : vector<8x128xf32>
      %336 = tpu.matmul %335, %278, %cst_293 {dimension_numbers = #tpu.dot_dimension_numbers<[1], [0], [0], [1], [0, 0, 1, 1], [], []>} : vector<8x32xbf16>, vector<32x128xbf16>, vector<8x128xf32> -> vector<8x128xf32>
      %337 = arith.addf %334, %336 : vector<8x128xf32>
      %338 = vector.extract_strided_slice %337 {offsets = [0, 0], sizes = [8, 96], strides = [1, 1]} : vector<8x128xf32> to vector<8x96xf32>
      %339 = arith.negf %338 : vector<8x96xf32>
      %340 = math.exp %339 : vector<8x96xf32>
      %cst_294 = arith.constant 1.000000e+00 : f32
      %341 = vector.broadcast %cst_294 : f32 to vector<8x96xf32>
      %342 = arith.addf %341, %340 : vector<8x96xf32>
      %343 = arith.divf %341, %342 : vector<8x96xf32>
      %344 = vector.extract_strided_slice %337 {offsets = [0, 96], sizes = [8, 32], strides = [1, 1]} : vector<8x128xf32> to vector<8x32xf32>
      %345 = math.tanh %344 : vector<8x32xf32>
      %346 = vector.extract_strided_slice %343 {offsets = [0, 0], sizes = [8, 32], strides = [1, 1]} : vector<8x96xf32> to vector<8x32xf32>
      %347 = vector.extract_strided_slice %343 {offsets = [0, 32], sizes = [8, 32], strides = [1, 1]} : vector<8x96xf32> to vector<8x32xf32>
      %348 = vector.extract_strided_slice %343 {offsets = [0, 64], sizes = [8, 32], strides = [1, 1]} : vector<8x96xf32> to vector<8x32xf32>
      %349 = arith.mulf %347, %326 : vector<8x32xf32>
      %350 = arith.mulf %346, %345 : vector<8x32xf32>
      %351 = arith.addf %349, %350 : vector<8x32xf32>
      %352 = math.tanh %351 : vector<8x32xf32>
      %353 = arith.mulf %348, %352 : vector<8x32xf32>
      %354 = arith.index_cast %332 : i32 to index
      %c0_295 = arith.constant 0 : index
      %355 = vector.load %arg9[%354, %c0_295] : memref<64x32xf32, #tpu.memory_space<vmem>>, vector<8x32xf32>
      tpu.vector_store %arg9[%354, %c0_295], %353 {strides = array<i32>} : memref<64x32xf32, #tpu.memory_space<vmem>>, vector<8x32xf32>,
      %c3_i32 = arith.constant 3 : i32
      %c8_i32_296 = arith.constant 8 : i32
      %356 = arith.muli %c3_i32, %c8_i32_296 : i32
      %357 = tpu.assume_multiple %356, 8 : i32
      %358 = arith.index_cast %357 : i32 to index
      %c0_297 = arith.constant 0 : index
      %359 = vector.load %arg10[%358, %c0_297] : memref<64x128xf32, #tpu.memory_space<vmem>>, vector<8x128xf32>
      %360 = arith.truncf %353 : vector<8x32xf32> to vector<8x32xbf16>
      %cst_298 = arith.constant dense<0.000000e+00> : vector<8x128xf32>
      %361 = tpu.matmul %360, %278, %cst_298 {dimension_numbers = #tpu.dot_dimension_numbers<[1], [0], [0], [1], [0, 0, 1, 1], [], []>} : vector<8x32xbf16>, vector<32x128xbf16>, vector<8x128xf32> -> vector<8x128xf32>
      %362 = arith.addf %359, %361 : vector<8x128xf32>
      %363 = vector.extract_strided_slice %362 {offsets = [0, 0], sizes = [8, 96], strides = [1, 1]} : vector<8x128xf32> to vector<8x96xf32>
      %364 = arith.negf %363 : vector<8x96xf32>
      %365 = math.exp %364 : vector<8x96xf32>
      %cst_299 = arith.constant 1.000000e+00 : f32
      %366 = vector.broadcast %cst_299 : f32 to vector<8x96xf32>
      %367 = arith.addf %366, %365 : vector<8x96xf32>
      %368 = arith.divf %366, %367 : vector<8x96xf32>
      %369 = vector.extract_strided_slice %362 {offsets = [0, 96], sizes = [8, 32], strides = [1, 1]} : vector<8x128xf32> to vector<8x32xf32>
      %370 = math.tanh %369 : vector<8x32xf32>
      %371 = vector.extract_strided_slice %368 {offsets = [0, 0], sizes = [8, 32], strides = [1, 1]} : vector<8x96xf32> to vector<8x32xf32>
      %372 = vector.extract_strided_slice %368 {offsets = [0, 32], sizes = [8, 32], strides = [1, 1]} : vector<8x96xf32> to vector<8x32xf32>
      %373 = vector.extract_strided_slice %368 {offsets = [0, 64], sizes = [8, 32], strides = [1, 1]} : vector<8x96xf32> to vector<8x32xf32>
      %374 = arith.mulf %372, %351 : vector<8x32xf32>
      %375 = arith.mulf %371, %370 : vector<8x32xf32>
      %376 = arith.addf %374, %375 : vector<8x32xf32>
      %377 = math.tanh %376 : vector<8x32xf32>
      %378 = arith.mulf %373, %377 : vector<8x32xf32>
      %379 = arith.index_cast %357 : i32 to index
      %c0_300 = arith.constant 0 : index
      %380 = vector.load %arg9[%379, %c0_300] : memref<64x32xf32, #tpu.memory_space<vmem>>, vector<8x32xf32>
      tpu.vector_store %arg9[%379, %c0_300], %378 {strides = array<i32>} : memref<64x32xf32, #tpu.memory_space<vmem>>, vector<8x32xf32>,
      %c4_i32 = arith.constant 4 : i32
      %c8_i32_301 = arith.constant 8 : i32
      %381 = arith.muli %c4_i32, %c8_i32_301 : i32
      %382 = tpu.assume_multiple %381, 8 : i32
      %383 = arith.index_cast %382 : i32 to index
      %c0_302 = arith.constant 0 : index
      %384 = vector.load %arg10[%383, %c0_302] : memref<64x128xf32, #tpu.memory_space<vmem>>, vector<8x128xf32>
      %385 = arith.truncf %378 : vector<8x32xf32> to vector<8x32xbf16>
      %cst_303 = arith.constant dense<0.000000e+00> : vector<8x128xf32>
      %386 = tpu.matmul %385, %278, %cst_303 {dimension_numbers = #tpu.dot_dimension_numbers<[1], [0], [0], [1], [0, 0, 1, 1], [], []>} : vector<8x32xbf16>, vector<32x128xbf16>, vector<8x128xf32> -> vector<8x128xf32>
      %387 = arith.addf %384, %386 : vector<8x128xf32>
      %388 = vector.extract_strided_slice %387 {offsets = [0, 0], sizes = [8, 96], strides = [1, 1]} : vector<8x128xf32> to vector<8x96xf32>
      %389 = arith.negf %388 : vector<8x96xf32>
      %390 = math.exp %389 : vector<8x96xf32>
      %cst_304 = arith.constant 1.000000e+00 : f32
      %391 = vector.broadcast %cst_304 : f32 to vector<8x96xf32>
      %392 = arith.addf %391, %390 : vector<8x96xf32>
      %393 = arith.divf %391, %392 : vector<8x96xf32>
      %394 = vector.extract_strided_slice %387 {offsets = [0, 96], sizes = [8, 32], strides = [1, 1]} : vector<8x128xf32> to vector<8x32xf32>
      %395 = math.tanh %394 : vector<8x32xf32>
      %396 = vector.extract_strided_slice %393 {offsets = [0, 0], sizes = [8, 32], strides = [1, 1]} : vector<8x96xf32> to vector<8x32xf32>
      %397 = vector.extract_strided_slice %393 {offsets = [0, 32], sizes = [8, 32], strides = [1, 1]} : vector<8x96xf32> to vector<8x32xf32>
      %398 = vector.extract_strided_slice %393 {offsets = [0, 64], sizes = [8, 32], strides = [1, 1]} : vector<8x96xf32> to vector<8x32xf32>
      %399 = arith.mulf %397, %376 : vector<8x32xf32>
      %400 = arith.mulf %396, %395 : vector<8x32xf32>
      %401 = arith.addf %399, %400 : vector<8x32xf32>
      %402 = math.tanh %401 : vector<8x32xf32>
      %403 = arith.mulf %398, %402 : vector<8x32xf32>
      %404 = arith.index_cast %382 : i32 to index
      %c0_305 = arith.constant 0 : index
      %405 = vector.load %arg9[%404, %c0_305] : memref<64x32xf32, #tpu.memory_space<vmem>>, vector<8x32xf32>
      tpu.vector_store %arg9[%404, %c0_305], %403 {strides = array<i32>} : memref<64x32xf32, #tpu.memory_space<vmem>>, vector<8x32xf32>,
      %c5_i32 = arith.constant 5 : i32
      %c8_i32_306 = arith.constant 8 : i32
      %406 = arith.muli %c5_i32, %c8_i32_306 : i32
      %407 = tpu.assume_multiple %406, 8 : i32
      %408 = arith.index_cast %407 : i32 to index
      %c0_307 = arith.constant 0 : index
      %409 = vector.load %arg10[%408, %c0_307] : memref<64x128xf32, #tpu.memory_space<vmem>>, vector<8x128xf32>
      %410 = arith.truncf %403 : vector<8x32xf32> to vector<8x32xbf16>
      %cst_308 = arith.constant dense<0.000000e+00> : vector<8x128xf32>
      %411 = tpu.matmul %410, %278, %cst_308 {dimension_numbers = #tpu.dot_dimension_numbers<[1], [0], [0], [1], [0, 0, 1, 1], [], []>} : vector<8x32xbf16>, vector<32x128xbf16>, vector<8x128xf32> -> vector<8x128xf32>
      %412 = arith.addf %409, %411 : vector<8x128xf32>
      %413 = vector.extract_strided_slice %412 {offsets = [0, 0], sizes = [8, 96], strides = [1, 1]} : vector<8x128xf32> to vector<8x96xf32>
      %414 = arith.negf %413 : vector<8x96xf32>
      %415 = math.exp %414 : vector<8x96xf32>
      %cst_309 = arith.constant 1.000000e+00 : f32
      %416 = vector.broadcast %cst_309 : f32 to vector<8x96xf32>
      %417 = arith.addf %416, %415 : vector<8x96xf32>
      %418 = arith.divf %416, %417 : vector<8x96xf32>
      %419 = vector.extract_strided_slice %412 {offsets = [0, 96], sizes = [8, 32], strides = [1, 1]} : vector<8x128xf32> to vector<8x32xf32>
      %420 = math.tanh %419 : vector<8x32xf32>
      %421 = vector.extract_strided_slice %418 {offsets = [0, 0], sizes = [8, 32], strides = [1, 1]} : vector<8x96xf32> to vector<8x32xf32>
      %422 = vector.extract_strided_slice %418 {offsets = [0, 32], sizes = [8, 32], strides = [1, 1]} : vector<8x96xf32> to vector<8x32xf32>
      %423 = vector.extract_strided_slice %418 {offsets = [0, 64], sizes = [8, 32], strides = [1, 1]} : vector<8x96xf32> to vector<8x32xf32>
      %424 = arith.mulf %422, %401 : vector<8x32xf32>
      %425 = arith.mulf %421, %420 : vector<8x32xf32>
      %426 = arith.addf %424, %425 : vector<8x32xf32>
      %427 = math.tanh %426 : vector<8x32xf32>
      %428 = arith.mulf %423, %427 : vector<8x32xf32>
      %429 = arith.index_cast %407 : i32 to index
      %c0_310 = arith.constant 0 : index
      %430 = vector.load %arg9[%429, %c0_310] : memref<64x32xf32, #tpu.memory_space<vmem>>, vector<8x32xf32>
      tpu.vector_store %arg9[%429, %c0_310], %428 {strides = array<i32>} : memref<64x32xf32, #tpu.memory_space<vmem>>, vector<8x32xf32>,
      %c6_i32 = arith.constant 6 : i32
      %c8_i32_311 = arith.constant 8 : i32
      %431 = arith.muli %c6_i32, %c8_i32_311 : i32
      %432 = tpu.assume_multiple %431, 8 : i32
      %433 = arith.index_cast %432 : i32 to index
      %c0_312 = arith.constant 0 : index
      %434 = vector.load %arg10[%433, %c0_312] : memref<64x128xf32, #tpu.memory_space<vmem>>, vector<8x128xf32>
      %435 = arith.truncf %428 : vector<8x32xf32> to vector<8x32xbf16>
      %cst_313 = arith.constant dense<0.000000e+00> : vector<8x128xf32>
      %436 = tpu.matmul %435, %278, %cst_313 {dimension_numbers = #tpu.dot_dimension_numbers<[1], [0], [0], [1], [0, 0, 1, 1], [], []>} : vector<8x32xbf16>, vector<32x128xbf16>, vector<8x128xf32> -> vector<8x128xf32>
      %437 = arith.addf %434, %436 : vector<8x128xf32>
      %438 = vector.extract_strided_slice %437 {offsets = [0, 0], sizes = [8, 96], strides = [1, 1]} : vector<8x128xf32> to vector<8x96xf32>
      %439 = arith.negf %438 : vector<8x96xf32>
      %440 = math.exp %439 : vector<8x96xf32>
      %cst_314 = arith.constant 1.000000e+00 : f32
      %441 = vector.broadcast %cst_314 : f32 to vector<8x96xf32>
      %442 = arith.addf %441, %440 : vector<8x96xf32>
      %443 = arith.divf %441, %442 : vector<8x96xf32>
      %444 = vector.extract_strided_slice %437 {offsets = [0, 96], sizes = [8, 32], strides = [1, 1]} : vector<8x128xf32> to vector<8x32xf32>
      %445 = math.tanh %444 : vector<8x32xf32>
      %446 = vector.extract_strided_slice %443 {offsets = [0, 0], sizes = [8, 32], strides = [1, 1]} : vector<8x96xf32> to vector<8x32xf32>
      %447 = vector.extract_strided_slice %443 {offsets = [0, 32], sizes = [8, 32], strides = [1, 1]} : vector<8x96xf32> to vector<8x32xf32>
      %448 = vector.extract_strided_slice %443 {offsets = [0, 64], sizes = [8, 32], strides = [1, 1]} : vector<8x96xf32> to vector<8x32xf32>
      %449 = arith.mulf %447, %426 : vector<8x32xf32>
      %450 = arith.mulf %446, %445 : vector<8x32xf32>
      %451 = arith.addf %449, %450 : vector<8x32xf32>
      %452 = math.tanh %451 : vector<8x32xf32>
      %453 = arith.mulf %448, %452 : vector<8x32xf32>
      %454 = arith.index_cast %432 : i32 to index
      %c0_315 = arith.constant 0 : index
      %455 = vector.load %arg9[%454, %c0_315] : memref<64x32xf32, #tpu.memory_space<vmem>>, vector<8x32xf32>
      tpu.vector_store %arg9[%454, %c0_315], %453 {strides = array<i32>} : memref<64x32xf32, #tpu.memory_space<vmem>>, vector<8x32xf32>,
      %c7_i32 = arith.constant 7 : i32
      %c8_i32_316 = arith.constant 8 : i32
      %456 = arith.muli %c7_i32, %c8_i32_316 : i32
      %457 = tpu.assume_multiple %456, 8 : i32
      %458 = arith.index_cast %457 : i32 to index
      %c0_317 = arith.constant 0 : index
      %459 = vector.load %arg10[%458, %c0_317] : memref<64x128xf32, #tpu.memory_space<vmem>>, vector<8x128xf32>
      %460 = arith.truncf %453 : vector<8x32xf32> to vector<8x32xbf16>
      %cst_318 = arith.constant dense<0.000000e+00> : vector<8x128xf32>
      %461 = tpu.matmul %460, %278, %cst_318 {dimension_numbers = #tpu.dot_dimension_numbers<[1], [0], [0], [1], [0, 0, 1, 1], [], []>} : vector<8x32xbf16>, vector<32x128xbf16>, vector<8x128xf32> -> vector<8x128xf32>
      %462 = arith.addf %459, %461 : vector<8x128xf32>
      %463 = vector.extract_strided_slice %462 {offsets = [0, 0], sizes = [8, 96], strides = [1, 1]} : vector<8x128xf32> to vector<8x96xf32>
      %464 = arith.negf %463 : vector<8x96xf32>
      %465 = math.exp %464 : vector<8x96xf32>
      %cst_319 = arith.constant 1.000000e+00 : f32
      %466 = vector.broadcast %cst_319 : f32 to vector<8x96xf32>
      %467 = arith.addf %466, %465 : vector<8x96xf32>
      %468 = arith.divf %466, %467 : vector<8x96xf32>
      %469 = vector.extract_strided_slice %462 {offsets = [0, 96], sizes = [8, 32], strides = [1, 1]} : vector<8x128xf32> to vector<8x32xf32>
      %470 = math.tanh %469 : vector<8x32xf32>
      %471 = vector.extract_strided_slice %468 {offsets = [0, 0], sizes = [8, 32], strides = [1, 1]} : vector<8x96xf32> to vector<8x32xf32>
      %472 = vector.extract_strided_slice %468 {offsets = [0, 32], sizes = [8, 32], strides = [1, 1]} : vector<8x96xf32> to vector<8x32xf32>
      %473 = vector.extract_strided_slice %468 {offsets = [0, 64], sizes = [8, 32], strides = [1, 1]} : vector<8x96xf32> to vector<8x32xf32>
      %474 = arith.mulf %472, %451 : vector<8x32xf32>
      %475 = arith.mulf %471, %470 : vector<8x32xf32>
      %476 = arith.addf %474, %475 : vector<8x32xf32>
      %477 = math.tanh %476 : vector<8x32xf32>
      %478 = arith.mulf %473, %477 : vector<8x32xf32>
      %479 = arith.index_cast %457 : i32 to index
      %c0_320 = arith.constant 0 : index
      %480 = vector.load %arg9[%479, %c0_320] : memref<64x32xf32, #tpu.memory_space<vmem>>, vector<8x32xf32>
      tpu.vector_store %arg9[%479, %c0_320], %478 {strides = array<i32>} : memref<64x32xf32, #tpu.memory_space<vmem>>, vector<8x32xf32>,
      %c8_i32_321 = arith.constant 8 : i32
      %c0_322 = arith.constant 0 : index
      %c0_323 = arith.constant 0 : index
      %481 = vector.load %arg9[%c0_322, %c0_323] : memref<64x32xf32, #tpu.memory_space<vmem>>, vector<64x32xf32>
      %482 = arith.truncf %481 : vector<64x32xf32> to vector<64x32xbf16>
      %c1_324 = arith.constant 1 : index
      %c0_325 = arith.constant 0 : index
      %c0_326 = arith.constant 0 : index
      %483 = vector.load %arg3[%c1_324, %c0_325, %c0_326] : memref<2x32x128xbf16, #tpu.memory_space<vmem>>, vector<1x32x128xbf16>
      %484 = vector.shape_cast %483 : vector<1x32x128xbf16> to vector<32x128xbf16>
      %cst_327 = arith.constant dense<0.000000e+00> : vector<64x128xf32>
      %485 = tpu.matmul %482, %484, %cst_327 {dimension_numbers = #tpu.dot_dimension_numbers<[1], [0], [0], [1], [0, 0, 1, 1], [], []>} : vector<64x32xbf16>, vector<32x128xbf16>, vector<64x128xf32> -> vector<64x128xf32>
      %c1_328 = arith.constant 1 : index
      %c0_329 = arith.constant 0 : index
      %c0_330 = arith.constant 0 : index
      %486 = vector.load %arg5[%c1_328, %c0_329, %c0_330] : memref<2x1x128xf32, #tpu.memory_space<vmem>>, vector<1x1x128xf32>
      %487 = vector.shape_cast %486 : vector<1x1x128xf32> to vector<1x128xf32>
      %488 = vector.broadcast %487 : vector<1x128xf32> to vector<64x128xf32>
      %489 = arith.addf %485, %488 : vector<64x128xf32>
      %c0_331 = arith.constant 0 : index
      %c0_332 = arith.constant 0 : index
      %490 = vector.load %arg10[%c0_331, %c0_332] : memref<64x128xf32, #tpu.memory_space<vmem>>, vector<64x128xf32>
      tpu.vector_store %arg10[%c0_331, %c0_332], %489 {strides = array<i32>} : memref<64x128xf32, #tpu.memory_space<vmem>>, vector<64x128xf32>,
      %c1_333 = arith.constant 1 : index
      %c0_334 = arith.constant 0 : index
      %c0_335 = arith.constant 0 : index
      %491 = vector.load %arg4[%c1_333, %c0_334, %c0_335] : memref<2x32x128xbf16, #tpu.memory_space<vmem>>, vector<1x32x128xbf16>
      %492 = vector.shape_cast %491 : vector<1x32x128xbf16> to vector<32x128xbf16>
      %cst_336 = arith.constant 0.000000e+00 : f32
      %493 = vector.broadcast %cst_336 : f32 to vector<8x32xf32>
      %cst_337 = arith.constant 0.000000e+00 : f32
      %494 = vector.broadcast %cst_337 : f32 to vector<8x32xf32>
      %c0_i32_338 = arith.constant 0 : i32
      %c8_i32_339 = arith.constant 8 : i32
      %495 = arith.muli %c0_i32_338, %c8_i32_339 : i32
      %496 = tpu.assume_multiple %495, 8 : i32
      %497 = arith.index_cast %496 : i32 to index
      %c0_340 = arith.constant 0 : index
      %498 = vector.load %arg10[%497, %c0_340] : memref<64x128xf32, #tpu.memory_space<vmem>>, vector<8x128xf32>
      %499 = arith.truncf %493 : vector<8x32xf32> to vector<8x32xbf16>
      %cst_341 = arith.constant dense<0.000000e+00> : vector<8x128xf32>
      %500 = tpu.matmul %499, %492, %cst_341 {dimension_numbers = #tpu.dot_dimension_numbers<[1], [0], [0], [1], [0, 0, 1, 1], [], []>} : vector<8x32xbf16>, vector<32x128xbf16>, vector<8x128xf32> -> vector<8x128xf32>
      %501 = arith.addf %498, %500 : vector<8x128xf32>
      %502 = vector.extract_strided_slice %501 {offsets = [0, 0], sizes = [8, 96], strides = [1, 1]} : vector<8x128xf32> to vector<8x96xf32>
      %503 = arith.negf %502 : vector<8x96xf32>
      %504 = math.exp %503 : vector<8x96xf32>
      %cst_342 = arith.constant 1.000000e+00 : f32
      %505 = vector.broadcast %cst_342 : f32 to vector<8x96xf32>
      %506 = arith.addf %505, %504 : vector<8x96xf32>
      %507 = arith.divf %505, %506 : vector<8x96xf32>
      %508 = vector.extract_strided_slice %501 {offsets = [0, 96], sizes = [8, 32], strides = [1, 1]} : vector<8x128xf32> to vector<8x32xf32>
      %509 = math.tanh %508 : vector<8x32xf32>
      %510 = vector.extract_strided_slice %507 {offsets = [0, 0], sizes = [8, 32], strides = [1, 1]} : vector<8x96xf32> to vector<8x32xf32>
      %511 = vector.extract_strided_slice %507 {offsets = [0, 32], sizes = [8, 32], strides = [1, 1]} : vector<8x96xf32> to vector<8x32xf32>
      %512 = vector.extract_strided_slice %507 {offsets = [0, 64], sizes = [8, 32], strides = [1, 1]} : vector<8x96xf32> to vector<8x32xf32>
      %513 = arith.mulf %511, %494 : vector<8x32xf32>
      %514 = arith.mulf %510, %509 : vector<8x32xf32>
      %515 = arith.addf %513, %514 : vector<8x32xf32>
      %516 = math.tanh %515 : vector<8x32xf32>
      %517 = arith.mulf %512, %516 : vector<8x32xf32>
      %c1_i32_343 = arith.constant 1 : i32
      %c8_i32_344 = arith.constant 8 : i32
      %518 = arith.muli %c1_i32_343, %c8_i32_344 : i32
      %519 = tpu.assume_multiple %518, 8 : i32
      %520 = arith.index_cast %519 : i32 to index
      %c0_345 = arith.constant 0 : index
      %521 = vector.load %arg10[%520, %c0_345] : memref<64x128xf32, #tpu.memory_space<vmem>>, vector<8x128xf32>
      %522 = arith.truncf %517 : vector<8x32xf32> to vector<8x32xbf16>
      %cst_346 = arith.constant dense<0.000000e+00> : vector<8x128xf32>
      %523 = tpu.matmul %522, %492, %cst_346 {dimension_numbers = #tpu.dot_dimension_numbers<[1], [0], [0], [1], [0, 0, 1, 1], [], []>} : vector<8x32xbf16>, vector<32x128xbf16>, vector<8x128xf32> -> vector<8x128xf32>
      %524 = arith.addf %521, %523 : vector<8x128xf32>
      %525 = vector.extract_strided_slice %524 {offsets = [0, 0], sizes = [8, 96], strides = [1, 1]} : vector<8x128xf32> to vector<8x96xf32>
      %526 = arith.negf %525 : vector<8x96xf32>
      %527 = math.exp %526 : vector<8x96xf32>
      %cst_347 = arith.constant 1.000000e+00 : f32
      %528 = vector.broadcast %cst_347 : f32 to vector<8x96xf32>
      %529 = arith.addf %528, %527 : vector<8x96xf32>
      %530 = arith.divf %528, %529 : vector<8x96xf32>
      %531 = vector.extract_strided_slice %524 {offsets = [0, 96], sizes = [8, 32], strides = [1, 1]} : vector<8x128xf32> to vector<8x32xf32>
      %532 = math.tanh %531 : vector<8x32xf32>
      %533 = vector.extract_strided_slice %530 {offsets = [0, 0], sizes = [8, 32], strides = [1, 1]} : vector<8x96xf32> to vector<8x32xf32>
      %534 = vector.extract_strided_slice %530 {offsets = [0, 32], sizes = [8, 32], strides = [1, 1]} : vector<8x96xf32> to vector<8x32xf32>
      %535 = vector.extract_strided_slice %530 {offsets = [0, 64], sizes = [8, 32], strides = [1, 1]} : vector<8x96xf32> to vector<8x32xf32>
      %536 = arith.mulf %534, %515 : vector<8x32xf32>
      %537 = arith.mulf %533, %532 : vector<8x32xf32>
      %538 = arith.addf %536, %537 : vector<8x32xf32>
      %539 = math.tanh %538 : vector<8x32xf32>
      %540 = arith.mulf %535, %539 : vector<8x32xf32>
      %c2_i32_348 = arith.constant 2 : i32
      %c8_i32_349 = arith.constant 8 : i32
      %541 = arith.muli %c2_i32_348, %c8_i32_349 : i32
      %542 = tpu.assume_multiple %541, 8 : i32
      %543 = arith.index_cast %542 : i32 to index
      %c0_350 = arith.constant 0 : index
      %544 = vector.load %arg10[%543, %c0_350] : memref<64x128xf32, #tpu.memory_space<vmem>>, vector<8x128xf32>
      %545 = arith.truncf %540 : vector<8x32xf32> to vector<8x32xbf16>
      %cst_351 = arith.constant dense<0.000000e+00> : vector<8x128xf32>
      %546 = tpu.matmul %545, %492, %cst_351 {dimension_numbers = #tpu.dot_dimension_numbers<[1], [0], [0], [1], [0, 0, 1, 1], [], []>} : vector<8x32xbf16>, vector<32x128xbf16>, vector<8x128xf32> -> vector<8x128xf32>
      %547 = arith.addf %544, %546 : vector<8x128xf32>
      %548 = vector.extract_strided_slice %547 {offsets = [0, 0], sizes = [8, 96], strides = [1, 1]} : vector<8x128xf32> to vector<8x96xf32>
      %549 = arith.negf %548 : vector<8x96xf32>
      %550 = math.exp %549 : vector<8x96xf32>
      %cst_352 = arith.constant 1.000000e+00 : f32
      %551 = vector.broadcast %cst_352 : f32 to vector<8x96xf32>
      %552 = arith.addf %551, %550 : vector<8x96xf32>
      %553 = arith.divf %551, %552 : vector<8x96xf32>
      %554 = vector.extract_strided_slice %547 {offsets = [0, 96], sizes = [8, 32], strides = [1, 1]} : vector<8x128xf32> to vector<8x32xf32>
      %555 = math.tanh %554 : vector<8x32xf32>
      %556 = vector.extract_strided_slice %553 {offsets = [0, 0], sizes = [8, 32], strides = [1, 1]} : vector<8x96xf32> to vector<8x32xf32>
      %557 = vector.extract_strided_slice %553 {offsets = [0, 32], sizes = [8, 32], strides = [1, 1]} : vector<8x96xf32> to vector<8x32xf32>
      %558 = vector.extract_strided_slice %553 {offsets = [0, 64], sizes = [8, 32], strides = [1, 1]} : vector<8x96xf32> to vector<8x32xf32>
      %559 = arith.mulf %557, %538 : vector<8x32xf32>
      %560 = arith.mulf %556, %555 : vector<8x32xf32>
      %561 = arith.addf %559, %560 : vector<8x32xf32>
      %562 = math.tanh %561 : vector<8x32xf32>
      %563 = arith.mulf %558, %562 : vector<8x32xf32>
      %c3_i32_353 = arith.constant 3 : i32
      %c8_i32_354 = arith.constant 8 : i32
      %564 = arith.muli %c3_i32_353, %c8_i32_354 : i32
      %565 = tpu.assume_multiple %564, 8 : i32
      %566 = arith.index_cast %565 : i32 to index
      %c0_355 = arith.constant 0 : index
      %567 = vector.load %arg10[%566, %c0_355] : memref<64x128xf32, #tpu.memory_space<vmem>>, vector<8x128xf32>
      %568 = arith.truncf %563 : vector<8x32xf32> to vector<8x32xbf16>
      %cst_356 = arith.constant dense<0.000000e+00> : vector<8x128xf32>
      %569 = tpu.matmul %568, %492, %cst_356 {dimension_numbers = #tpu.dot_dimension_numbers<[1], [0], [0], [1], [0, 0, 1, 1], [], []>} : vector<8x32xbf16>, vector<32x128xbf16>, vector<8x128xf32> -> vector<8x128xf32>
      %570 = arith.addf %567, %569 : vector<8x128xf32>
      %571 = vector.extract_strided_slice %570 {offsets = [0, 0], sizes = [8, 96], strides = [1, 1]} : vector<8x128xf32> to vector<8x96xf32>
      %572 = arith.negf %571 : vector<8x96xf32>
      %573 = math.exp %572 : vector<8x96xf32>
      %cst_357 = arith.constant 1.000000e+00 : f32
      %574 = vector.broadcast %cst_357 : f32 to vector<8x96xf32>
      %575 = arith.addf %574, %573 : vector<8x96xf32>
      %576 = arith.divf %574, %575 : vector<8x96xf32>
      %577 = vector.extract_strided_slice %570 {offsets = [0, 96], sizes = [8, 32], strides = [1, 1]} : vector<8x128xf32> to vector<8x32xf32>
      %578 = math.tanh %577 : vector<8x32xf32>
      %579 = vector.extract_strided_slice %576 {offsets = [0, 0], sizes = [8, 32], strides = [1, 1]} : vector<8x96xf32> to vector<8x32xf32>
      %580 = vector.extract_strided_slice %576 {offsets = [0, 32], sizes = [8, 32], strides = [1, 1]} : vector<8x96xf32> to vector<8x32xf32>
      %581 = vector.extract_strided_slice %576 {offsets = [0, 64], sizes = [8, 32], strides = [1, 1]} : vector<8x96xf32> to vector<8x32xf32>
      %582 = arith.mulf %580, %561 : vector<8x32xf32>
      %583 = arith.mulf %579, %578 : vector<8x32xf32>
      %584 = arith.addf %582, %583 : vector<8x32xf32>
      %585 = math.tanh %584 : vector<8x32xf32>
      %586 = arith.mulf %581, %585 : vector<8x32xf32>
      %c4_i32_358 = arith.constant 4 : i32
      %c8_i32_359 = arith.constant 8 : i32
      %587 = arith.muli %c4_i32_358, %c8_i32_359 : i32
      %588 = tpu.assume_multiple %587, 8 : i32
      %589 = arith.index_cast %588 : i32 to index
      %c0_360 = arith.constant 0 : index
      %590 = vector.load %arg10[%589, %c0_360] : memref<64x128xf32, #tpu.memory_space<vmem>>, vector<8x128xf32>
      %591 = arith.truncf %586 : vector<8x32xf32> to vector<8x32xbf16>
      %cst_361 = arith.constant dense<0.000000e+00> : vector<8x128xf32>
      %592 = tpu.matmul %591, %492, %cst_361 {dimension_numbers = #tpu.dot_dimension_numbers<[1], [0], [0], [1], [0, 0, 1, 1], [], []>} : vector<8x32xbf16>, vector<32x128xbf16>, vector<8x128xf32> -> vector<8x128xf32>
      %593 = arith.addf %590, %592 : vector<8x128xf32>
      %594 = vector.extract_strided_slice %593 {offsets = [0, 0], sizes = [8, 96], strides = [1, 1]} : vector<8x128xf32> to vector<8x96xf32>
      %595 = arith.negf %594 : vector<8x96xf32>
      %596 = math.exp %595 : vector<8x96xf32>
      %cst_362 = arith.constant 1.000000e+00 : f32
      %597 = vector.broadcast %cst_362 : f32 to vector<8x96xf32>
      %598 = arith.addf %597, %596 : vector<8x96xf32>
      %599 = arith.divf %597, %598 : vector<8x96xf32>
      %600 = vector.extract_strided_slice %593 {offsets = [0, 96], sizes = [8, 32], strides = [1, 1]} : vector<8x128xf32> to vector<8x32xf32>
      %601 = math.tanh %600 : vector<8x32xf32>
      %602 = vector.extract_strided_slice %599 {offsets = [0, 0], sizes = [8, 32], strides = [1, 1]} : vector<8x96xf32> to vector<8x32xf32>
      %603 = vector.extract_strided_slice %599 {offsets = [0, 32], sizes = [8, 32], strides = [1, 1]} : vector<8x96xf32> to vector<8x32xf32>
      %604 = vector.extract_strided_slice %599 {offsets = [0, 64], sizes = [8, 32], strides = [1, 1]} : vector<8x96xf32> to vector<8x32xf32>
      %605 = arith.mulf %603, %584 : vector<8x32xf32>
      %606 = arith.mulf %602, %601 : vector<8x32xf32>
      %607 = arith.addf %605, %606 : vector<8x32xf32>
      %608 = math.tanh %607 : vector<8x32xf32>
      %609 = arith.mulf %604, %608 : vector<8x32xf32>
      %c5_i32_363 = arith.constant 5 : i32
      %c8_i32_364 = arith.constant 8 : i32
      %610 = arith.muli %c5_i32_363, %c8_i32_364 : i32
      %611 = tpu.assume_multiple %610, 8 : i32
      %612 = arith.index_cast %611 : i32 to index
      %c0_365 = arith.constant 0 : index
      %613 = vector.load %arg10[%612, %c0_365] : memref<64x128xf32, #tpu.memory_space<vmem>>, vector<8x128xf32>
      %614 = arith.truncf %609 : vector<8x32xf32> to vector<8x32xbf16>
      %cst_366 = arith.constant dense<0.000000e+00> : vector<8x128xf32>
      %615 = tpu.matmul %614, %492, %cst_366 {dimension_numbers = #tpu.dot_dimension_numbers<[1], [0], [0], [1], [0, 0, 1, 1], [], []>} : vector<8x32xbf16>, vector<32x128xbf16>, vector<8x128xf32> -> vector<8x128xf32>
      %616 = arith.addf %613, %615 : vector<8x128xf32>
      %617 = vector.extract_strided_slice %616 {offsets = [0, 0], sizes = [8, 96], strides = [1, 1]} : vector<8x128xf32> to vector<8x96xf32>
      %618 = arith.negf %617 : vector<8x96xf32>
      %619 = math.exp %618 : vector<8x96xf32>
      %cst_367 = arith.constant 1.000000e+00 : f32
      %620 = vector.broadcast %cst_367 : f32 to vector<8x96xf32>
      %621 = arith.addf %620, %619 : vector<8x96xf32>
      %622 = arith.divf %620, %621 : vector<8x96xf32>
      %623 = vector.extract_strided_slice %616 {offsets = [0, 96], sizes = [8, 32], strides = [1, 1]} : vector<8x128xf32> to vector<8x32xf32>
      %624 = math.tanh %623 : vector<8x32xf32>
      %625 = vector.extract_strided_slice %622 {offsets = [0, 0], sizes = [8, 32], strides = [1, 1]} : vector<8x96xf32> to vector<8x32xf32>
      %626 = vector.extract_strided_slice %622 {offsets = [0, 32], sizes = [8, 32], strides = [1, 1]} : vector<8x96xf32> to vector<8x32xf32>
      %627 = vector.extract_strided_slice %622 {offsets = [0, 64], sizes = [8, 32], strides = [1, 1]} : vector<8x96xf32> to vector<8x32xf32>
      %628 = arith.mulf %626, %607 : vector<8x32xf32>
      %629 = arith.mulf %625, %624 : vector<8x32xf32>
      %630 = arith.addf %628, %629 : vector<8x32xf32>
      %631 = math.tanh %630 : vector<8x32xf32>
      %632 = arith.mulf %627, %631 : vector<8x32xf32>
      %c6_i32_368 = arith.constant 6 : i32
      %c8_i32_369 = arith.constant 8 : i32
      %633 = arith.muli %c6_i32_368, %c8_i32_369 : i32
      %634 = tpu.assume_multiple %633, 8 : i32
      %635 = arith.index_cast %634 : i32 to index
      %c0_370 = arith.constant 0 : index
      %636 = vector.load %arg10[%635, %c0_370] : memref<64x128xf32, #tpu.memory_space<vmem>>, vector<8x128xf32>
      %637 = arith.truncf %632 : vector<8x32xf32> to vector<8x32xbf16>
      %cst_371 = arith.constant dense<0.000000e+00> : vector<8x128xf32>
      %638 = tpu.matmul %637, %492, %cst_371 {dimension_numbers = #tpu.dot_dimension_numbers<[1], [0], [0], [1], [0, 0, 1, 1], [], []>} : vector<8x32xbf16>, vector<32x128xbf16>, vector<8x128xf32> -> vector<8x128xf32>
      %639 = arith.addf %636, %638 : vector<8x128xf32>
      %640 = vector.extract_strided_slice %639 {offsets = [0, 0], sizes = [8, 96], strides = [1, 1]} : vector<8x128xf32> to vector<8x96xf32>
      %641 = arith.negf %640 : vector<8x96xf32>
      %642 = math.exp %641 : vector<8x96xf32>
      %cst_372 = arith.constant 1.000000e+00 : f32
      %643 = vector.broadcast %cst_372 : f32 to vector<8x96xf32>
      %644 = arith.addf %643, %642 : vector<8x96xf32>
      %645 = arith.divf %643, %644 : vector<8x96xf32>
      %646 = vector.extract_strided_slice %639 {offsets = [0, 96], sizes = [8, 32], strides = [1, 1]} : vector<8x128xf32> to vector<8x32xf32>
      %647 = math.tanh %646 : vector<8x32xf32>
      %648 = vector.extract_strided_slice %645 {offsets = [0, 0], sizes = [8, 32], strides = [1, 1]} : vector<8x96xf32> to vector<8x32xf32>
      %649 = vector.extract_strided_slice %645 {offsets = [0, 32], sizes = [8, 32], strides = [1, 1]} : vector<8x96xf32> to vector<8x32xf32>
      %650 = vector.extract_strided_slice %645 {offsets = [0, 64], sizes = [8, 32], strides = [1, 1]} : vector<8x96xf32> to vector<8x32xf32>
      %651 = arith.mulf %649, %630 : vector<8x32xf32>
      %652 = arith.mulf %648, %647 : vector<8x32xf32>
      %653 = arith.addf %651, %652 : vector<8x32xf32>
      %654 = math.tanh %653 : vector<8x32xf32>
      %655 = arith.mulf %650, %654 : vector<8x32xf32>
      %c7_i32_373 = arith.constant 7 : i32
      %c8_i32_374 = arith.constant 8 : i32
      %656 = arith.muli %c7_i32_373, %c8_i32_374 : i32
      %657 = tpu.assume_multiple %656, 8 : i32
      %658 = arith.index_cast %657 : i32 to index
      %c0_375 = arith.constant 0 : index
      %659 = vector.load %arg10[%658, %c0_375] : memref<64x128xf32, #tpu.memory_space<vmem>>, vector<8x128xf32>
      %660 = arith.truncf %655 : vector<8x32xf32> to vector<8x32xbf16>
      %cst_376 = arith.constant dense<0.000000e+00> : vector<8x128xf32>
      %661 = tpu.matmul %660, %492, %cst_376 {dimension_numbers = #tpu.dot_dimension_numbers<[1], [0], [0], [1], [0, 0, 1, 1], [], []>} : vector<8x32xbf16>, vector<32x128xbf16>, vector<8x128xf32> -> vector<8x128xf32>
      %662 = arith.addf %659, %661 : vector<8x128xf32>
      %663 = vector.extract_strided_slice %662 {offsets = [0, 0], sizes = [8, 96], strides = [1, 1]} : vector<8x128xf32> to vector<8x96xf32>
      %664 = arith.negf %663 : vector<8x96xf32>
      %665 = math.exp %664 : vector<8x96xf32>
      %cst_377 = arith.constant 1.000000e+00 : f32
      %666 = vector.broadcast %cst_377 : f32 to vector<8x96xf32>
      %667 = arith.addf %666, %665 : vector<8x96xf32>
      %668 = arith.divf %666, %667 : vector<8x96xf32>
      %669 = vector.extract_strided_slice %662 {offsets = [0, 96], sizes = [8, 32], strides = [1, 1]} : vector<8x128xf32> to vector<8x32xf32>
      %670 = math.tanh %669 : vector<8x32xf32>
      %671 = vector.extract_strided_slice %668 {offsets = [0, 0], sizes = [8, 32], strides = [1, 1]} : vector<8x96xf32> to vector<8x32xf32>
      %672 = vector.extract_strided_slice %668 {offsets = [0, 32], sizes = [8, 32], strides = [1, 1]} : vector<8x96xf32> to vector<8x32xf32>
      %673 = vector.extract_strided_slice %668 {offsets = [0, 64], sizes = [8, 32], strides = [1, 1]} : vector<8x96xf32> to vector<8x32xf32>
      %674 = arith.mulf %672, %653 : vector<8x32xf32>
      %675 = arith.mulf %671, %670 : vector<8x32xf32>
      %676 = arith.addf %674, %675 : vector<8x32xf32>
      %677 = math.tanh %676 : vector<8x32xf32>
      %678 = arith.mulf %673, %677 : vector<8x32xf32>
      %c8_i32_378 = arith.constant 8 : i32
      %c0_379 = arith.constant 0 : index
      %c0_380 = arith.constant 0 : index
      %679 = vector.load %arg11[%c0_379, %c0_380] : memref<8x32xf32, #tpu.memory_space<vmem>>, vector<8x32xf32>
      tpu.vector_store %arg11[%c0_379, %c0_380], %678 {strides = array<i32>} : memref<8x32xf32, #tpu.memory_space<vmem>>, vector<8x32xf32>,
    } else {
    }
    %c0 = arith.constant 0 : index
    %c0_1 = arith.constant 0 : index
    %3 = vector.load %arg11[%c0, %c0_1] : memref<8x32xf32, #tpu.memory_space<vmem>>, vector<8x32xf32>
    %4 = arith.truncf %3 : vector<8x32xf32> to vector<8x32xbf16>
    %c0_2 = arith.constant 0 : index
    %c0_3 = arith.constant 0 : index
    %5 = vector.load %arg6[%c0_2, %c0_3] : memref<32x128xbf16, #tpu.memory_space<vmem>>, vector<32x128xbf16>
    %cst = arith.constant dense<0.000000e+00> : vector<8x128xf32>
    %6 = tpu.matmul %4, %5, %cst {dimension_numbers = #tpu.dot_dimension_numbers<[1], [0], [0], [1], [0, 0, 1, 1], [], []>} : vector<8x32xbf16>, vector<32x128xbf16>, vector<8x128xf32> -> vector<8x128xf32>
    %c0_4 = arith.constant 0 : index
    %c0_5 = arith.constant 0 : index
    %7 = vector.load %arg7[%c0_4, %c0_5] : memref<1x128xf32, #tpu.memory_space<vmem>>, vector<1x128xf32>
    %8 = vector.broadcast %7 : vector<1x128xf32> to vector<8x128xf32>
    %9 = arith.addf %6, %8 : vector<8x128xf32>
    %c0_6 = arith.constant 0 : index
    %c0_7 = arith.constant 0 : index
    %10 = vector.load %arg8[%c0_6, %c0_7] : memref<8x128xf32, #tpu.memory_space<vmem>>, vector<8x128xf32>
    tpu.vector_store %arg8[%c0_6, %c0_7], %9 {strides = array<i32>} : memref<8x128xf32, #tpu.memory_space<vmem>>, vector<8x128xf32>,
    return
  }
  func.func @transform_0(%arg0: i32, %arg1: memref<8x8xi32, #tpu.memory_space<smem>>) -> (i32, i32) {
    %c0_i32 = arith.constant 0 : i32
    %c0_i32_0 = arith.constant 0 : i32
    %c0_i32_1 = arith.constant 0 : i32
    return %c0_i32, %c0_i32_0 : i32, i32
  }
  func.func @transform_1(%arg0: i32, %arg1: memref<8x8xi32, #tpu.memory_space<smem>>) -> (i32, i32, i32) {
    %c0_i32 = arith.constant 0 : i32
    %c0_i32_0 = arith.constant 0 : i32
    %c0_i32_1 = arith.constant 0 : i32
    %c0_i32_2 = arith.constant 0 : i32
    return %c0_i32, %c0_i32_0, %c0_i32_1 : i32, i32, i32
  }
  func.func @transform_2(%arg0: i32, %arg1: memref<8x8xi32, #tpu.memory_space<smem>>) -> (i32, i32, i32) {
    %c0_i32 = arith.constant 0 : i32
    %c0_i32_0 = arith.constant 0 : i32
    %c0_i32_1 = arith.constant 0 : i32
    %c0_i32_2 = arith.constant 0 : i32
    return %c0_i32, %c0_i32_0, %c0_i32_1 : i32, i32, i32
  }
  func.func @transform_3(%arg0: i32, %arg1: memref<8x8xi32, #tpu.memory_space<smem>>) -> (i32, i32, i32) {
    %c0_i32 = arith.constant 0 : i32
    %c0_i32_0 = arith.constant 0 : i32
    %c0_i32_1 = arith.constant 0 : i32
    %c0_i32_2 = arith.constant 0 : i32
    return %c0_i32, %c0_i32_0, %c0_i32_1 : i32, i32, i32
  }
  func.func @transform_4(%arg0: i32, %arg1: memref<8x8xi32, #tpu.memory_space<smem>>) -> (i32, i32) {
    %c0_i32 = arith.constant 0 : i32
    %c0_i32_0 = arith.constant 0 : i32
    return %c0_i32, %arg0 : i32, i32
  }
  func.func @transform_5(%arg0: i32, %arg1: memref<8x8xi32, #tpu.memory_space<smem>>) -> (i32, i32) {
    %c0_i32 = arith.constant 0 : i32
    %c0_i32_0 = arith.constant 0 : i32
    return %c0_i32, %arg0 : i32, i32
  }
  func.func @transform_6(%arg0: i32, %arg1: memref<8x8xi32, #tpu.memory_space<smem>>) -> (i32, i32) {
    %c0_i32 = arith.constant 0 : i32
    %c0_i32_0 = arith.constant 0 : i32
    return %c0_i32, %arg0 : i32, i32
  }
}

</mosaic_0001>

<bundles_post_ra>
// kernel: next_word_lstm_forward.1
= control target key start
LH: loop header
LB: loop body
LE: loop exit
PB: predicated region body
PF: predicated region fallthrough
CT: control target
= control target key end

     0   :  { %s3124_s0 = inlined_call_operand.vmem [shape: s32[8,8], index: 0, kind: input, shape index: {}]   ;;  %s3125_s1 = inlined_call_operand.vmem [shape: f32[64,32], index: 1, kind: input, shape index: {}]   ;;  %s3126_s2 = inlined_call_operand.vmem [shape: bf16[2,32,128], index: 2, kind: input, shape index: {}]   ;;  %s3127_s3 = inlined_call_operand.vmem [shape: bf16[2,32,128], index: 3, kind: input, shape index: {}]   ;;  %s3128_s4 = inlined_call_operand.vmem [shape: f32[2,1,128], index: 4, kind: input, shape index: {}]   ;;  %s3129_s5 = inlined_call_operand.vmem [shape: bf16[32,128], index: 5, kind: input, shape index: {}]   ;;  %s3130_s6 = inlined_call_operand.vmem [shape: f32[1,128], index: 6, kind: input, shape index: {}]   ;;  %s3131_s7 = inlined_call_operand.vmem [shape: f32[8,128], index: 7, kind: output, shape index: {}]  }
   0x1   :  { %s12_s26 = sshll.u32 %s3124_s0, 4  ;;  %s13_s26 = int_to_ptr.vmem [resolvable:$true] %s12_s26 }
   0x2   :  { %s2413_s27 = scalar_lea.vmem %s13_s26, 128  ;;  %p2418_p1 = scmp.lt.s32.totalorder %s13_s26, %s13_s26 }
   0x3   :  { %p2414_p0 = scmp.ne.s32.totalorder %s13_s26, %s2413_s27  ;;  %p2419_p2 = scmp.lt.s32.totalorder %s2413_s27, %s2413_s27 }
   0x5   :  { %p2420_p3 = por %p2419_p2, %p2418_p1 }
   0x7   :  { %p2421_p4 = pnand %p2420_p3, %p2414_p0 }
   0x9   :  { %2424 = shalt.err (!%p2421_p4)  }
   0xa   :  { %s2427_s28 = smov [#allocation6]  }
   0xb   :  { %15 = dma.vmem_to_smem %s13_s26, 128, %s2427_s28, [#allocation5] }
   0xc   :  { %2425 = dma.done.wait [#allocation5], 128 }
   0xd   :  { %2426 = vsyncadd [#allocation5], 4294967168 }
   0xe   :  { %17 = sfence }
   0xf   :  { %v2479_v0 = vld [vmem:[%s3127_s3 + $0x8] sm:$0xff]   ;;  %v2428_v1 = vmov 0.0   ;;  %v2489_v3 = vld [vmem:[%s3127_s3] sm:$0xff]   ;;  %vm2429_vm0 = vmmov 0   ;;  %s35_s13 = sld [smem:[#allocation6]]  ;;  %vm38_vm1 = vcmask 253952  }
  0x10   :  { %2121 = vmatprep.subr.bf16.mxu1 %v2428_v1  ;;  %v2276_v2 = vld [vmem:[%s3126_s2 + $0x8] sm:$0xff]   ;;  %2125 = vmatprep.mubr.msk.bf16.mxu1 %vm2429_vm0, %v2428_v1  ;;  %v2278_v4 = vld [vmem:[%s3126_s2] sm:$0xff]   ;;  %s1922_s14 = sld [smem:[#allocation6 + $0x80]]  ;;  %v2430_v5 = vmov 0   ;;  %vm327_vm2 = vcmask 261120  }
  0x11   :  { %2122 = vmatpush3.bf16.msra.mxu1 %v2479_v0  ;;  %2109 = vmatprep.subr.bf16.mxu0 %v2276_v2  ;;  %s1923_s15 = sld [smem:[#allocation6 + $0x100]]  ;;  %v2670_v49 = vld [vmem:[%s3128_s4] ss:$0 sm:$0xff] }
  0x12   :  { %2123 = vmatprep.subr.bf16.mxu1 %v2428_v1  ;;  %2110 = vmatpush3.bf16.msra.mxu0 %v2276_v2  ;;  %s1924_s16 = sld [smem:[#allocation6 + $0x180]] }
  0x13   :  { %2111 = vmatprep.subr.bf16.mxu0 %v2278_v4  ;;  %s1925_s17 = sld [smem:[#allocation6 + $0x200]] }
  0x14   :  { %s2500_s18 = sld [smem:[#allocation6 + $0x280]] }
  0x15   :  { %2124 = vmatpush3.bf16.msra.mxu1 %v2489_v3  ;;  %s36_s21 = scalar_lea.vmem %s3125_s1, %s35_s13  ;;  %s2506_s22 = sld [smem:[#allocation6 + $0x300]] }
  0x16   :  { %2129 = vmatprep.subr.bf16.mxu1 %v2428_v1  ;;  %2112 = vmatpush3.bf16.msra.mxu0 %v2278_v4  ;;  %v37_v6 = vld [vmem:[%s36_s21] sm:$0x1]  ;;  %s41_s25 = scalar_lea.vmem %s3125_s1, %s1922_s14  ;;  %s2514_s26 = sld [smem:[#allocation6 + $0x380]] }
  0x17   :  { %2137 = vmatprep.subr.bf16.mxu0 %v2428_v1  ;;  %39 = vst.msk [vmem:[#allocation2] sm:$0x1] %vm38_vm1, %v37_v6  ;;  %v42_v7 = vld [vmem:[%s41_s25] sm:$0x1]  ;;  %s45_s29 = scalar_lea.vmem %s3125_s1, %s1923_s15  ;;  %s1929_s30 = sld [smem:[#allocation6 + $0x1]] }
  0x18   :  { %2126 = vmatmul.mubr.bf16.vlgmr.msra.gmra.mxu1 %v2430_v5  ;;  %43 = vst.msk [vmem:[#allocation2 + $0x1] sm:$0x1] %vm38_vm1, %v42_v7  ;;  %v46_v8 = vld [vmem:[%s45_s29] sm:$0x1]  ;;  %s49_s9 = scalar_lea.vmem %s3125_s1, %s1924_s16  ;;  %s1930_s10 = sld [smem:[#allocation6 + $0x81]] }
  0x19   :  { %2130 = vmatpush3.bf16.msra.mxu1 %v2479_v0  ;;  %2133 = vmatprep.mubr.msk.bf16.mxu1 %vm2429_vm0, %v2428_v1  ;;  %47 = vst.msk [vmem:[#allocation2 + $0x2] sm:$0x1] %vm38_vm1, %v46_v8  ;;  %v50_v9 = vld [vmem:[%s49_s9] sm:$0x1]  ;;  %s53_s13 = scalar_lea.vmem %s3125_s1, %s1925_s17  ;;  %s1931_s14 = sld [smem:[#allocation6 + $0x101]] }
  0x1a   :  { %2131 = vmatprep.subr.bf16.mxu1 %v2428_v1  ;;  %51 = vst.msk [vmem:[#allocation2 + $0x3] sm:$0x1] %vm38_vm1, %v50_v9  ;;  %v54_v10 = vld [vmem:[%s53_s13] sm:$0x1]  ;;  %s57_s20 = scalar_lea.vmem %s3125_s1, %s2500_s18  ;;  %s1932_s16 = sld [smem:[#allocation6 + $0x181]] }
  0x1b   :  { %55 = vst.msk [vmem:[#allocation2 + $0x4] sm:$0x1] %vm38_vm1, %v54_v10  ;;  %v58_v11 = vld [vmem:[%s57_s20] sm:$0x1]  ;;  %s61_s17 = scalar_lea.vmem %s3125_s1, %s2506_s22  ;;  %s1933_s24 = sld [smem:[#allocation6 + $0x201]] }
  0x1c   :  { %59 = vst.msk [vmem:[#allocation2 + $0x5] sm:$0x1] %vm38_vm1, %v58_v11  ;;  %v62_v12 = vld [vmem:[%s61_s17] sm:$0x1]  ;;  %s65_s28 = scalar_lea.vmem %s3125_s1, %s2514_s26  ;;  %s1934_s29 = sld [smem:[#allocation6 + $0x281]] }
  0x1d   :  { %2132 = vmatpush3.bf16.msra.mxu1 %v2489_v3  ;;  %63 = vst.msk [vmem:[#allocation2 + $0x6] sm:$0x1] %vm38_vm1, %v62_v12  ;;  %v66_v13 = vld [vmem:[%s65_s28] sm:$0x1]  ;;  %s69_s8 = scalar_lea.vmem %s3125_s1, %s1929_s30  ;;  %s1935_s9 = sld [smem:[#allocation6 + $0x301]] }
  0x1e   :  { %2145 = vmatprep.subr.bf16.mxu1 %v2428_v1  ;;  %67 = vst.msk [vmem:[#allocation2 + $0x7] sm:$0x1] %vm38_vm1, %v66_v13  ;;  %v70_v14 = vld [vmem:[%s69_s8] sm:$0x1]  ;;  %s73_s12 = scalar_lea.vmem %s3125_s1, %s1930_s10  ;;  %s1936_s13 = sld [smem:[#allocation6 + $0x381]] }
  0x1f   :  { %71 = vst.msk [vmem:[#allocation2 + $0x8] sm:$0x1] %vm38_vm1, %v70_v14  ;;  %v74_v15 = vld [vmem:[%s73_s12] sm:$0x1]  ;;  %s77_s19 = scalar_lea.vmem %s3125_s1, %s1931_s14  ;;  %s1937_s20 = sld [smem:[#allocation6 + $0x2]] }
  0x20   :  { %75 = vst.msk [vmem:[#allocation2 + $0x9] sm:$0x1] %vm38_vm1, %v74_v15  ;;  %v78_v16 = vld [vmem:[%s77_s19] sm:$0x1]  ;;  %s81_s23 = scalar_lea.vmem %s3125_s1, %s1932_s16  ;;  %s1938_s17 = sld [smem:[#allocation6 + $0x82]] }
  0x21   :  { %79 = vst.msk [vmem:[#allocation2 + $0xa] sm:$0x1] %vm38_vm1, %v78_v16  ;;  %v82_v17 = vld [vmem:[%s81_s23] sm:$0x1]  ;;  %s85_s27 = scalar_lea.vmem %s3125_s1, %s1933_s24  ;;  %s1939_s28 = sld [smem:[#allocation6 + $0x102]] }
  0x22   :  { %83 = vst.msk [vmem:[#allocation2 + $0xb] sm:$0x1] %vm38_vm1, %v82_v17  ;;  %v86_v18 = vld [vmem:[%s85_s27] sm:$0x1]  ;;  %s89_s0 = scalar_lea.vmem %s3125_s1, %s1934_s29  ;;  %s1940_s8 = sld [smem:[#allocation6 + $0x182]] }
  0x23   :  { %87 = vst.msk [vmem:[#allocation2 + $0xc] sm:$0x1] %vm38_vm1, %v86_v18  ;;  %v90_v19 = vld [vmem:[%s89_s0] sm:$0x1]  ;;  %s93_s11 = scalar_lea.vmem %s3125_s1, %s1935_s9  ;;  %s1941_s12 = sld [smem:[#allocation6 + $0x202]] }
  0x24   :  { %91 = vst.msk [vmem:[#allocation2 + $0xd] sm:$0x1] %vm38_vm1, %v90_v19  ;;  %v94_v20 = vld [vmem:[%s93_s11] sm:$0x1]  ;;  %s97_s15 = scalar_lea.vmem %s3125_s1, %s1936_s13  ;;  %s1942_s19 = sld [smem:[#allocation6 + $0x282]] }
  0x25   :  { %95 = vst.msk [vmem:[#allocation2 + $0xe] sm:$0x1] %vm38_vm1, %v94_v20  ;;  %v98_v21 = vld [vmem:[%s97_s15] sm:$0x1]  ;;  %s101_s21 = scalar_lea.vmem %s3125_s1, %s1937_s20  ;;  %s1943_s23 = sld [smem:[#allocation6 + $0x302]] }
  0x26   :  { %99 = vst.msk [vmem:[#allocation2 + $0xf] sm:$0x1] %vm38_vm1, %v98_v21  ;;  %v102_v22 = vld [vmem:[%s101_s21] sm:$0x1]  ;;  %s105_s25 = scalar_lea.vmem %s3125_s1, %s1938_s17  ;;  %s2586_s27 = sld [smem:[#allocation6 + $0x382]] }
  0x27   :  { %103 = vst.msk [vmem:[#allocation2 + $0x10] sm:$0x1] %vm38_vm1, %v102_v22  ;;  %v106_v23 = vld [vmem:[%s105_s25] sm:$0x1]  ;;  %s109_s18 = scalar_lea.vmem %s3125_s1, %s1939_s28  ;;  %s2592_s0 = sld [smem:[#allocation6 + $0x3]] }
  0x28   :  { %107 = vst.msk [vmem:[#allocation2 + $0x11] sm:$0x1] %vm38_vm1, %v106_v23  ;;  %v110_v24 = vld [vmem:[%s109_s18] sm:$0x1]  ;;  %s113_s22 = scalar_lea.vmem %s3125_s1, %s1940_s8  ;;  %s2598_s11 = sld [smem:[#allocation6 + $0x83]] }
  0x29   :  { %111 = vst.msk [vmem:[#allocation2 + $0x12] sm:$0x1] %vm38_vm1, %v110_v24  ;;  %v114_v25 = vld [vmem:[%s113_s22] sm:$0x1]  ;;  %s117_s26 = scalar_lea.vmem %s3125_s1, %s1941_s12  ;;  %s2604_s28 = sld [smem:[#allocation6 + $0x103]] }
  0x2a   :  { %115 = vst.msk [vmem:[#allocation2 + $0x13] sm:$0x1] %vm38_vm1, %v114_v25  ;;  %v118_v26 = vld [vmem:[%s117_s26] sm:$0x1]  ;;  %s121_s8 = scalar_lea.vmem %s3125_s1, %s1942_s19  ;;  %s2610_s30 = sld [smem:[#allocation6 + $0x183]] }
  0x2b   :  { %v292_v27 = vld [vmem:[#allocation2] sm:$0xff]  ;;  %119 = vst.msk [vmem:[#allocation2 + $0x14] sm:$0x1] %vm38_vm1, %v118_v26  ;;  %s125_s12 = scalar_lea.vmem %s3125_s1, %s1943_s23  ;;  %s1949_s10 = sld [smem:[#allocation6 + $0x203]] }
  0x2c   :  { %v122_v28 = vld [vmem:[%s121_s8] sm:$0x1]  ;;  %s129_s19 = scalar_lea.vmem %s3125_s1, %s2586_s27  ;;  %s1950_s14 = sld [smem:[#allocation6 + $0x283]] }
  0x2d   :  { %123 = vst.msk [vmem:[#allocation2 + $0x15] sm:$0x1] %vm38_vm1, %v122_v28  ;;  %v126_v29 = vld [vmem:[%s125_s12] sm:$0x1]  ;;  %v293_v30 = vld [vmem:[#allocation2 + $0x8] sm:$0xff]  ;;  %s133_s23 = scalar_lea.vmem %s3125_s1, %s2592_s0  ;;  %s1951_s16 = sld [smem:[#allocation6 + $0x303]] }
  0x2e   :  { %127 = vst.msk [vmem:[#allocation2 + $0x16] sm:$0x1] %vm38_vm1, %v126_v29  ;;  %v130_v31 = vld [vmem:[%s129_s19] sm:$0x1]  ;;  %v300_v32 = vpack.c.bf16 %v293_v30, %v292_v27  ;;  %s137_s27 = scalar_lea.vmem %s3125_s1, %s2598_s11  ;;  %s1952_s24 = sld [smem:[#allocation6 + $0x383]] }
  0x2f   :  { %131 = vst.msk [vmem:[#allocation2 + $0x17] sm:$0x1] %vm38_vm1, %v130_v31  ;;  %v134_v33 = vld [vmem:[%s133_s23] sm:$0x1]  ;;  %s141_s29 = scalar_lea.vmem %s3125_s1, %s2604_s28  ;;  %s2431_s22 = smov 32  }
  0x30   :  { %135 = vst.msk [vmem:[#allocation2 + $0x18] sm:$0x1] %vm38_vm1, %v134_v33  ;;  %v138_v34 = vld [vmem:[%s137_s27] sm:$0x1]  ;;  %2113 = vmatprep.mubr.msk.bf16.mxu0 %vm327_vm2, %v300_v32  ;;  %s145_s21 = scalar_lea.vmem %s3125_s1, %s2610_s30  ;;  %s2432_s17 = smov 64  }
  0x31   :  { %139 = vst.msk [vmem:[#allocation2 + $0x19] sm:$0x1] %vm38_vm1, %v138_v34  ;;  %v142_v35 = vld [vmem:[%s141_s29] sm:$0x1]  ;;  %s149_s12 = scalar_lea.vmem %s3125_s1, %s1949_s10  ;;  %s1953_s27 = sld [smem:[#allocation6 + $0x4]] }
  0x32   :  { %143 = vst.msk [vmem:[#allocation2 + $0x1a] sm:$0x1] %vm38_vm1, %v142_v35  ;;  %v146_v36 = vld [vmem:[%s145_s21] sm:$0x1]  ;;  %s153_s13 = scalar_lea.vmem %s3125_s1, %s1950_s14  ;;  %s1955_s26 = sld [smem:[#allocation6 + $0x104]] }
  0x33   :  { %147 = vst.msk [vmem:[#allocation2 + $0x1b] sm:$0x1] %vm38_vm1, %v146_v36  ;;  %v150_v37 = vld [vmem:[%s149_s12] sm:$0x1]  ;;  %s157_s30 = scalar_lea.vmem %s3125_s1, %s1951_s16  ;;  %s1956_s15 = sld [smem:[#allocation6 + $0x184]] }
  0x34   :  { %151 = vst.msk [vmem:[#allocation2 + $0x1c] sm:$0x1] %vm38_vm1, %v150_v37  ;;  %v154_v38 = vld [vmem:[%s153_s13] sm:$0x1]  ;;  %s161_s10 = scalar_lea.vmem %s3125_s1, %s1952_s24  ;;  %s1954_s24 = sld [smem:[#allocation6 + $0x84]] }
  0x35   :  { %155 = vst.msk [vmem:[#allocation2 + $0x1d] sm:$0x1] %vm38_vm1, %v154_v38  ;;  %v158_v39 = vld [vmem:[%s157_s30] sm:$0x1]  ;;  %s1957_s29 = sld [smem:[#allocation6 + $0x204]] }
  0x36   :  { %159 = vst.msk [vmem:[#allocation2 + $0x1e] sm:$0x1] %vm38_vm1, %v158_v39  ;;  %v162_v40 = vld [vmem:[%s161_s10] sm:$0x1]  ;;  %v294_v41 = vld [vmem:[#allocation2 + $0x10] sm:$0xff]  ;;  %s1958_s0 = sld [smem:[#allocation6 + $0x284]] }
  0x37   :  { %163 = vst.msk [vmem:[#allocation2 + $0x1f] sm:$0x1] %vm38_vm1, %v162_v40  ;;  %s165_s11 = scalar_lea.vmem %s3125_s1, %s1953_s27  ;;  %s1959_s9 = sld [smem:[#allocation6 + $0x304]] }
  0x38   :  { %v166_v26 = vld [vmem:[%s165_s11] sm:$0x1]  ;;  %s1960_s13 = sld [smem:[#allocation6 + $0x384]]  ;;  %s173_s30 = scalar_lea.vmem %s3125_s1, %s1955_s26 }
  0x39   :  { %167 = vst.msk [vmem:[#allocation2 + $0x20] sm:$0x1] %vm38_vm1, %v166_v26  ;;  %s1961_s20 = sld [smem:[#allocation6 + $0x5]]  ;;  %v174_v29 = vld [vmem:[%s173_s30] sm:$0x1]  ;;  %s177_s14 = scalar_lea.vmem %s3125_s1, %s1956_s15 }
  0x3a   :  { %s169_s25 = scalar_lea.vmem %s3125_s1, %s1954_s24  ;;  %s1962_s16 = sld [smem:[#allocation6 + $0x85]]  ;;  %175 = vst.msk [vmem:[#allocation2 + $0x22] sm:$0x1] %vm38_vm1, %v174_v29  ;;  %v178_v30 = vld [vmem:[%s177_s14] sm:$0x1] }
  0x3b   :  { %v170_v28 = vld [vmem:[%s169_s25] sm:$0x1]  ;;  %s181_s8 = scalar_lea.vmem %s3125_s1, %s1957_s29  ;;  %s1963_s21 = sld [smem:[#allocation6 + $0x105]]  ;;  %179 = vst.msk [vmem:[#allocation2 + $0x23] sm:$0x1] %vm38_vm1, %v178_v30 }
  0x3c   :  { %171 = vst.msk [vmem:[#allocation2 + $0x21] sm:$0x1] %vm38_vm1, %v170_v28  ;;  %v182_v31 = vld [vmem:[%s181_s8] sm:$0x1]  ;;  %s185_s12 = scalar_lea.vmem %s3125_s1, %s1958_s0  ;;  %s1964_s28 = sld [smem:[#allocation6 + $0x185]] }
  0x3d   :  { %183 = vst.msk [vmem:[#allocation2 + $0x24] sm:$0x1] %vm38_vm1, %v182_v31  ;;  %v186_v32 = vld [vmem:[%s185_s12] sm:$0x1]  ;;  %s189_s19 = scalar_lea.vmem %s3125_s1, %s1959_s9  ;;  %s1965_s18 = sld [smem:[#allocation6 + $0x205]] }
  0x3e   :  { %v295_v42 = vld [vmem:[#allocation2 + $0x18] sm:$0xff]  ;;  %187 = vst.msk [vmem:[#allocation2 + $0x25] sm:$0x1] %vm38_vm1, %v186_v32  ;;  %v190_v33 = vld [vmem:[%s189_s19] sm:$0x1]  ;;  %s193_s23 = scalar_lea.vmem %s3125_s1, %s1960_s13  ;;  %s1966_s10 = sld [smem:[#allocation6 + $0x285]] }
  0x3f   :  { %v301_v43 = vpack.c.bf16 %v295_v42, %v294_v41  ;;  %191 = vst.msk [vmem:[#allocation2 + $0x26] sm:$0x1] %vm38_vm1, %v190_v33  ;;  %v194_v34 = vld [vmem:[%s193_s23] sm:$0x1]  ;;  %s197_s27 = scalar_lea.vmem %s3125_s1, %s1961_s20  ;;  %s1967_s24 = sld [smem:[#allocation6 + $0x305]] }
  0x40   :  { %195 = vst.msk [vmem:[#allocation2 + $0x27] sm:$0x1] %vm38_vm1, %v194_v34  ;;  %v198_v35 = vld [vmem:[%s197_s27] sm:$0x1]  ;;  %s201_s26 = scalar_lea.vmem %s3125_s1, %s1962_s16  ;;  %s1968_s11 = sld [smem:[#allocation6 + $0x385]] }
  0x41   :  { %2114 = vmatmul.mubr.msk.bf16.vlgmr.msra.gmra.mxu0 %vm327_vm2, %v301_v43  ;;  %199 = vst.msk [vmem:[#allocation2 + $0x28] sm:$0x1] %vm38_vm1, %v198_v35  ;;  %v202_v36 = vld [vmem:[%s201_s26] sm:$0x1]  ;;  %s205_s15 = scalar_lea.vmem %s3125_s1, %s1963_s21  ;;  %s1969_s25 = sld [smem:[#allocation6 + $0x6]] }
  0x42   :  { %2138 = vmatpush3.bf16.msra.mxu0 %v2479_v0  ;;  %203 = vst.msk [vmem:[#allocation2 + $0x29] sm:$0x1] %vm38_vm1, %v202_v36  ;;  %v206_v37 = vld [vmem:[%s205_s15] sm:$0x1]  ;;  %s209_s29 = scalar_lea.vmem %s3125_s1, %s1964_s28  ;;  %s1970_s30 = sld [smem:[#allocation6 + $0x86]] }
  0x43   :  { %2139 = vmatprep.subr.bf16.mxu0 %v2428_v1  ;;  %207 = vst.msk [vmem:[#allocation2 + $0x2a] sm:$0x1] %vm38_vm1, %v206_v37  ;;  %v210_v38 = vld [vmem:[%s209_s29] sm:$0x1]  ;;  %s213_s0 = scalar_lea.vmem %s3125_s1, %s1965_s18  ;;  %s1971_s14 = sld [smem:[#allocation6 + $0x106]] }
  0x44   :  { %211 = vst.msk [vmem:[#allocation2 + $0x2b] sm:$0x1] %vm38_vm1, %v210_v38  ;;  %v214_v39 = vld [vmem:[%s213_s0] sm:$0x1]  ;;  %s217_s9 = scalar_lea.vmem %s3125_s1, %s1966_s10  ;;  %s1972_s8 = sld [smem:[#allocation6 + $0x186]] }
  0x45   :  { %215 = vst.msk [vmem:[#allocation2 + $0x2c] sm:$0x1] %vm38_vm1, %v214_v39  ;;  %v218_v40 = vld [vmem:[%s217_s9] sm:$0x1]  ;;  %s221_s13 = scalar_lea.vmem %s3125_s1, %s1967_s24  ;;  %s1973_s12 = sld [smem:[#allocation6 + $0x206]] }
  0x46   :  { %2140 = vmatpush3.bf16.msra.mxu0 %v2489_v3  ;;  %219 = vst.msk [vmem:[#allocation2 + $0x2d] sm:$0x1] %vm38_vm1, %v218_v40  ;;  %v222_v41 = vld [vmem:[%s221_s13] sm:$0x1]  ;;  %s225_s20 = scalar_lea.vmem %s3125_s1, %s1968_s11  ;;  %s1974_s19 = sld [smem:[#allocation6 + $0x286]] }
  0x47   :  { %2153 = vmatprep.subr.bf16.mxu0 %v2428_v1  ;;  %223 = vst.msk [vmem:[#allocation2 + $0x2e] sm:$0x1] %vm38_vm1, %v222_v41  ;;  %v226_v42 = vld [vmem:[%s225_s20] sm:$0x1]  ;;  %s229_s16 = scalar_lea.vmem %s3125_s1, %s1969_s25  ;;  %s1975_s23 = sld [smem:[#allocation6 + $0x306]] }
  0x48   :  { %227 = vst.msk [vmem:[#allocation2 + $0x2f] sm:$0x1] %vm38_vm1, %v226_v42  ;;  %v230_v43 = vld [vmem:[%s229_s16] sm:$0x1]  ;;  %s233_s21 = scalar_lea.vmem %s3125_s1, %s1970_s30  ;;  %s1976_s27 = sld [smem:[#allocation6 + $0x386]] }
  0x49   :  { %231 = vst.msk [vmem:[#allocation2 + $0x30] sm:$0x1] %vm38_vm1, %v230_v43  ;;  %s237_s28 = scalar_lea.vmem %s3125_s1, %s1971_s14  ;;  %s2775_s26 = sld [smem:[#allocation6 + $0x7]] }
  0x4a   :  { %s241_s18 = scalar_lea.vmem %s3125_s1, %s1972_s8  ;;  %s2781_s15 = sld [smem:[#allocation6 + $0x87]] }
  0x4b   :  { %s245_s10 = scalar_lea.vmem %s3125_s1, %s1973_s12  ;;  %s2787_s29 = sld [smem:[#allocation6 + $0x107]] }
  0x4c   :  { %s249_s24 = scalar_lea.vmem %s3125_s1, %s1974_s19  ;;  %s1980_s8 = sld [smem:[#allocation6 + $0x187]] }
  0x4d   :  { %s253_s12 = scalar_lea.vmem %s3125_s1, %s1975_s23  ;;  %s1981_s11 = sld [smem:[#allocation6 + $0x207]] }
  0x4e   :  { %s257_s25 = scalar_lea.vmem %s3125_s1, %s1976_s27  ;;  %s1982_s19 = sld [smem:[#allocation6 + $0x287]] }
  0x4f   :  { %s261_s30 = scalar_lea.vmem %s3125_s1, %s2775_s26  ;;  %s1983_s20 = sld [smem:[#allocation6 + $0x307]] }
  0x50   :  { %s265_s14 = scalar_lea.vmem %s3125_s1, %s2781_s15  ;;  %s1984_s16 = sld [smem:[#allocation6 + $0x387]] }
  0x51   :  { %s269_s0 = scalar_lea.vmem %s3125_s1, %s2787_s29 }
  0x54   :  { %s281_s13 = scalar_lea.vmem %s3125_s1, %s1982_s19 }
  0xd8   :  { %v467_v44 = vpop.f32.mrf.mxu1 }
  0xda   :  { %v2127_v45 = vpop.f32.mrf.mxu1 }
  0xdb   :  { %v238_v45 = vld [vmem:[%s237_s28] sm:$0x1]  ;;  %s277_s28 = scalar_lea.vmem %s3125_s1, %s1981_s11  ;;  %s289_s11 = scalar_lea.vmem %s3125_s1, %s1984_s16 }
  0xdc   :  { %v470_v46 = vpop.f32.mrf.mxu1  ;;  %239 = vst.msk [vmem:[#allocation2 + $0x32] sm:$0x1] %vm38_vm1, %v238_v45 }
  0xdd   :  { %v242_v46 = vld [vmem:[%s241_s18] sm:$0x1] }
  0xde   :  { %v2128_v47 = vpop.f32.mrf.mxu1  ;;  %243 = vst.msk [vmem:[#allocation2 + $0x33] sm:$0x1] %vm38_vm1, %v242_v46 }
  0xdf   :  { %v246_v47 = vld [vmem:[%s245_s10] sm:$0x1] }
  0xe0   :  { %247 = vst.msk [vmem:[#allocation2 + $0x34] sm:$0x1] %vm38_vm1, %v246_v47 }
 0x101   :  { %v2665_v48 = vpop.f32.mrf.mxu0 }
 0x103   :  { %v374_v50 = vpop.f32.mrf.mxu0 }
 0x104   :  { %v375_v51 = vadd.f32 %v2670_v49, %v374_v50  ;;  %v296_v50 = vld [vmem:[#allocation2 + $0x20] sm:$0xff] }
 0x105   :  { %v2688_v8 = vpop.f32.mrf.mxu0 }
 0x106   :  { %v473_v52 = vadd.f32 %v467_v44, %v375_v51  ;;  %v234_v44 = vld [vmem:[%s233_s21] sm:$0x1] }
 0x107   :  { %v377_v9 = vpop.f32.mrf.mxu0  ;;  %235 = vst.msk [vmem:[#allocation2 + $0x31] sm:$0x1] %vm38_vm1, %v234_v44  ;;  %v250_v51 = vld [vmem:[%s249_s24] sm:$0x1] }
 0x108   :  { %2285 = vtanh.f32 %v473_v52  ;;  %v1994_v54 = vmul.f32 -1.442695, %v473_v52  ;;  %v378_v10 = vadd.f32 %v2670_v49, %v377_v9  ;;  %251 = vst.msk [vmem:[#allocation2 + $0x35] sm:$0x1] %vm38_vm1, %v250_v51  ;;  %v254_v52 = vld [vmem:[%s253_s12] sm:$0x1]  ;;  %s273_s12 = scalar_lea.vmem %s3125_s1, %s1980_s8  ;;  %s285_s8 = scalar_lea.vmem %s3125_s1, %s1983_s20 }
 0x109   :  { %255 = vst.msk [vmem:[#allocation2 + $0x36] sm:$0x1] %vm38_vm1, %v254_v52 }
 0x10a   :  { %2287 = vpow2.f32 %v1994_v54  ;;  %v258_v54 = vld [vmem:[%s257_s25] sm:$0x1] }
 0x10b   :  { %259 = vst.msk [vmem:[#allocation2 + $0x37] sm:$0x1] %vm38_vm1, %v258_v54 }
 0x115   :  { %v2286_v53 = vpop.eup %2285 }
 0x116   :  { %483 = vrot.lane.b32.xlu0 %v2286_v53, %s2431_s22  ;;  %v297_v53 = vld [vmem:[#allocation2 + $0x28] sm:$0xff] }
 0x117   :  { %v2288_v55 = vpop.eup %2287 }
 0x118   :  { %v477_v56 = vadd.f32 1.0, %v2288_v55  ;;  %v302_v55 = vpack.c.bf16 %v297_v53, %v296_v50 }
 0x11a   :  { %2289 = vrcp.f32 %v477_v56  ;;  %v262_v56 = vld [vmem:[%s261_s30] sm:$0x1]  ;;  %2117 = vmatprep.mubr.msk.bf16.mxu0 %vm327_vm2, %v302_v55 }
 0x11b   :  { %263 = vst.msk [vmem:[#allocation2 + $0x38] sm:$0x1] %vm38_vm1, %v262_v56 }
 0x127   :  { %v2290_v57 = vpop.eup %2289 }
 0x128   :  { %v481_v60 = vmul.f32 0.0, %v2290_v57 }
 0x188   :  { %v484_v58 = vpop.permute.xlu0 %483 }
 0x189   :  { %v486_v59 = vmul.f32 %v2290_v57, %v484_v58  ;;  %v270_v58 = vld [vmem:[%s269_s0] sm:$0x1] }
 0x18a   :  { %271 = vst.msk [vmem:[#allocation2 + $0x3a] sm:$0x1] %vm38_vm1, %v270_v58 }
 0x18b   :  { %488 = vrot.lane.b32.xlu0 %v486_v59, %s2431_s22  ;;  %v274_v59 = vld [vmem:[%s273_s12] sm:$0x1] }
 0x18c   :  { %275 = vst.msk [vmem:[#allocation2 + $0x3b] sm:$0x1] %vm38_vm1, %v274_v59 }
 0x1fd   :  { %v489_v61 = vpop.permute.xlu0 %488 }
 0x1fe   :  { %v491_v62 = vadd.f32 %v489_v61, %v481_v60  ;;  %v278_v60 = vld [vmem:[%s277_s28] sm:$0x1] }
 0x1ff   :  { %279 = vst.msk [vmem:[#allocation2 + $0x3c] sm:$0x1] %vm38_vm1, %v278_v60  ;;  %v282_v61 = vld [vmem:[%s281_s13] sm:$0x1] }
 0x200   :  { %2291 = vtanh.f32 %v491_v62  ;;  %283 = vst.msk [vmem:[#allocation2 + $0x3d] sm:$0x1] %vm38_vm1, %v282_v61 }
 0x20d   :  { %v2292_v63 = vpop.eup %2291 }
 0x20e   :  { %494 = vrot.lane.b32.xlu1 %v2292_v63, %s2431_s22  ;;  %v290_v63 = vld [vmem:[%s289_s11] sm:$0x1] }
 0x20f   :  { %291 = vst.msk [vmem:[#allocation2 + $0x3f] sm:$0x1] %vm38_vm1, %v290_v63 }
 0x280   :  { %v495_v2 = vpop.permute.xlu1 %494 }
 0x281   :  { %v2676_v4 = vmul.f32 %v2290_v57, %v495_v2  ;;  %v266_v57 = vld [vmem:[%s265_s14] sm:$0x1]  ;;  %v298_v2 = vld [vmem:[#allocation2 + $0x30] sm:$0xff] }
 0x282   :  { %267 = vst.msk [vmem:[#allocation2 + $0x39] sm:$0x1] %vm38_vm1, %v266_v57 }
 0x283   :  { %v505_v6 = vpack.c.bf16 %v2676_v4, %v2676_v4 }
 0x285   :  { %507 = vrot.lane.b32.xlu1 %v505_v6, %s2432_s17 }
 0x2f7   :  { %v508_v7 = vpop.permute.xlu1 %507 }
 0x2f8   :  { %2134 = vmatmul.mubr.msk.bf16.vlgmr.msra.gmra.mxu1 %vm327_vm2, %v508_v7 }
 0x2f9   :  { %2146 = vmatpush3.bf16.msra.mxu1 %v2479_v0  ;;  %2149 = vmatprep.mubr.msk.bf16.mxu1 %vm2429_vm0, %v2428_v1 }
 0x2fa   :  { %2147 = vmatprep.subr.bf16.mxu1 %v2428_v1 }
 0x2fd   :  { %2148 = vmatpush3.bf16.msra.mxu1 %v2489_v3 }
 0x2fe   :  { %2161 = vmatprep.subr.bf16.mxu1 %v2428_v1 }
 0x3b8   :  { %v546_v11 = vpop.f32.mrf.mxu1 }
 0x3b9   :  { %v552_v12 = vadd.f32 %v546_v11, %v378_v10 }
 0x3ba   :  { %v2135_v13 = vpop.f32.mrf.mxu1 }
 0x3bb   :  { %2293 = vtanh.f32 %v552_v12  ;;  %v1996_v17 = vmul.f32 -1.442695, %v552_v12 }
 0x3bc   :  { %v549_v14 = vpop.f32.mrf.mxu1 }
 0x3bd   :  { %2295 = vpow2.f32 %v1996_v17  ;;  %v383_v17 = vadd.f32 %v2665_v48, %v2670_v49 }
 0x3be   :  { %v2136_v15 = vpop.f32.mrf.mxu1 }
 0x3c8   :  { %v2294_v16 = vpop.eup %2293 }
 0x3c9   :  { %562 = vrot.lane.b32.xlu0 %v2294_v16, %s2431_s22 }
 0x3ca   :  { %v2296_v18 = vpop.eup %2295 }
 0x3cb   :  { %v556_v19 = vadd.f32 1.0, %v2296_v18 }
 0x3cd   :  { %2297 = vrcp.f32 %v556_v19 }
 0x3da   :  { %v2692_v20 = vpop.eup %2297 }
 0x3db   :  { %v560_v23 = vmul.f32 %v2692_v20, %v491_v62  ;;  %v286_v62 = vld [vmem:[%s285_s8] sm:$0x1] }
 0x3dc   :  { %287 = vst.msk [vmem:[#allocation2 + $0x3e] sm:$0x1] %vm38_vm1, %v286_v62 }
 0x3e3   :  { %v299_v6 = vld [vmem:[#allocation2 + $0x38] sm:$0xff] }
 0x3e4   :  { %v303_v7 = vpack.c.bf16 %v299_v6, %v298_v2 }
 0x3e6   :  { %2118 = vmatmul.mubr.msk.bf16.gmra.mxu0 %vm327_vm2, %v303_v7 }
 0x3e7   :  { %2141 = vmatprep.mubr.msk.bf16.mxu0 %vm2429_vm0, %v2428_v1 }
 0x43b   :  { %v563_v21 = vpop.permute.xlu0 %562 }
 0x43c   :  { %v565_v22 = vmul.f32 %v2692_v20, %v563_v21 }
 0x43e   :  { %567 = vrot.lane.b32.xlu1 %v565_v22, %s2431_s22 }
 0x4a6   :  { %v2855_v13 = vpop.f32.mrf.mxu0 }
 0x4a8   :  { %v2857_v14 = vpop.f32.mrf.mxu0 }
 0x4a9   :  { %v391_v59 = vadd.f32 %v2670_v49, %v2857_v14 }
 0x4aa   :  { %v2859_v15 = vpop.f32.mrf.mxu0 }
 0x4ac   :  { %v2861_v16 = vpop.f32.mrf.mxu0 }
 0x4b0   :  { %v568_v24 = vpop.permute.xlu1 %567 }
 0x4b1   :  { %v2697_v25 = vadd.f32 %v568_v24, %v560_v23 }
 0x4b3   :  { %2299 = vtanh.f32 %v2697_v25 }
 0x4c0   :  { %v2300_v27 = vpop.eup %2299 }
 0x4c1   :  { %573 = vrot.lane.b32.xlu0 %v2300_v27, %s2431_s22 }
 0x533   :  { %v574_v9 = vpop.permute.xlu0 %573 }
 0x534   :  { %v2843_v10 = vmul.f32 %v2692_v20, %v574_v9 }
 0x536   :  { %v585_v11 = vpack.c.bf16 %v2843_v10, %v2843_v10 }
 0x538   :  { %587 = vrot.lane.b32.xlu1 %v585_v11, %s2432_s17 }
 0x5aa   :  { %v588_v12 = vpop.permute.xlu1 %587 }
 0x5ab   :  { %2142 = vmatmul.mubr.msk.bf16.vlgmr.msra.gmra.mxu0 %vm327_vm2, %v588_v12 }
 0x5ac   :  { %2154 = vmatpush3.bf16.msra.mxu0 %v2479_v0  ;;  %2157 = vmatprep.mubr.msk.bf16.mxu0 %vm2429_vm0, %v2428_v1 }
 0x5ad   :  { %2155 = vmatprep.subr.bf16.mxu0 %v2428_v1 }
 0x5b0   :  { %2156 = vmatpush3.bf16.msra.mxu0 %v2489_v3 }
 0x5b1   :  { %2169 = vmatprep.subr.bf16.mxu0 %v2428_v1 }
 0x66b   :  { %v626_v18 = vpop.f32.mrf.mxu0 }
 0x66c   :  { %v632_v19 = vadd.f32 %v626_v18, %v383_v17 }
 0x66d   :  { %v2143_v20 = vpop.f32.mrf.mxu0 }
 0x66e   :  { %2301 = vtanh.f32 %v632_v19  ;;  %v1998_v24 = vmul.f32 -1.442695, %v632_v19 }
 0x66f   :  { %v629_v21 = vpop.f32.mrf.mxu0 }
 0x670   :  { %2303 = vpow2.f32 %v1998_v24 }
 0x671   :  { %v2144_v22 = vpop.f32.mrf.mxu0 }
 0x67b   :  { %v2302_v23 = vpop.eup %2301 }
 0x67c   :  { %642 = vrot.lane.b32.xlu0 %v2302_v23, %s2431_s22 }
 0x67d   :  { %v2304_v26 = vpop.eup %2303 }
 0x67e   :  { %v636_v27 = vadd.f32 1.0, %v2304_v26 }
 0x680   :  { %2305 = vrcp.f32 %v636_v27  ;;  %v394_v27 = vadd.f32 %v2670_v49, %v2861_v16 }
 0x68d   :  { %v2306_v28 = vpop.eup %2305 }
 0x68e   :  { %v640_v48 = vmul.f32 %v2306_v28, %v2697_v25  ;;  %v386_v25 = vadd.f32 %v2688_v8, %v2670_v49 }
 0x6ee   :  { %v643_v29 = vpop.permute.xlu0 %642 }
 0x6ef   :  { %v645_v30 = vmul.f32 %v2306_v28, %v643_v29 }
 0x6f1   :  { %647 = vrot.lane.b32.xlu1 %v645_v30, %s2431_s22 }
 0x763   :  { %v648_v31 = vpop.permute.xlu1 %647 }
 0x764   :  { %v650_v32 = vadd.f32 %v648_v31, %v640_v48 }
 0x766   :  { %2307 = vtanh.f32 %v650_v32 }
 0x773   :  { %v2308_v33 = vpop.eup %2307 }
 0x774   :  { %653 = vrot.lane.b32.xlu0 %v2308_v33, %s2431_s22 }
 0x7e6   :  { %v654_v34 = vpop.permute.xlu0 %653 }
 0x7e7   :  { %v2869_v35 = vmul.f32 %v2306_v28, %v654_v34 }
 0x7e9   :  { %v665_v36 = vpack.c.bf16 %v2869_v35, %v2869_v35 }
 0x7eb   :  { %667 = vrot.lane.b32.xlu1 %v665_v36, %s2432_s17 }
 0x85d   :  { %v668_v37 = vpop.permute.xlu1 %667 }
 0x85e   :  { %2150 = vmatmul.mubr.msk.bf16.vlgmr.msra.gmra.mxu1 %vm327_vm2, %v668_v37 }
 0x85f   :  { %2162 = vmatpush3.bf16.msra.mxu1 %v2479_v0  ;;  %2165 = vmatprep.mubr.msk.bf16.mxu1 %vm2429_vm0, %v2428_v1 }
 0x860   :  { %2163 = vmatprep.subr.bf16.mxu1 %v2428_v1 }
 0x863   :  { %2164 = vmatpush3.bf16.msra.mxu1 %v2489_v3 }
 0x864   :  { %2177 = vmatprep.subr.bf16.mxu1 %v2428_v1 }
 0x91e   :  { %v706_v38 = vpop.f32.mrf.mxu1 }
 0x91f   :  { %v712_v39 = vadd.f32 %v706_v38, %v386_v25 }
 0x920   :  { %v2151_v40 = vpop.f32.mrf.mxu1 }
 0x921   :  { %2309 = vtanh.f32 %v712_v39  ;;  %v2000_v44 = vmul.f32 -1.442695, %v712_v39 }
 0x922   :  { %v709_v41 = vpop.f32.mrf.mxu1 }
 0x923   :  { %2311 = vpow2.f32 %v2000_v44  ;;  %v399_v44 = vadd.f32 %v2855_v13, %v2670_v49 }
 0x924   :  { %v2152_v42 = vpop.f32.mrf.mxu1 }
 0x92e   :  { %v2310_v43 = vpop.eup %2309 }
 0x92f   :  { %722 = vrot.lane.b32.xlu0 %v2310_v43, %s2431_s22 }
 0x930   :  { %v2312_v45 = vpop.eup %2311 }
 0x931   :  { %v716_v46 = vadd.f32 1.0, %v2312_v45 }
 0x933   :  { %2313 = vrcp.f32 %v716_v46 }
 0x940   :  { %v2314_v47 = vpop.eup %2313 }
 0x941   :  { %v720_v8 = vmul.f32 %v2314_v47, %v650_v32 }
 0x9a1   :  { %v723_v50 = vpop.permute.xlu0 %722 }
 0x9a2   :  { %v725_v51 = vmul.f32 %v2314_v47, %v723_v50 }
 0x9a4   :  { %727 = vrot.lane.b32.xlu1 %v725_v51, %s2431_s22 }
 0xa16   :  { %v728_v52 = vpop.permute.xlu1 %727 }
 0xa17   :  { %v730_v53 = vadd.f32 %v728_v52, %v720_v8 }
 0xa19   :  { %2315 = vtanh.f32 %v730_v53 }
 0xa26   :  { %v2316_v54 = vpop.eup %2315 }
 0xa27   :  { %733 = vrot.lane.b32.xlu0 %v2316_v54, %s2431_s22 }
 0xa99   :  { %v734_v55 = vpop.permute.xlu0 %733 }
 0xa9a   :  { %v2886_v56 = vmul.f32 %v2314_v47, %v734_v55 }
 0xa9c   :  { %v745_v57 = vpack.c.bf16 %v2886_v56, %v2886_v56 }
 0xa9e   :  { %747 = vrot.lane.b32.xlu1 %v745_v57, %s2432_s17 }
 0xb10   :  { %v748_v58 = vpop.permute.xlu1 %747 }
 0xb11   :  { %2158 = vmatmul.mubr.msk.bf16.vlgmr.msra.gmra.mxu0 %vm327_vm2, %v748_v58 }
 0xb12   :  { %2170 = vmatpush3.bf16.msra.mxu0 %v2479_v0  ;;  %2173 = vmatprep.mubr.msk.bf16.mxu0 %vm2429_vm0, %v2428_v1 }
 0xb13   :  { %2171 = vmatprep.subr.bf16.mxu0 %v2428_v1 }
 0xb16   :  { %2172 = vmatpush3.bf16.msra.mxu0 %v2489_v3 }
 0xbd1   :  { %v786_v60 = vpop.f32.mrf.mxu0 }
 0xbd2   :  { %v792_v61 = vadd.f32 %v786_v60, %v391_v59 }
 0xbd3   :  { %v2159_v62 = vpop.f32.mrf.mxu0 }
 0xbd4   :  { %2317 = vtanh.f32 %v792_v61  ;;  %v2002_v7 = vmul.f32 -1.442695, %v792_v61 }
 0xbd5   :  { %v789_v63 = vpop.f32.mrf.mxu0 }
 0xbd6   :  { %2319 = vpow2.f32 %v2002_v7  ;;  %v2279_v63 = vld [vmem:[%s3126_s2 + $0x18] sm:$0xff]  }
 0xbd7   :  { %v2160_v2 = vpop.f32.mrf.mxu0  ;;  %2185 = vmatprep.subr.bf16.mxu0 %v2279_v63 }
 0xbe1   :  { %v2318_v6 = vpop.eup %2317 }
 0xbe2   :  { %802 = vrot.lane.b32.xlu0 %v2318_v6, %s2431_s22 }
 0xbe3   :  { %v2320_v9 = vpop.eup %2319 }
 0xbe4   :  { %v796_v11 = vadd.f32 1.0, %v2320_v9 }
 0xbe6   :  { %2321 = vrcp.f32 %v796_v11 }
 0xbf3   :  { %v2322_v12 = vpop.eup %2321 }
 0xbf4   :  { %v800_v14 = vmul.f32 %v2322_v12, %v730_v53 }
 0xc54   :  { %v803_v17 = vpop.permute.xlu0 %802 }
 0xc55   :  { %v805_v18 = vmul.f32 %v2322_v12, %v803_v17 }
 0xc57   :  { %807 = vrot.lane.b32.xlu1 %v805_v18, %s2431_s22 }
 0xcc9   :  { %v808_v19 = vpop.permute.xlu1 %807 }
 0xcca   :  { %v810_v20 = vadd.f32 %v808_v19, %v800_v14  ;;  %v2961_v19 = vld [vmem:[%s3127_s3 + $0x18] sm:$0xff]  }
 0xccc   :  { %2323 = vtanh.f32 %v810_v20 }
 0xcd9   :  { %v2324_v21 = vpop.eup %2323 }
 0xcda   :  { %813 = vrot.lane.b32.xlu0 %v2324_v21, %s2431_s22 }
 0xd4c   :  { %v814_v22 = vpop.permute.xlu0 %813 }
 0xd4d   :  { %v2902_v23 = vmul.f32 %v2322_v12, %v814_v22  ;;  %v402_v22 = vadd.f32 %v2859_v15, %v2670_v49 }
 0xd4f   :  { %v825_v24 = vpack.c.bf16 %v2902_v23, %v2902_v23 }
 0xd51   :  { %827 = vrot.lane.b32.xlu1 %v825_v24, %s2432_s17 }
 0xdc3   :  { %v828_v26 = vpop.permute.xlu1 %827 }
 0xdc4   :  { %2166 = vmatmul.mubr.msk.bf16.vlgmr.msra.gmra.mxu1 %vm327_vm2, %v828_v26 }
 0xdc5   :  { %2178 = vmatpush3.bf16.msra.mxu1 %v2479_v0  ;;  %2181 = vmatprep.mubr.msk.bf16.mxu1 %vm2429_vm0, %v2428_v1 }
 0xdc6   :  { %2179 = vmatprep.subr.bf16.mxu1 %v2428_v1 }
 0xdc9   :  { %2180 = vmatpush3.bf16.msra.mxu1 %v2489_v3 }
 0xdca   :  { %2197 = vmatprep.subr.bf16.mxu1 %v2428_v1 }
 0xe84   :  { %v866_v28 = vpop.f32.mrf.mxu1 }
 0xe85   :  { %v872_v29 = vadd.f32 %v866_v28, %v394_v27 }
 0xe86   :  { %v2167_v30 = vpop.f32.mrf.mxu1 }
 0xe87   :  { %2325 = vtanh.f32 %v872_v29  ;;  %v2004_v0 = vmul.f32 -1.442695, %v872_v29  ;;  %v2994_v30 = vld [vmem:[%s3128_s4 + $0x1] ss:$0 sm:$0xff] }
 0xe88   :  { %v869_v48 = vpop.f32.mrf.mxu1 }
 0xe89   :  { %2327 = vpow2.f32 %v2004_v0 }
 0xe8a   :  { %v2168_v31 = vpop.f32.mrf.mxu1 }
 0xe94   :  { %v2326_v32 = vpop.eup %2325 }
 0xe95   :  { %882 = vrot.lane.b32.xlu0 %v2326_v32, %s2431_s22 }
 0xe96   :  { %v2328_v33 = vpop.eup %2327 }
 0xe97   :  { %v876_v34 = vadd.f32 1.0, %v2328_v33 }
 0xe99   :  { %2329 = vrcp.f32 %v876_v34 }
 0xea6   :  { %v2330_v3 = vpop.eup %2329 }
 0xea7   :  { %v880_v16 = vmul.f32 %v2330_v3, %v810_v20  ;;  %v2969_v20 = vld [vmem:[%s3127_s3 + $0x10] sm:$0xff]  }
 0xf07   :  { %v883_v36 = vpop.permute.xlu0 %882 }
 0xf08   :  { %v885_v37 = vmul.f32 %v2330_v3, %v883_v36 }
 0xf0a   :  { %887 = vrot.lane.b32.xlu1 %v885_v37, %s2431_s22 }
 0xf7c   :  { %v888_v25 = vpop.permute.xlu1 %887 }
 0xf7d   :  { %v890_v38 = vadd.f32 %v888_v25, %v880_v16 }
 0xf7f   :  { %2331 = vtanh.f32 %v890_v38 }
 0xf8c   :  { %v2332_v39 = vpop.eup %2331 }
 0xf8d   :  { %893 = vrot.lane.b32.xlu0 %v2332_v39, %s2431_s22 }
 0xfff   :  { %v894_v40 = vpop.permute.xlu0 %893 }
0x1000   :  { %v2919_v41 = vmul.f32 %v2330_v3, %v894_v40 }
0x1002   :  { %v905_v42 = vpack.c.bf16 %v2919_v41, %v2919_v41 }
0x1004   :  { %907 = vrot.lane.b32.xlu1 %v905_v42, %s2432_s17 }
0x1076   :  { %v908_v43 = vpop.permute.xlu1 %907 }
0x1077   :  { %2174 = vmatmul.mubr.msk.bf16.vlgmr.msra.gmra.mxu0 %vm327_vm2, %v908_v43 }
0x1078   :  { %2186 = vmatpush3.bf16.msra.mxu0 %v2279_v63 }
0x1137   :  { %v946_v45 = vpop.f32.mrf.mxu0 }
0x1138   :  { %v952_v46 = vadd.f32 %v946_v45, %v399_v44 }
0x1139   :  { %v2175_v47 = vpop.f32.mrf.mxu0 }
0x113a   :  { %2333 = vtanh.f32 %v952_v46  ;;  %v2006_v52 = vmul.f32 -1.442695, %v952_v46 }
0x113b   :  { %v949_v50 = vpop.f32.mrf.mxu0 }
0x113c   :  { %2335 = vpow2.f32 %v2006_v52 }
0x113d   :  { %v2176_v51 = vpop.f32.mrf.mxu0 }
0x1147   :  { %v2334_v8 = vpop.eup %2333 }
0x1148   :  { %962 = vrot.lane.b32.xlu0 %v2334_v8, %s2431_s22 }
0x1149   :  { %v2336_v53 = vpop.eup %2335 }
0x114a   :  { %v956_v54 = vadd.f32 1.0, %v2336_v53 }
0x114c   :  { %2337 = vrcp.f32 %v956_v54 }
0x1159   :  { %v2338_v55 = vpop.eup %2337 }
0x115a   :  { %v960_v13 = vmul.f32 %v2338_v55, %v890_v38 }
0x11ba   :  { %v963_v57 = vpop.permute.xlu0 %962 }
0x11bb   :  { %v965_v58 = vmul.f32 %v2338_v55, %v963_v57 }
0x11bd   :  { %967 = vrot.lane.b32.xlu1 %v965_v58, %s2431_s22 }
0x11c1   :  { %499 = vrot.lane.b32.xlu1 %v2676_v4, %s2432_s17  ;;  %v2280_v4 = vld [vmem:[%s3126_s2 + $0x10] sm:$0xff]  }
0x11c2   :  { %2187 = vmatprep.subr.bf16.mxu0 %v2280_v4 }
0x11c3   :  { %2188 = vmatpush3.bf16.msra.mxu0 %v2280_v4 }
0x11c4   :  { %2213 = vmatprep.subr.bf16.mxu0 %v2428_v1 }
0x11c5   :  { %658 = vrot.lane.b32.xlu1 %v2869_v35, %s2432_s17 }
0x122f   :  { %v968_v59 = vpop.permute.xlu1 %967 }
0x1230   :  { %v2933_v60 = vadd.f32 %v968_v59, %v960_v13 }
0x1232   :  { %2339 = vtanh.f32 %v2933_v60 }
0x1233   :  { %v500_v61 = vpop.permute.xlu1 %499 }
0x1234   :  { %502 = vst.msk [vmem:[#allocation2] sm:$0xff] %vm327_vm2, %v500_v61 }
0x1237   :  { %v659_v62 = vpop.permute.xlu1 %658 }
0x1238   :  { %662 = vst.msk [vmem:[#allocation2 + $0x10] sm:$0xff] %vm327_vm2, %v659_v62 }
0x123b   :  { %v1063_v12 = vld [vmem:[#allocation2] sm:$0xff] }
0x123f   :  { %v2340_v35 = vpop.eup %2339 }
0x1240   :  { %973 = vrot.lane.b32.xlu0 %v2340_v35, %s2431_s22 }
0x1244   :  { %578 = vrot.lane.b32.xlu0 %v2843_v10, %s2432_s17 }
0x1248   :  { %738 = vrot.lane.b32.xlu0 %v2886_v56, %s2432_s17  ;;  %v1065_v56 = vld [vmem:[#allocation2 + $0x10] sm:$0xff] }
0x12b2   :  { %v974_v2 = vpop.permute.xlu0 %973 }
0x12b3   :  { %v2950_v6 = vmul.f32 %v2338_v55, %v974_v2 }
0x12b5   :  { %v985_v7 = vpack.c.bf16 %v2950_v6, %v2950_v6 }
0x12b6   :  { %v579_v9 = vpop.permute.xlu0 %578 }
0x12b7   :  { %582 = vst.msk [vmem:[#allocation2 + $0x8] sm:$0xff] %vm327_vm2, %v579_v9  ;;  %987 = vrot.lane.b32.xlu1 %v985_v7, %s2432_s17 }
0x12ba   :  { %v739_v11 = vpop.permute.xlu0 %738 }
0x12bb   :  { %742 = vst.msk [vmem:[#allocation2 + $0x18] sm:$0xff] %vm327_vm2, %v739_v11 }
0x12be   :  { %v1064_v17 = vld [vmem:[#allocation2 + $0x8] sm:$0xff] }
0x12bf   :  { %v1071_v10 = vpack.c.bf16 %v1064_v17, %v1063_v12 }
0x12c1   :  { %2189 = vmatprep.mubr.msk.bf16.mxu0 %vm327_vm2, %v1071_v10 }
0x12c2   :  { %v1066_v18 = vld [vmem:[#allocation2 + $0x18] sm:$0xff] }
0x12c3   :  { %v1072_v14 = vpack.c.bf16 %v1066_v18, %v1065_v56 }
0x12c5   :  { %2190 = vmatmul.mubr.msk.bf16.vlgmr.msra.gmra.mxu0 %vm327_vm2, %v1072_v14 }
0x12c6   :  { %2214 = vmatpush3.bf16.msra.mxu0 %v2961_v19 }
0x12c7   :  { %2215 = vmatprep.subr.bf16.mxu0 %v2428_v1 }
0x12ca   :  { %2216 = vmatpush3.bf16.msra.mxu0 %v2969_v20 }
0x12cb   :  { %2229 = vmatprep.subr.bf16.mxu0 %v2428_v1 }
0x1329   :  { %v988_v21 = vpop.permute.xlu1 %987 }
0x132a   :  { %2182 = vmatmul.mubr.msk.bf16.vlgmr.msra.gmra.mxu1 %vm327_vm2, %v988_v21 }
0x132b   :  { %2198 = vmatpush3.bf16.msra.mxu1 %v2961_v19  ;;  %2201 = vmatprep.mubr.msk.bf16.mxu1 %vm2429_vm0, %v2428_v1 }
0x132c   :  { %2199 = vmatprep.subr.bf16.mxu1 %v2428_v1 }
0x132f   :  { %2200 = vmatpush3.bf16.msra.mxu1 %v2969_v20 }
0x1330   :  { %2205 = vmatprep.subr.bf16.mxu1 %v2428_v1 }
0x1332   :  { %2202 = vmatmul.mubr.bf16.vlgmr.msra.gmra.mxu1 %v2430_v5 }
0x1333   :  { %2206 = vmatpush3.bf16.msra.mxu1 %v2961_v19  ;;  %2209 = vmatprep.mubr.msk.bf16.mxu1 %vm2429_vm0, %v2428_v1 }
0x1334   :  { %2207 = vmatprep.subr.bf16.mxu1 %v2428_v1 }
0x1337   :  { %2208 = vmatpush3.bf16.msra.mxu1 %v2969_v20 }
0x1338   :  { %2221 = vmatprep.subr.bf16.mxu1 %v2428_v1 }
0x1385   :  { %v2989_v24 = vpop.f32.mrf.mxu0 }
0x1387   :  { %v1146_v5 = vpop.f32.mrf.mxu0 }
0x1388   :  { %v1147_v31 = vadd.f32 %v2994_v30, %v1146_v5 }
0x1389   :  { %v3018_v63 = vpop.f32.mrf.mxu0 }
0x138b   :  { %v1149_v4 = vpop.f32.mrf.mxu0 }
0x138c   :  { %v1150_v35 = vadd.f32 %v2994_v30, %v1149_v4 }
0x13ea   :  { %v1026_v26 = vpop.f32.mrf.mxu1 }
0x13eb   :  { %v1032_v27 = vadd.f32 %v1026_v26, %v402_v22 }
0x13ec   :  { %v2183_v28 = vpop.f32.mrf.mxu1 }
0x13ed   :  { %v2008_v45 = vmul.f32 -1.442695, %v1032_v27 }
0x13ee   :  { %v1029_v29 = vpop.f32.mrf.mxu1 }
0x13f0   :  { %v2184_v48 = vpop.f32.mrf.mxu1 }
0x13f2   :  { %v1237_v32 = vpop.f32.mrf.mxu1 }
0x13f3   :  { %v1243_v0 = vadd.f32 %v1237_v32, %v1147_v31 }
0x13f4   :  { %v2203_v33 = vpop.f32.mrf.mxu1 }
0x13f5   :  { %2341 = vtanh.f32 %v1243_v0  ;;  %v2027_v3 = vmul.f32 -1.442695, %v1243_v0 }
0x13f6   :  { %v1240_v49 = vpop.f32.mrf.mxu1 }
0x13f7   :  { %2343 = vpow2.f32 %v2027_v3 }
0x13f8   :  { %v2204_v15 = vpop.f32.mrf.mxu1 }
0x1402   :  { %v2342_v34 = vpop.eup %2341 }
0x1403   :  { %1253 = vrot.lane.b32.xlu0 %v2342_v34, %s2431_s22 }
0x1404   :  { %v2344_v36 = vpop.eup %2343 }
0x1405   :  { %v1247_v37 = vadd.f32 1.0, %v2344_v36 }
0x1407   :  { %2345 = vrcp.f32 %v1247_v37 }
0x1414   :  { %v2346_v16 = vpop.eup %2345 }
0x1415   :  { %v1251_v39 = vmul.f32 0.0, %v2346_v16 }
0x1475   :  { %v1254_v25 = vpop.permute.xlu0 %1253 }
0x1476   :  { %v1256_v38 = vmul.f32 %v2346_v16, %v1254_v25 }
0x1478   :  { %1258 = vrot.lane.b32.xlu1 %v1256_v38, %s2431_s22  ;;  %v1155_v38 = vadd.f32 %v2989_v24, %v2994_v30 }
0x14ea   :  { %v1259_v40 = vpop.permute.xlu1 %1258 }
0x14eb   :  { %v1261_v42 = vadd.f32 %v1259_v40, %v1251_v39 }
0x14ed   :  { %2347 = vtanh.f32 %v1261_v42 }
0x14ee   :  { %2349 = vtanh.f32 %v1032_v27 }
0x14ef   :  { %2351 = vpow2.f32 %v2008_v45 }
0x14fa   :  { %v2348_v43 = vpop.eup %2347 }
0x14fb   :  { %1264 = vrot.lane.b32.xlu0 %v2348_v43, %s2431_s22  ;;  %v2350_v44 = vpop.eup %2349 }
0x14fc   :  { %v2352_v46 = vpop.eup %2351 }
0x14fd   :  { %v1036_v47 = vadd.f32 1.0, %v2352_v46 }
0x14ff   :  { %1042 = vrot.lane.b32.xlu0 %v2350_v44, %s2431_s22  ;;  %2353 = vrcp.f32 %v1036_v47 }
0x150c   :  { %v2354_v52 = vpop.eup %2353 }
0x150d   :  { %v1040_v57 = vmul.f32 %v2354_v52, %v2933_v60 }
0x156d   :  { %v1265_v50 = vpop.permute.xlu0 %1264 }
0x156e   :  { %v1267_v51 = vmul.f32 %v2346_v16, %v1265_v50 }
0x1570   :  { %v1269_v8 = vpack.c.bf16 %v1267_v51, %v1267_v51 }
0x1571   :  { %v1043_v53 = vpop.permute.xlu0 %1042 }
0x1572   :  { %v1045_v54 = vmul.f32 %v2354_v52, %v1043_v53  ;;  %1271 = vrot.lane.b32.xlu1 %v1269_v8, %s2432_s17 }
0x1574   :  { %1047 = vrot.lane.b32.xlu0 %v1045_v54, %s2431_s22 }
0x15e4   :  { %v1272_v55 = vpop.permute.xlu1 %1271 }
0x15e5   :  { %2210 = vmatmul.mubr.msk.bf16.vlgmr.msra.gmra.mxu1 %vm327_vm2, %v1272_v55 }
0x15e6   :  { %v1048_v58 = vpop.permute.xlu0 %1047  ;;  %2222 = vmatpush3.bf16.msra.mxu1 %v2961_v19  ;;  %2225 = vmatprep.mubr.msk.bf16.mxu1 %vm2429_vm0, %v2428_v1 }
0x15e7   :  { %v1050_v13 = vadd.f32 %v1048_v58, %v1040_v57  ;;  %2223 = vmatprep.subr.bf16.mxu1 %v2428_v1 }
0x15e9   :  { %2355 = vtanh.f32 %v1050_v13 }
0x15ea   :  { %2224 = vmatpush3.bf16.msra.mxu1 %v2969_v20 }
0x15eb   :  { %2237 = vmatprep.subr.bf16.mxu1 %v2428_v1 }
0x15f6   :  { %v2356_v59 = vpop.eup %2355 }
0x15f7   :  { %1053 = vrot.lane.b32.xlu0 %v2356_v59, %s2431_s22 }
0x15fb   :  { %818 = vrot.lane.b32.xlu0 %v2902_v23, %s2432_s17 }
0x15ff   :  { %978 = vrot.lane.b32.xlu0 %v2950_v6, %s2432_s17 }
0x1669   :  { %v1054_v60 = vpop.permute.xlu0 %1053 }
0x166a   :  { %v1056_v28 = vmul.f32 %v2354_v52, %v1054_v60  ;;  %v1158_v60 = vadd.f32 %v3018_v63, %v2994_v30 }
0x166d   :  { %v819_v61 = vpop.permute.xlu0 %818 }
0x166e   :  { %822 = vst.msk [vmem:[#allocation2 + $0x20] sm:$0xff] %vm327_vm2, %v819_v61 }
0x1671   :  { %v979_v62 = vpop.permute.xlu0 %978 }
0x1672   :  { %982 = vst.msk [vmem:[#allocation2 + $0x30] sm:$0xff] %vm327_vm2, %v979_v62 }
0x1675   :  { %v1067_v0 = vld [vmem:[#allocation2 + $0x20] sm:$0xff] }
0x16a5   :  { %v1310_v2 = vpop.f32.mrf.mxu1 }
0x16a6   :  { %v1316_v7 = vadd.f32 %v1310_v2, %v1150_v35 }
0x16a7   :  { %v2211_v9 = vpop.f32.mrf.mxu1 }
0x16a8   :  { %2357 = vtanh.f32 %v1316_v7  ;;  %v2029_v6 = vmul.f32 -1.442695, %v1316_v7 }
0x16a9   :  { %v1313_v23 = vpop.f32.mrf.mxu1 }
0x16aa   :  { %2359 = vpow2.f32 %v2029_v6 }
0x16ab   :  { %v2212_v11 = vpop.f32.mrf.mxu1 }
0x16b5   :  { %v2358_v12 = vpop.eup %2357 }
0x16b6   :  { %1326 = vrot.lane.b32.xlu1 %v2358_v12, %s2431_s22 }
0x16b7   :  { %v2360_v17 = vpop.eup %2359 }
0x16b8   :  { %v1320_v10 = vadd.f32 1.0, %v2360_v17 }
0x16ba   :  { %2361 = vrcp.f32 %v1320_v10 }
0x16c7   :  { %v2362_v56 = vpop.eup %2361 }
0x16c8   :  { %v1324_v21 = vmul.f32 %v2362_v56, %v1261_v42 }
0x1728   :  { %v1327_v18 = vpop.permute.xlu1 %1326 }
0x1729   :  { %v1329_v14 = vmul.f32 %v2362_v56, %v1327_v18 }
0x172b   :  { %1331 = vrot.lane.b32.xlu1 %v1329_v14, %s2431_s22 }
0x179d   :  { %v1332_v22 = vpop.permute.xlu1 %1331 }
0x179e   :  { %v1334_v26 = vadd.f32 %v1332_v22, %v1324_v21 }
0x17a0   :  { %2363 = vtanh.f32 %v1334_v26 }
0x17ad   :  { %v2364_v27 = vpop.eup %2363 }
0x17ae   :  { %1337 = vrot.lane.b32.xlu1 %v2364_v27, %s2431_s22 }
0x17b2   :  { %898 = vrot.lane.b32.xlu1 %v2919_v41, %s2432_s17  ;;  %v1069_v41 = vld [vmem:[#allocation2 + $0x30] sm:$0xff] }
0x17b6   :  { %1058 = vrot.lane.b32.xlu1 %v1056_v28, %s2432_s17 }
0x1820   :  { %v1338_v5 = vpop.permute.xlu1 %1337 }
0x1821   :  { %v1340_v29 = vmul.f32 %v2362_v56, %v1338_v5 }
0x1823   :  { %v1342_v48 = vpack.c.bf16 %v1340_v29, %v1340_v29 }
0x1824   :  { %v899_v31 = vpop.permute.xlu1 %898 }
0x1825   :  { %902 = vst.msk [vmem:[#allocation2 + $0x28] sm:$0xff] %vm327_vm2, %v899_v31  ;;  %1344 = vrot.lane.b32.xlu0 %v1342_v48, %s2432_s17 }
0x1828   :  { %v1059_v32 = vpop.permute.xlu1 %1058 }
0x1829   :  { %1062 = vst.msk [vmem:[#allocation2 + $0x38] sm:$0xff] %vm327_vm2, %v1059_v32 }
0x182c   :  { %v1068_v33 = vld [vmem:[#allocation2 + $0x28] sm:$0xff] }
0x182d   :  { %v1073_v49 = vpack.c.bf16 %v1068_v33, %v1067_v0 }
0x182f   :  { %2193 = vmatprep.mubr.msk.bf16.mxu0 %vm327_vm2, %v1073_v49 }
0x1830   :  { %v1070_v15 = vld [vmem:[#allocation2 + $0x38] sm:$0xff] }
0x1831   :  { %v1074_v34 = vpack.c.bf16 %v1070_v15, %v1069_v41 }
0x1833   :  { %2194 = vmatmul.mubr.msk.bf16.gmra.mxu0 %vm327_vm2, %v1074_v34 }
0x1834   :  { %2217 = vmatprep.mubr.msk.bf16.mxu0 %vm2429_vm0, %v2428_v1 }
0x1897   :  { %v1345_v3 = vpop.permute.xlu0 %1344 }
0x1898   :  { %2218 = vmatmul.mubr.msk.bf16.vlgmr.msra.gmra.mxu0 %vm327_vm2, %v1345_v3 }
0x1899   :  { %2230 = vmatpush3.bf16.msra.mxu0 %v2961_v19  ;;  %2233 = vmatprep.mubr.msk.bf16.mxu0 %vm2429_vm0, %v2428_v1 }
0x189a   :  { %2231 = vmatprep.subr.bf16.mxu0 %v2428_v1 }
0x189d   :  { %2232 = vmatpush3.bf16.msra.mxu0 %v2969_v20 }
0x189e   :  { %2245 = vmatprep.subr.bf16.mxu0 %v2428_v1 }
0x18f3   :  { %v3041_v36 = vpop.f32.mrf.mxu0 }
0x18f5   :  { %v3043_v37 = vpop.f32.mrf.mxu0 }
0x18f6   :  { %v1163_v27 = vadd.f32 %v2994_v30, %v3043_v37 }
0x18f7   :  { %v3045_v16 = vpop.f32.mrf.mxu0 }
0x18f9   :  { %v3047_v25 = vpop.f32.mrf.mxu0 }
0x1958   :  { %v1383_v39 = vpop.f32.mrf.mxu0 }
0x1959   :  { %v1389_v40 = vadd.f32 %v1383_v39, %v1155_v38 }
0x195a   :  { %v2219_v42 = vpop.f32.mrf.mxu0 }
0x195b   :  { %2365 = vtanh.f32 %v1389_v40  ;;  %v2031_v46 = vmul.f32 -1.442695, %v1389_v40 }
0x195c   :  { %v1386_v43 = vpop.f32.mrf.mxu0 }
0x195d   :  { %2367 = vpow2.f32 %v2031_v46 }
0x195e   :  { %v2220_v44 = vpop.f32.mrf.mxu0 }
0x1968   :  { %v2366_v45 = vpop.eup %2365 }
0x1969   :  { %1399 = vrot.lane.b32.xlu1 %v2366_v45, %s2431_s22  ;;  %v1166_v45 = vadd.f32 %v2994_v30, %v3047_v25 }
0x196a   :  { %v2368_v47 = vpop.eup %2367 }
0x196b   :  { %v1393_v50 = vadd.f32 1.0, %v2368_v47 }
0x196d   :  { %2369 = vrcp.f32 %v1393_v50 }
0x197a   :  { %v2370_v51 = vpop.eup %2369 }
0x197b   :  { %v1397_v24 = vmul.f32 %v2370_v51, %v1334_v26 }
0x19db   :  { %v1400_v8 = vpop.permute.xlu1 %1399 }
0x19dc   :  { %v1402_v52 = vmul.f32 %v2370_v51, %v1400_v8 }
0x19de   :  { %1404 = vrot.lane.b32.xlu0 %v1402_v52, %s2431_s22 }
0x1a50   :  { %v1405_v53 = vpop.permute.xlu0 %1404 }
0x1a51   :  { %v1407_v54 = vadd.f32 %v1405_v53, %v1397_v24 }
0x1a53   :  { %2371 = vtanh.f32 %v1407_v54 }
0x1a60   :  { %v2372_v55 = vpop.eup %2371 }
0x1a61   :  { %1410 = vrot.lane.b32.xlu1 %v2372_v55, %s2431_s22 }
0x1ad3   :  { %v1411_v57 = vpop.permute.xlu1 %1410 }
0x1ad4   :  { %v1413_v58 = vmul.f32 %v2370_v51, %v1411_v57 }
0x1ad6   :  { %v1415_v13 = vpack.c.bf16 %v1413_v58, %v1413_v58 }
0x1ad8   :  { %1417 = vrot.lane.b32.xlu0 %v1415_v13, %s2432_s17 }
0x1b4a   :  { %v1418_v59 = vpop.permute.xlu0 %1417 }
0x1b4b   :  { %2226 = vmatmul.mubr.msk.bf16.vlgmr.msra.gmra.mxu1 %vm327_vm2, %v1418_v59 }
0x1b4c   :  { %2238 = vmatpush3.bf16.msra.mxu1 %v2961_v19  ;;  %2241 = vmatprep.mubr.msk.bf16.mxu1 %vm2429_vm0, %v2428_v1 }
0x1b4d   :  { %2239 = vmatprep.subr.bf16.mxu1 %v2428_v1 }
0x1b50   :  { %2240 = vmatpush3.bf16.msra.mxu1 %v2969_v20 }
0x1b51   :  { %2253 = vmatprep.subr.bf16.mxu1 %v2428_v1 }
0x1c0b   :  { %v1456_v61 = vpop.f32.mrf.mxu1 }
0x1c0c   :  { %v1462_v62 = vadd.f32 %v1456_v61, %v1158_v60 }
0x1c0d   :  { %v2227_v4 = vpop.f32.mrf.mxu1 }
0x1c0e   :  { %2373 = vtanh.f32 %v1462_v62  ;;  %v2033_v9 = vmul.f32 -1.442695, %v1462_v62  ;;  %v1171_v4 = vadd.f32 %v3041_v36, %v2994_v30 }
0x1c0f   :  { %v1459_v35 = vpop.f32.mrf.mxu1 }
0x1c10   :  { %2375 = vpow2.f32 %v2033_v9 }
0x1c11   :  { %v2228_v2 = vpop.f32.mrf.mxu1 }
0x1c1b   :  { %v2374_v7 = vpop.eup %2373 }
0x1c1c   :  { %1472 = vrot.lane.b32.xlu1 %v2374_v7, %s2431_s22 }
0x1c1d   :  { %v2376_v23 = vpop.eup %2375 }
0x1c1e   :  { %v1466_v11 = vadd.f32 1.0, %v2376_v23 }
0x1c20   :  { %2377 = vrcp.f32 %v1466_v11 }
0x1c2d   :  { %v2378_v12 = vpop.eup %2377 }
0x1c2e   :  { %v1470_v63 = vmul.f32 %v2378_v12, %v1407_v54 }
0x1c8e   :  { %v1473_v6 = vpop.permute.xlu1 %1472 }
0x1c8f   :  { %v1475_v17 = vmul.f32 %v2378_v12, %v1473_v6 }
0x1c91   :  { %1477 = vrot.lane.b32.xlu0 %v1475_v17, %s2431_s22 }
0x1d03   :  { %v1478_v10 = vpop.permute.xlu0 %1477 }
0x1d04   :  { %v1480_v56 = vadd.f32 %v1478_v10, %v1470_v63 }
0x1d06   :  { %2379 = vtanh.f32 %v1480_v56 }
0x1d13   :  { %v2380_v18 = vpop.eup %2379 }
0x1d14   :  { %1483 = vrot.lane.b32.xlu1 %v2380_v18, %s2431_s22 }
0x1d86   :  { %v1484_v14 = vpop.permute.xlu1 %1483 }
0x1d87   :  { %v1486_v21 = vmul.f32 %v2378_v12, %v1484_v14 }
0x1d89   :  { %v1488_v22 = vpack.c.bf16 %v1486_v21, %v1486_v21 }
0x1d8b   :  { %1490 = vrot.lane.b32.xlu0 %v1488_v22, %s2432_s17 }
0x1dfd   :  { %v1491_v26 = vpop.permute.xlu0 %1490 }
0x1dfe   :  { %2234 = vmatmul.mubr.msk.bf16.vlgmr.msra.gmra.mxu0 %vm327_vm2, %v1491_v26 }
0x1dff   :  { %2246 = vmatpush3.bf16.msra.mxu0 %v2961_v19  ;;  %2249 = vmatprep.mubr.msk.bf16.mxu0 %vm2429_vm0, %v2428_v1 }
0x1e00   :  { %2247 = vmatprep.subr.bf16.mxu0 %v2428_v1 }
0x1e03   :  { %2248 = vmatpush3.bf16.msra.mxu0 %v2969_v20 }
0x1e04   :  { %2261 = vmatprep.subr.bf16.mxu0 %v2428_v1 }
0x1ebe   :  { %v1529_v28 = vpop.f32.mrf.mxu0 }
0x1ebf   :  { %v1535_v5 = vadd.f32 %v1529_v28, %v1163_v27 }
0x1ec0   :  { %v2235_v29 = vpop.f32.mrf.mxu0 }
0x1ec1   :  { %2381 = vtanh.f32 %v1535_v5  ;;  %v2035_v0 = vmul.f32 -1.442695, %v1535_v5  ;;  %v1174_v5 = vadd.f32 %v3045_v16, %v2994_v30 }
0x1ec2   :  { %v1532_v48 = vpop.f32.mrf.mxu0 }
0x1ec3   :  { %2383 = vpow2.f32 %v2035_v0 }
0x1ec4   :  { %v2236_v31 = vpop.f32.mrf.mxu0 }
0x1ece   :  { %v2382_v32 = vpop.eup %2381 }
0x1ecf   :  { %1545 = vrot.lane.b32.xlu1 %v2382_v32, %s2431_s22 }
0x1ed0   :  { %v2384_v33 = vpop.eup %2383 }
0x1ed1   :  { %v1539_v49 = vadd.f32 1.0, %v2384_v33 }
0x1ed3   :  { %2385 = vrcp.f32 %v1539_v49 }
0x1ee0   :  { %v2386_v41 = vpop.eup %2385 }
0x1ee1   :  { %v1543_v3 = vmul.f32 %v2386_v41, %v1480_v56 }
0x1f41   :  { %v1546_v15 = vpop.permute.xlu1 %1545 }
0x1f42   :  { %v1548_v34 = vmul.f32 %v2386_v41, %v1546_v15 }
0x1f44   :  { %1550 = vrot.lane.b32.xlu0 %v1548_v34, %s2431_s22 }
0x1fb6   :  { %v1551_v37 = vpop.permute.xlu0 %1550 }
0x1fb7   :  { %v1553_v38 = vadd.f32 %v1551_v37, %v1543_v3 }
0x1fb9   :  { %2387 = vtanh.f32 %v1553_v38 }
0x1fc6   :  { %v2388_v39 = vpop.eup %2387 }
0x1fc7   :  { %1556 = vrot.lane.b32.xlu1 %v2388_v39, %s2431_s22 }
0x2039   :  { %v1557_v40 = vpop.permute.xlu1 %1556 }
0x203a   :  { %v1559_v42 = vmul.f32 %v2386_v41, %v1557_v40  ;;  %v2283_v40 = vld [vmem:[%s3129_s5 + $0x8] sm:$0xff]  }
0x203c   :  { %v1561_v43 = vpack.c.bf16 %v1559_v42, %v1559_v42  ;;  %v2284_v42 = vld [vmem:[%s3129_s5] sm:$0xff]  }
0x203e   :  { %1563 = vrot.lane.b32.xlu0 %v1561_v43, %s2432_s17 }
0x20b0   :  { %v1564_v44 = vpop.permute.xlu0 %1563 }
0x20b1   :  { %2242 = vmatmul.mubr.msk.bf16.vlgmr.msra.gmra.mxu1 %vm327_vm2, %v1564_v44 }
0x20b2   :  { %2254 = vmatpush3.bf16.msra.mxu1 %v2961_v19  ;;  %2257 = vmatprep.mubr.msk.bf16.mxu1 %vm2429_vm0, %v2428_v1 }
0x20b3   :  { %2255 = vmatprep.subr.bf16.mxu1 %v2428_v1 }
0x20b6   :  { %2256 = vmatpush3.bf16.msra.mxu1 %v2969_v20 }
0x2171   :  { %v1602_v46 = vpop.f32.mrf.mxu1 }
0x2172   :  { %v1608_v47 = vadd.f32 %v1602_v46, %v1166_v45 }
0x2173   :  { %v2243_v50 = vpop.f32.mrf.mxu1 }
0x2174   :  { %2389 = vtanh.f32 %v1608_v47  ;;  %v2037_v19 = vmul.f32 -1.442695, %v1608_v47  ;;  %v2042_v50 = vld [vmem:[%s3130_s6] ss:$0 sm:$0xff] }
0x2175   :  { %v1605_v51 = vpop.f32.mrf.mxu1 }
0x2176   :  { %2391 = vpow2.f32 %v2037_v19 }
0x2177   :  { %v2244_v8 = vpop.f32.mrf.mxu1 }
0x2181   :  { %v2390_v52 = vpop.eup %2389 }
0x2182   :  { %1618 = vrot.lane.b32.xlu1 %v2390_v52, %s2431_s22 }
0x2183   :  { %v2392_v24 = vpop.eup %2391 }
0x2184   :  { %v1612_v53 = vadd.f32 1.0, %v2392_v24 }
0x2186   :  { %2393 = vrcp.f32 %v1612_v53 }
0x2193   :  { %v2394_v54 = vpop.eup %2393 }
0x2194   :  { %v1616_v25 = vmul.f32 %v2394_v54, %v1553_v38 }
0x21f4   :  { %v1619_v55 = vpop.permute.xlu1 %1618 }
0x21f5   :  { %v1621_v20 = vmul.f32 %v2394_v54, %v1619_v55 }
0x21f7   :  { %1623 = vrot.lane.b32.xlu0 %v1621_v20, %s2431_s22 }
0x2269   :  { %v1624_v57 = vpop.permute.xlu0 %1623 }
0x226a   :  { %v1626_v58 = vadd.f32 %v1624_v57, %v1616_v25 }
0x226c   :  { %2395 = vtanh.f32 %v1626_v58 }
0x2279   :  { %v2396_v13 = vpop.eup %2395 }
0x227a   :  { %1629 = vrot.lane.b32.xlu1 %v2396_v13, %s2431_s22 }
0x22ec   :  { %v1630_v59 = vpop.permute.xlu1 %1629 }
0x22ed   :  { %v1632_v60 = vmul.f32 %v2394_v54, %v1630_v59 }
0x22ef   :  { %v1634_v61 = vpack.c.bf16 %v1632_v60, %v1632_v60 }
0x22f1   :  { %1636 = vrot.lane.b32.xlu0 %v1634_v61, %s2432_s17 }
0x2363   :  { %v1637_v62 = vpop.permute.xlu0 %1636 }
0x2364   :  { %2250 = vmatmul.mubr.msk.bf16.vlgmr.msra.gmra.mxu0 %vm327_vm2, %v1637_v62 }
0x2365   :  { %2265 = vmatprep.mubr.msk.bf16.mxu0 %vm2429_vm0, %v2428_v1  ;;  %2262 = vmatpush3.bf16.msra.mxu0 %v2283_v40 }
0x2366   :  { %2263 = vmatprep.subr.bf16.mxu0 %v2428_v1 }
0x2369   :  { %2264 = vmatpush3.bf16.msra.mxu0 %v2284_v42 }
0x2424   :  { %v1675_v35 = vpop.f32.mrf.mxu0 }
0x2425   :  { %v1681_v2 = vadd.f32 %v1675_v35, %v1171_v4 }
0x2426   :  { %v2251_v7 = vpop.f32.mrf.mxu0 }
0x2427   :  { %2397 = vtanh.f32 %v1681_v2  ;;  %v2039_v12 = vmul.f32 -1.442695, %v1681_v2 }
0x2428   :  { %v1678_v9 = vpop.f32.mrf.mxu0 }
0x2429   :  { %2399 = vpow2.f32 %v2039_v12 }
0x242a   :  { %v2252_v23 = vpop.f32.mrf.mxu0 }
0x2434   :  { %v2398_v11 = vpop.eup %2397 }
0x2435   :  { %1691 = vrot.lane.b32.xlu1 %v2398_v11, %s2431_s22 }
0x2436   :  { %v2400_v6 = vpop.eup %2399 }
0x2437   :  { %v1685_v17 = vadd.f32 1.0, %v2400_v6 }
0x2439   :  { %2401 = vrcp.f32 %v1685_v17 }
0x2446   :  { %v2402_v63 = vpop.eup %2401 }
0x2447   :  { %v1689_v36 = vmul.f32 %v2402_v63, %v1626_v58 }
0x24a7   :  { %v1692_v10 = vpop.permute.xlu1 %1691 }
0x24a8   :  { %v1694_v56 = vmul.f32 %v2402_v63, %v1692_v10 }
0x24aa   :  { %1696 = vrot.lane.b32.xlu0 %v1694_v56, %s2431_s22 }
0x251c   :  { %v1697_v18 = vpop.permute.xlu0 %1696 }
0x251d   :  { %v1699_v14 = vadd.f32 %v1697_v18, %v1689_v36 }
0x251f   :  { %2403 = vtanh.f32 %v1699_v14 }
0x252c   :  { %v2404_v21 = vpop.eup %2403 }
0x252d   :  { %1702 = vrot.lane.b32.xlu1 %v2404_v21, %s2431_s22 }
0x259f   :  { %v1703_v22 = vpop.permute.xlu1 %1702 }
0x25a0   :  { %v1705_v26 = vmul.f32 %v2402_v63, %v1703_v22 }
0x25a2   :  { %v1707_v27 = vpack.c.bf16 %v1705_v26, %v1705_v26 }
0x25a4   :  { %1709 = vrot.lane.b32.xlu0 %v1707_v27, %s2432_s17 }
0x2616   :  { %v1710_v28 = vpop.permute.xlu0 %1709 }
0x2617   :  { %2258 = vmatmul.mubr.msk.bf16.vlgmr.msra.gmra.mxu1 %vm327_vm2, %v1710_v28 }
0x26d7   :  { %v1748_v29 = vpop.f32.mrf.mxu1 }
0x26d8   :  { %v1754_v48 = vadd.f32 %v1748_v29, %v1174_v5 }
0x26d9   :  { %v2259_v31 = vpop.f32.mrf.mxu1 }
0x26da   :  { %2405 = vtanh.f32 %v1754_v48  ;;  %v2041_v49 = vmul.f32 -1.442695, %v1754_v48 }
0x26db   :  { %v1751_v32 = vpop.f32.mrf.mxu1 }
0x26dc   :  { %2407 = vpow2.f32 %v2041_v49 }
0x26dd   :  { %v2260_v0 = vpop.f32.mrf.mxu1 }
0x26e7   :  { %v2406_v33 = vpop.eup %2405 }
0x26e8   :  { %1764 = vrot.lane.b32.xlu1 %v2406_v33, %s2431_s22 }
0x26e9   :  { %v2408_v41 = vpop.eup %2407 }
0x26ea   :  { %v1758_v15 = vadd.f32 1.0, %v2408_v41 }
0x26ec   :  { %2409 = vrcp.f32 %v1758_v15 }
0x26f9   :  { %v2410_v34 = vpop.eup %2409 }
0x26fa   :  { %v1762_v30 = vmul.f32 %v2410_v34, %v1699_v14 }
0x275a   :  { %v1765_v3 = vpop.permute.xlu1 %1764 }
0x275b   :  { %v1767_v37 = vmul.f32 %v2410_v34, %v1765_v3 }
0x275d   :  { %1769 = vrot.lane.b32.xlu0 %v1767_v37, %s2431_s22 }
0x27cf   :  { %v1770_v16 = vpop.permute.xlu0 %1769 }
0x27d0   :  { %v1772_v38 = vadd.f32 %v1770_v16, %v1762_v30 }
0x27d2   :  { %2411 = vtanh.f32 %v1772_v38 }
0x27df   :  { %v2412_v39 = vpop.eup %2411 }
0x27e0   :  { %1775 = vrot.lane.b32.xlu1 %v2412_v39, %s2431_s22 }
0x2852   :  { %v1776_v43 = vpop.permute.xlu1 %1775 }
0x2853   :  { %v1778_v44 = vmul.f32 %v2410_v34, %v1776_v43 }
0x2855   :  { %1780 = vrot.lane.b32.xlu0 %v1778_v44, %s2432_s17 }
0x28c7   :  { %v1781_v45 = vpop.permute.xlu0 %1780 }
0x28c8   :  { %1783 = vst.msk [vmem:[#allocation4] sm:$0xff] %vm327_vm2, %v1781_v45 }
0x28cf   :  { %v1784_v46 = vld [vmem:[#allocation4] sm:$0xff] }
0x28d0   :  { %v1785_v47 = vpack.c.bf16 %v1784_v46, %v1784_v46 }
0x28d2   :  { %2266 = vmatmul.mubr.msk.bf16.vlgmr.msra.gmra.mxu0 %vm327_vm2, %v1785_v47 }
0x2992   :  { %v1847_v51 = vpop.f32.mrf.mxu0 }
0x2993   :  { %v1848_v8 = vadd.f32 %v2042_v50, %v1847_v51 }
0x2994   :  { %v2267_v52 = vpop.f32.mrf.mxu0 }
0x2995   :  { %1853 = vst [vmem:[%s3131_s7] sm:$0xff] %v1848_v8 }
0x2996   :  { %v1850_v1 = vpop.f32.mrf.mxu0 }
0x2998   :  { %v2268_v19 = vpop.f32.mrf.mxu0 }

</bundles_post_ra>
